<compile_context>
chip_gen: v7x
topology: tpu7x:2x2x1
jax: 0.10.0
libtpu: 0.0.40
codegen_flags: <defaults>
</compile_context>

<pallas_src>
import math

import jax
import jax.numpy as jnp
from jax.experimental import pallas as pl
from jax.experimental.pallas import tpu as pltpu

# ----------------------------- config (small) -----------------------------
B = 2            # batch
NUM_SEG = 3      # number of segments (input_ids.shape[1] in the torch code)
S = 8            # sequence length
H = 32           # hidden size
NUM_HEADS = 2
DH = H // NUM_HEADS
INTER = 64       # FFN intermediate size
NUM_LAYERS = 2
VOCAB = 50
MAX_POS = 16
TYPE_VOCAB = 2
LN_EPS = 1e-12

NE = NUM_SEG * B         # total (segment, batch) examples = 6
M = NE * S               # flattened token rows per call = 48
NEG_INF = -1e9


# ----------------------------- small helpers ------------------------------
def _layernorm(x, gamma, beta):
    mu = jnp.mean(x, axis=-1, keepdims=True)
    var = jnp.mean((x - mu) ** 2, axis=-1, keepdims=True)
    return (x - mu) * jax.lax.rsqrt(var + LN_EPS) * gamma + beta


def _gelu(x):
    # tanh-approx GELU (EUP-friendly).
    # TODO(synk): exact erf GELU if bit-parity with torch nn.GELU is required.
    c = math.sqrt(2.0 / math.pi)
    return 0.5 * x * (1.0 + jnp.tanh(c * (x + 0.044715 * x * x * x)))


# --------------------------- fused Pallas kernel ---------------------------
def bert_fused_kernel(ids_ref, bias_ref, word_emb_ref, pt_emb_ref, emb_ln_ref,
                      w_qkv_ref, b_qkv_ref, w_o_ref, vecs_ref,
                      w_ff1_ref, b_ff1_ref, w_ff2_ref, out_ref):
    attn_bias = bias_ref[...]                        # (M, M) f32: block-diag + key mask

    # ---- embeddings: bf16 one-hot @ bf16 table (MXU) + pos/type + LayerNorm
    ids3 = ids_ref[...][:, :, None]                  # (NE, S, 1) int32
    vocab_iota = jax.lax.broadcasted_iota(jnp.int32, (NE, S, VOCAB), 2)
    onehot = (ids3 == vocab_iota).astype(jnp.bfloat16).reshape(M, VOCAB)
    x = jnp.dot(onehot, word_emb_ref[...],
                preferred_element_type=jnp.float32)  # (M, H) f32
    x = x + pt_emb_ref[...]                          # pos+type, pre-tiled to (M, H)
    x = _layernorm(x, emb_ln_ref[0, :], emb_ln_ref[1, :])

    scale = 1.0 / math.sqrt(DH)
    # static layer loop; stacked weights stay VMEM-resident for the whole call
    for l in range(NUM_LAYERS):
        w_qkv = w_qkv_ref[l]          # (H, 3H)            bf16
        b_qkv = b_qkv_ref[l]          # (1, 3H)             f32
        w_o_l = w_o_ref[l]            # (NUM_HEADS, DH, H)  bf16
        w_ff1 = w_ff1_ref[l]          # (H, INTER)          bf16
        b_ff1 = b_ff1_ref[l]          # (1, INTER)          f32
        w_ff2 = w_ff2_ref[l]          # (INTER, H)          bf16
        vecs = vecs_ref[l]            # (6, H) f32: [b_o, ln1_g, ln1_b, b_ff2, ln2_g, ln2_b]

        qkv = jnp.dot(x.astype(jnp.bfloat16), w_qkv,
                      preferred_element_type=jnp.float32) + b_qkv   # (M, 3H) f32
        qkv_bf = qkv.astype(jnp.bfloat16)            # single bf16 cast, sliced per head

        # flattened attention: one score matmul + one PV matmul per head over
        # ALL examples; cross-example / padded keys masked by attn_bias.
        attn_acc = jnp.zeros((M, H), jnp.float32)
        for hh in range(NUM_HEADS):
            lo = hh * DH
            q = qkv_bf[:, lo:lo + DH]                # (M, DH) bf16
            k = qkv_bf[:, H + lo:H + lo + DH]        # (M, DH) bf16
            v = qkv_bf[:, 2 * H + lo:2 * H + lo + DH]
            s = jax.lax.dot_general(q, k, (((1,), (1,)), ((), ())),
                                    preferred_element_type=jnp.float32)  # (M, M)
            s = s * scale + attn_bias
            s = s - jnp.max(s, axis=-1, keepdims=True)
            p = jnp.exp(s)
            p = p * pl.reciprocal(jnp.sum(p, axis=-1, keepdims=True), approx=True)
            ctx = jnp.dot(p.astype(jnp.bfloat16), v,
                          preferred_element_type=jnp.float32)            # (M, DH)
            # W_O split along its K axis per head -> no concat of head outputs
            attn_acc = attn_acc + jnp.dot(ctx.astype(jnp.bfloat16), w_o_l[hh],
                                          preferred_element_type=jnp.float32)

        h1 = _layernorm(x + attn_acc + vecs[0, :], vecs[1, :], vecs[2, :])  # (M, H)

        ff = jnp.dot(h1.astype(jnp.bfloat16), w_ff1,
                     preferred_element_type=jnp.float32) + b_ff1
        ff = _gelu(ff)
        ff = jnp.dot(ff.astype(jnp.bfloat16), w_ff2,
                     preferred_element_type=jnp.float32) + vecs[3, :]
        x = _layernorm(h1 + ff, vecs[4, :], vecs[5, :])                     # (M, H)

    # only the [CLS] row of every example goes back to HBM, as a flat 2D block
    out_ref[...] = x.reshape(NE, S, H)[:, 0, :]


# ------------------------------ parameter init -----------------------------
def init_params(key):
    def nrm(k, shape, scale=0.02):
        return (scale * jax.random.normal(k, shape)).astype(jnp.float32)

    keys = jax.random.split(key, 4 + NUM_LAYERS)
    wq, wk, wv, wo, wi, wo2 = [], [], [], [], [], []
    for li in range(NUM_LAYERS):
        lk = jax.random.split(keys[4 + li], 6)
        wq.append(nrm(lk[0], (H, H)))
        wk.append(nrm(lk[1], (H, H)))
        wv.append(nrm(lk[2], (H, H)))
        wo.append(nrm(lk[3], (H, H)))
        wi.append(nrm(lk[4], (H, INTER)))
        wo2.append(nrm(lk[5], (INTER, H)))

    w_qkv = jnp.stack([jnp.concatenate([wq[l], wk[l], wv[l]], axis=1)
                       for l in range(NUM_LAYERS)], axis=0)            # (L, H, 3H)
    # W_O stored per-head along its K (input) axis: (L, NUM_HEADS, DH, H)
    w_o = jnp.stack([wo[l].reshape(NUM_HEADS, DH, H) for l in range(NUM_LAYERS)],
                    axis=0)
    vecs_one = jnp.stack([jnp.zeros((H,)), jnp.ones((H,)), jnp.zeros((H,)),
                          jnp.zeros((H,)), jnp.ones((H,)), jnp.zeros((H,))], axis=0)

    return {
        "word_emb": nrm(keys[0], (VOCAB, H)).astype(jnp.bfloat16),     # bf16 MXU input
        "pos_emb": nrm(keys[1], (MAX_POS, H)),
        "type_emb": nrm(keys[2], (TYPE_VOCAB, H)),
        "emb_g": jnp.ones((H,), jnp.float32),
        "emb_b": jnp.zeros((H,), jnp.float32),
        # layer-stacked, packed weights (bf16 MXU inputs, f32 accumulate in-kernel)
        "w_qkv": w_qkv.astype(jnp.bfloat16),                           # (L, H, 3H)
        "b_qkv": jnp.zeros((NUM_LAYERS, 1, 3 * H), jnp.float32),       # (L, 1, 3H)
        "w_o": w_o.astype(jnp.bfloat16),                               # (L, NH, DH, H)
        "w_ff1": jnp.stack(wi).astype(jnp.bfloat16),                   # (L, H, INTER)
        "b_ff1": jnp.zeros((NUM_LAYERS, 1, INTER), jnp.float32),       # (L, 1, INTER)
        "w_ff2": jnp.stack(wo2).astype(jnp.bfloat16),                  # (L, INTER, H)
        "vecs": jnp.stack([vecs_one] * NUM_LAYERS).astype(jnp.float32),  # (L, 6, H)
    }


# ------------------------------ BertEmbedder fwd ---------------------------
def bert_embedder_forward(params, input_ids, attn_mask):
    """
    input_ids: (B, NUM_SEG, S) int32
    attn_mask: (B, NUM_SEG, S) float32
    returns:   (NUM_SEG, B, H)   -- matches torch.stack(cat_list, 0)
    """
    # flatten (segment, batch) into one example axis, segment-major
    ids = jnp.transpose(input_ids, (1, 0, 2)).reshape(NE, S).astype(jnp.int32)
    mask = jnp.transpose(attn_mask, (1, 0, 2)).reshape(NE, S).astype(jnp.float32)

    # block-diagonal attention bias with key-validity folded in: (M, M)
    blk = jnp.kron(jnp.eye(NE, dtype=jnp.float32), jnp.ones((S, S), jnp.float32))
    key_valid = mask.reshape(1, M)
    attn_bias = jnp.where((blk > 0.5) & (key_valid > 0.5), 0.0, NEG_INF)
    attn_bias = attn_bias.astype(jnp.float32)

    # position + (all-zero) token-type embedding, pre-tiled to the token axis
    pt_emb = params["pos_emb"][:S] + params["type_emb"][0][None, :]    # (S, H)
    pt_full = jnp.tile(pt_emb, (NE, 1))                                # (M, H)
    emb_ln = jnp.stack([params["emb_g"], params["emb_b"]], axis=0)     # (2, H)

    def full(shape):
        return pl.BlockSpec(shape, lambda g, _nd=len(shape): (0,) * _nd)

    cls = pl.pallas_call(
        bert_fused_kernel,
        out_shape=jax.ShapeDtypeStruct((NE, H), jnp.float32),
        grid=(1,),   # single step: all examples fused; M=48 rows per matmul
        in_specs=[
            full((NE, S)),                    # ids (2D, no size-1 trailing dim)
            full((M, M)),                     # attention bias
            full(params["word_emb"].shape),
            full((M, H)),                     # pos+type, pre-tiled
            full(emb_ln.shape),
            full(params["w_qkv"].shape),
            full(params["b_qkv"].shape),
            full(params["w_o"].shape),
            full(params["vecs"].shape),
            full(params["w_ff1"].shape),
            full(params["b_ff1"].shape),
            full(params["w_ff2"].shape),
        ],
        out_specs=pl.BlockSpec((NE, H), lambda g: (0, 0)),
        compiler_params=pltpu.CompilerParams(dimension_semantics=("arbitrary",)),
    )(ids, attn_bias, params["word_emb"], pt_full, emb_ln,
      params["w_qkv"], params["b_qkv"], params["w_o"], params["vecs"],
      params["w_ff1"], params["b_ff1"], params["w_ff2"])

    return cls.reshape(NUM_SEG, B, H)


# ----------------------------------- main ----------------------------------
if __name__ == "__main__":
    key = jax.random.PRNGKey(0)
    kp, kids, kmask = jax.random.split(key, 3)

    params = init_params(kp)

    input_ids = jax.random.randint(kids, (B, NUM_SEG, S), 0, VOCAB, dtype=jnp.int32)
    # valid lengths per (batch, segment); position 0 (CLS) always valid
    lengths = jax.random.randint(kmask, (B, NUM_SEG, 1), 3, S + 1)
    attn_mask = (jnp.arange(S)[None, None, :] < lengths).astype(jnp.float32)

    fwd = jax.jit(bert_embedder_forward)
    out = jax.block_until_ready(fwd(params, input_ids, attn_mask))

    assert out.shape == (NUM_SEG, B, H)
    assert out.dtype == jnp.float32
    assert bool(jnp.all(jnp.isfinite(out)))
    print("KERNEL_OK")
</pallas_src>

<mosaic_0001>
module attributes {stable_mosaic.version = 11 : i64} {
  func.func @bert_fused_kernel(%arg0: i32, %arg1: memref<6x8xi32, #tpu.memory_space<vmem>>, %arg2: memref<48x48xf32, #tpu.memory_space<vmem>>, %arg3: memref<50x32xbf16, #tpu.memory_space<vmem>>, %arg4: memref<48x32xf32, #tpu.memory_space<vmem>>, %arg5: memref<2x32xf32, #tpu.memory_space<vmem>>, %arg6: memref<2x32x96xbf16, #tpu.memory_space<vmem>>, %arg7: memref<2x1x96xf32, #tpu.memory_space<vmem>>, %arg8: memref<2x2x16x32xbf16, #tpu.memory_space<vmem>>, %arg9: memref<2x6x32xf32, #tpu.memory_space<vmem>>, %arg10: memref<2x32x64xbf16, #tpu.memory_space<vmem>>, %arg11: memref<2x1x64xf32, #tpu.memory_space<vmem>>, %arg12: memref<2x64x32xbf16, #tpu.memory_space<vmem>>, %arg13: memref<6x32xf32, #tpu.memory_space<vmem>>) attributes {dimension_semantics = [#tpu.dimension_semantics<arbitrary>], iteration_bounds = array<i64: 1>, scalar_prefetch = 0 : i64, scratch_operands = 0 : i64, tpu.core_type = #tpu.core_type<tc>, window_params = [{pipeline_mode = #tpu.pipeline_mode<synchronous>, transform_indices = @transform_0, window_bounds = array<i64: 6, 8>}, {pipeline_mode = #tpu.pipeline_mode<synchronous>, transform_indices = @transform_1, window_bounds = array<i64: 48, 48>}, {pipeline_mode = #tpu.pipeline_mode<synchronous>, transform_indices = @transform_2, window_bounds = array<i64: 50, 32>}, {pipeline_mode = #tpu.pipeline_mode<synchronous>, transform_indices = @transform_3, window_bounds = array<i64: 48, 32>}, {pipeline_mode = #tpu.pipeline_mode<synchronous>, transform_indices = @transform_4, window_bounds = array<i64: 2, 32>}, {pipeline_mode = #tpu.pipeline_mode<synchronous>, transform_indices = @transform_5, window_bounds = array<i64: 2, 32, 96>}, {pipeline_mode = #tpu.pipeline_mode<synchronous>, transform_indices = @transform_6, window_bounds = array<i64: 2, 1, 96>}, {pipeline_mode = #tpu.pipeline_mode<synchronous>, transform_indices = @transform_7, window_bounds = array<i64: 2, 2, 16, 32>}, {pipeline_mode = #tpu.pipeline_mode<synchronous>, transform_indices = @transform_8, window_bounds = array<i64: 2, 6, 32>}, {pipeline_mode = #tpu.pipeline_mode<synchronous>, transform_indices = @transform_9, window_bounds = array<i64: 2, 32, 64>}, {pipeline_mode = #tpu.pipeline_mode<synchronous>, transform_indices = @transform_10, window_bounds = array<i64: 2, 1, 64>}, {pipeline_mode = #tpu.pipeline_mode<synchronous>, transform_indices = @transform_11, window_bounds = array<i64: 2, 64, 32>}, {pipeline_mode = #tpu.pipeline_mode<synchronous>, transform_indices = @transform_12, window_bounds = array<i64: 6, 32>}]} {
    %c0 = arith.constant 0 : index
    %c0_0 = arith.constant 0 : index
    %0 = vector.load %arg2[%c0, %c0_0] : memref<48x48xf32, #tpu.memory_space<vmem>>, vector<48x48xf32>
    %c0_1 = arith.constant 0 : index
    %c0_2 = arith.constant 0 : index
    %1 = vector.load %arg1[%c0_1, %c0_2] : memref<6x8xi32, #tpu.memory_space<vmem>>, vector<6x8xi32>
    %2 = vector.shape_cast %1 : vector<6x8xi32> to vector<6x8x1xi32>
    %3 = tpu.iota {dimensions = array<i32: 2>} : vector<6x8x50xi32>
    %4 = vector.broadcast %2 : vector<6x8x1xi32> to vector<6x8x50xi32>
    %5 = arith.cmpi eq, %4, %3 : vector<6x8x50xi32>
    %6 = arith.extui %5 : vector<6x8x50xi1> to vector<6x8x50xi32>
    %7 = arith.sitofp %6 : vector<6x8x50xi32> to vector<6x8x50xf32>
    %8 = arith.truncf %7 : vector<6x8x50xf32> to vector<6x8x50xbf16>
    %9 = vector.shape_cast %8 : vector<6x8x50xbf16> to vector<48x50xbf16>
    %c0_3 = arith.constant 0 : index
    %c0_4 = arith.constant 0 : index
    %10 = vector.load %arg3[%c0_3, %c0_4] : memref<50x32xbf16, #tpu.memory_space<vmem>>, vector<50x32xbf16>
    %cst = arith.constant dense<0.000000e+00> : vector<48x32xf32>
    %11 = tpu.matmul %9, %10, %cst {dimension_numbers = #tpu.dot_dimension_numbers<[1], [0], [0], [1], [0, 0, 1, 1], [], []>} : vector<48x50xbf16>, vector<50x32xbf16>, vector<48x32xf32> -> vector<48x32xf32>
    %c0_5 = arith.constant 0 : index
    %c0_6 = arith.constant 0 : index
    %12 = vector.load %arg4[%c0_5, %c0_6] : memref<48x32xf32, #tpu.memory_space<vmem>>, vector<48x32xf32>
    %13 = arith.addf %11, %12 : vector<48x32xf32>
    %c0_7 = arith.constant 0 : index
    %c0_8 = arith.constant 0 : index
    %14 = vector.load %arg5[%c0_7, %c0_8] : memref<2x32xf32, #tpu.memory_space<vmem>>, vector<1x32xf32>
    %15 = vector.shape_cast %14 : vector<1x32xf32> to vector<32xf32>
    %c1 = arith.constant 1 : index
    %c0_9 = arith.constant 0 : index
    %16 = vector.load %arg5[%c1, %c0_9] : memref<2x32xf32, #tpu.memory_space<vmem>>, vector<1x32xf32>
    %17 = vector.shape_cast %16 : vector<1x32xf32> to vector<32xf32>
    %cst_10 = arith.constant dense<0.000000e+00> : vector<48xf32>
    %18 = vector.multi_reduction <add>, %13, %cst_10 [1] : vector<48x32xf32> to vector<48xf32>
    %19 = vector.shape_cast %18 : vector<48xf32> to vector<48x1xf32>
    %cst_11 = arith.constant 3.200000e+01 : f32
    %20 = vector.broadcast %cst_11 : f32 to vector<48x1xf32>
    %21 = arith.divf %19, %20 : vector<48x1xf32>
    %22 = vector.broadcast %21 : vector<48x1xf32> to vector<48x32xf32>
    %23 = arith.subf %13, %22 : vector<48x32xf32>
    %24 = arith.mulf %23, %23 : vector<48x32xf32>
    %cst_12 = arith.constant dense<0.000000e+00> : vector<48xf32>
    %25 = vector.multi_reduction <add>, %24, %cst_12 [1] : vector<48x32xf32> to vector<48xf32>
    %26 = vector.shape_cast %25 : vector<48xf32> to vector<48x1xf32>
    %cst_13 = arith.constant 3.200000e+01 : f32
    %27 = vector.broadcast %cst_13 : f32 to vector<48x1xf32>
    %28 = arith.divf %26, %27 : vector<48x1xf32>
    %29 = vector.broadcast %21 : vector<48x1xf32> to vector<48x32xf32>
    %30 = arith.subf %13, %29 : vector<48x32xf32>
    %cst_14 = arith.constant 9.99999996E-13 : f32
    %31 = vector.broadcast %cst_14 : f32 to vector<48x1xf32>
    %32 = arith.addf %28, %31 : vector<48x1xf32>
    %33 = math.rsqrt %32 : vector<48x1xf32>
    %34 = vector.broadcast %33 : vector<48x1xf32> to vector<48x32xf32>
    %35 = arith.mulf %30, %34 : vector<48x32xf32>
    %36 = vector.shape_cast %15 : vector<32xf32> to vector<1x32xf32>
    %37 = vector.broadcast %36 : vector<1x32xf32> to vector<48x32xf32>
    %38 = arith.mulf %35, %37 : vector<48x32xf32>
    %39 = vector.shape_cast %17 : vector<32xf32> to vector<1x32xf32>
    %40 = vector.broadcast %39 : vector<1x32xf32> to vector<48x32xf32>
    %41 = arith.addf %38, %40 : vector<48x32xf32>
    %c0_15 = arith.constant 0 : index
    %c0_16 = arith.constant 0 : index
    %c0_17 = arith.constant 0 : index
    %42 = vector.load %arg6[%c0_15, %c0_16, %c0_17] : memref<2x32x96xbf16, #tpu.memory_space<vmem>>, vector<1x32x96xbf16>
    %43 = vector.shape_cast %42 : vector<1x32x96xbf16> to vector<32x96xbf16>
    %c0_18 = arith.constant 0 : index
    %c0_19 = arith.constant 0 : index
    %c0_20 = arith.constant 0 : index
    %44 = vector.load %arg7[%c0_18, %c0_19, %c0_20] : memref<2x1x96xf32, #tpu.memory_space<vmem>>, vector<1x1x96xf32>
    %45 = vector.shape_cast %44 : vector<1x1x96xf32> to vector<1x96xf32>
    %c0_21 = arith.constant 0 : index
    %c0_22 = arith.constant 0 : index
    %c0_23 = arith.constant 0 : index
    %c0_24 = arith.constant 0 : index
    %46 = vector.load %arg8[%c0_21, %c0_22, %c0_23, %c0_24] : memref<2x2x16x32xbf16, #tpu.memory_space<vmem>>, vector<1x2x16x32xbf16>
    %47 = vector.shape_cast %46 : vector<1x2x16x32xbf16> to vector<2x16x32xbf16>
    %c0_25 = arith.constant 0 : index
    %c0_26 = arith.constant 0 : index
    %c0_27 = arith.constant 0 : index
    %48 = vector.load %arg10[%c0_25, %c0_26, %c0_27] : memref<2x32x64xbf16, #tpu.memory_space<vmem>>, vector<1x32x64xbf16>
    %49 = vector.shape_cast %48 : vector<1x32x64xbf16> to vector<32x64xbf16>
    %c0_28 = arith.constant 0 : index
    %c0_29 = arith.constant 0 : index
    %c0_30 = arith.constant 0 : index
    %50 = vector.load %arg11[%c0_28, %c0_29, %c0_30] : memref<2x1x64xf32, #tpu.memory_space<vmem>>, vector<1x1x64xf32>
    %51 = vector.shape_cast %50 : vector<1x1x64xf32> to vector<1x64xf32>
    %c0_31 = arith.constant 0 : index
    %c0_32 = arith.constant 0 : index
    %c0_33 = arith.constant 0 : index
    %52 = vector.load %arg12[%c0_31, %c0_32, %c0_33] : memref<2x64x32xbf16, #tpu.memory_space<vmem>>, vector<1x64x32xbf16>
    %53 = vector.shape_cast %52 : vector<1x64x32xbf16> to vector<64x32xbf16>
    %c0_34 = arith.constant 0 : index
    %c0_35 = arith.constant 0 : index
    %c0_36 = arith.constant 0 : index
    %54 = vector.load %arg9[%c0_34, %c0_35, %c0_36] : memref<2x6x32xf32, #tpu.memory_space<vmem>>, vector<1x6x32xf32>
    %55 = vector.shape_cast %54 : vector<1x6x32xf32> to vector<6x32xf32>
    %56 = arith.truncf %41 : vector<48x32xf32> to vector<48x32xbf16>
    %cst_37 = arith.constant dense<0.000000e+00> : vector<48x96xf32>
    %57 = tpu.matmul %56, %43, %cst_37 {dimension_numbers = #tpu.dot_dimension_numbers<[1], [0], [0], [1], [0, 0, 1, 1], [], []>} : vector<48x32xbf16>, vector<32x96xbf16>, vector<48x96xf32> -> vector<48x96xf32>
    %58 = vector.broadcast %45 : vector<1x96xf32> to vector<48x96xf32>
    %59 = arith.addf %57, %58 : vector<48x96xf32>
    %60 = arith.truncf %59 : vector<48x96xf32> to vector<48x96xbf16>
    %cst_38 = arith.constant 0.000000e+00 : f32
    %61 = vector.broadcast %cst_38 : f32 to vector<48x32xf32>
    %62 = vector.extract_strided_slice %60 {offsets = [0, 0], sizes = [48, 16], strides = [1, 1]} : vector<48x96xbf16> to vector<48x16xbf16>
    %63 = vector.extract_strided_slice %60 {offsets = [0, 32], sizes = [48, 16], strides = [1, 1]} : vector<48x96xbf16> to vector<48x16xbf16>
    %64 = vector.extract_strided_slice %60 {offsets = [0, 64], sizes = [48, 16], strides = [1, 1]} : vector<48x96xbf16> to vector<48x16xbf16>
    %cst_39 = arith.constant dense<0.000000e+00> : vector<48x48xf32>
    %65 = tpu.matmul %62, %63, %cst_39 {dimension_numbers = #tpu.dot_dimension_numbers<[1], [1], [0], [0], [0, 0, 1, 0], [], []>} : vector<48x16xbf16>, vector<48x16xbf16>, vector<48x48xf32> -> vector<48x48xf32>
    %cst_40 = arith.constant 2.500000e-01 : f32
    %66 = vector.broadcast %cst_40 : f32 to vector<48x48xf32>
    %67 = arith.mulf %65, %66 : vector<48x48xf32>
    %68 = arith.addf %67, %0 : vector<48x48xf32>
    %cst_41 = arith.constant dense<0xFF800000> : vector<48xf32>
    %69 = vector.multi_reduction <maximumf>, %68, %cst_41 [1] : vector<48x48xf32> to vector<48xf32>
    %70 = vector.shape_cast %69 : vector<48xf32> to vector<48x1xf32>
    %71 = vector.broadcast %70 : vector<48x1xf32> to vector<48x48xf32>
    %72 = arith.subf %68, %71 : vector<48x48xf32>
    %73 = math.exp %72 : vector<48x48xf32>
    %cst_42 = arith.constant dense<0.000000e+00> : vector<48xf32>
    %74 = vector.multi_reduction <add>, %73, %cst_42 [1] : vector<48x48xf32> to vector<48xf32>
    %75 = vector.shape_cast %74 : vector<48xf32> to vector<48x1xf32>
    %76 = tpu.reciprocal %75 {approx = true} : vector<48x1xf32> -> vector<48x1xf32>
    %77 = vector.broadcast %76 : vector<48x1xf32> to vector<48x48xf32>
    %78 = arith.mulf %73, %77 : vector<48x48xf32>
    %79 = arith.truncf %78 : vector<48x48xf32> to vector<48x48xbf16>
    %cst_43 = arith.constant dense<0.000000e+00> : vector<48x16xf32>
    %80 = tpu.matmul %79, %64, %cst_43 {dimension_numbers = #tpu.dot_dimension_numbers<[1], [0], [0], [1], [0, 0, 1, 1], [], []>} : vector<48x48xbf16>, vector<48x16xbf16>, vector<48x16xf32> -> vector<48x16xf32>
    %81 = arith.truncf %80 : vector<48x16xf32> to vector<48x16xbf16>
    %82 = vector.extract_strided_slice %47 {offsets = [0, 0, 0], sizes = [1, 16, 32], strides = [1, 1, 1]} : vector<2x16x32xbf16> to vector<1x16x32xbf16>
    %83 = vector.shape_cast %82 : vector<1x16x32xbf16> to vector<16x32xbf16>
    %cst_44 = arith.constant dense<0.000000e+00> : vector<48x32xf32>
    %84 = tpu.matmul %81, %83, %cst_44 {dimension_numbers = #tpu.dot_dimension_numbers<[1], [0], [0], [1], [0, 0, 1, 1], [], []>} : vector<48x16xbf16>, vector<16x32xbf16>, vector<48x32xf32> -> vector<48x32xf32>
    %85 = arith.addf %61, %84 : vector<48x32xf32>
    %86 = vector.extract_strided_slice %60 {offsets = [0, 16], sizes = [48, 16], strides = [1, 1]} : vector<48x96xbf16> to vector<48x16xbf16>
    %87 = vector.extract_strided_slice %60 {offsets = [0, 48], sizes = [48, 16], strides = [1, 1]} : vector<48x96xbf16> to vector<48x16xbf16>
    %88 = vector.extract_strided_slice %60 {offsets = [0, 80], sizes = [48, 16], strides = [1, 1]} : vector<48x96xbf16> to vector<48x16xbf16>
    %cst_45 = arith.constant dense<0.000000e+00> : vector<48x48xf32>
    %89 = tpu.matmul %86, %87, %cst_45 {dimension_numbers = #tpu.dot_dimension_numbers<[1], [1], [0], [0], [0, 0, 1, 0], [], []>} : vector<48x16xbf16>, vector<48x16xbf16>, vector<48x48xf32> -> vector<48x48xf32>
    %cst_46 = arith.constant 2.500000e-01 : f32
    %90 = vector.broadcast %cst_46 : f32 to vector<48x48xf32>
    %91 = arith.mulf %89, %90 : vector<48x48xf32>
    %92 = arith.addf %91, %0 : vector<48x48xf32>
    %cst_47 = arith.constant dense<0xFF800000> : vector<48xf32>
    %93 = vector.multi_reduction <maximumf>, %92, %cst_47 [1] : vector<48x48xf32> to vector<48xf32>
    %94 = vector.shape_cast %93 : vector<48xf32> to vector<48x1xf32>
    %95 = vector.broadcast %94 : vector<48x1xf32> to vector<48x48xf32>
    %96 = arith.subf %92, %95 : vector<48x48xf32>
    %97 = math.exp %96 : vector<48x48xf32>
    %cst_48 = arith.constant dense<0.000000e+00> : vector<48xf32>
    %98 = vector.multi_reduction <add>, %97, %cst_48 [1] : vector<48x48xf32> to vector<48xf32>
    %99 = vector.shape_cast %98 : vector<48xf32> to vector<48x1xf32>
    %100 = tpu.reciprocal %99 {approx = true} : vector<48x1xf32> -> vector<48x1xf32>
    %101 = vector.broadcast %100 : vector<48x1xf32> to vector<48x48xf32>
    %102 = arith.mulf %97, %101 : vector<48x48xf32>
    %103 = arith.truncf %102 : vector<48x48xf32> to vector<48x48xbf16>
    %cst_49 = arith.constant dense<0.000000e+00> : vector<48x16xf32>
    %104 = tpu.matmul %103, %88, %cst_49 {dimension_numbers = #tpu.dot_dimension_numbers<[1], [0], [0], [1], [0, 0, 1, 1], [], []>} : vector<48x48xbf16>, vector<48x16xbf16>, vector<48x16xf32> -> vector<48x16xf32>
    %105 = arith.truncf %104 : vector<48x16xf32> to vector<48x16xbf16>
    %106 = vector.extract_strided_slice %47 {offsets = [1, 0, 0], sizes = [1, 16, 32], strides = [1, 1, 1]} : vector<2x16x32xbf16> to vector<1x16x32xbf16>
    %107 = vector.shape_cast %106 : vector<1x16x32xbf16> to vector<16x32xbf16>
    %cst_50 = arith.constant dense<0.000000e+00> : vector<48x32xf32>
    %108 = tpu.matmul %105, %107, %cst_50 {dimension_numbers = #tpu.dot_dimension_numbers<[1], [0], [0], [1], [0, 0, 1, 1], [], []>} : vector<48x16xbf16>, vector<16x32xbf16>, vector<48x32xf32> -> vector<48x32xf32>
    %109 = arith.addf %85, %108 : vector<48x32xf32>
    %110 = arith.addf %41, %109 : vector<48x32xf32>
    %111 = vector.extract_strided_slice %55 {offsets = [0, 0], sizes = [1, 32], strides = [1, 1]} : vector<6x32xf32> to vector<1x32xf32>
    %112 = vector.shape_cast %111 : vector<1x32xf32> to vector<32xf32>
    %113 = vector.shape_cast %112 : vector<32xf32> to vector<1x32xf32>
    %114 = vector.broadcast %113 : vector<1x32xf32> to vector<48x32xf32>
    %115 = arith.addf %110, %114 : vector<48x32xf32>
    %116 = vector.extract_strided_slice %55 {offsets = [1, 0], sizes = [1, 32], strides = [1, 1]} : vector<6x32xf32> to vector<1x32xf32>
    %117 = vector.shape_cast %116 : vector<1x32xf32> to vector<32xf32>
    %118 = vector.extract_strided_slice %55 {offsets = [2, 0], sizes = [1, 32], strides = [1, 1]} : vector<6x32xf32> to vector<1x32xf32>
    %119 = vector.shape_cast %118 : vector<1x32xf32> to vector<32xf32>
    %cst_51 = arith.constant dense<0.000000e+00> : vector<48xf32>
    %120 = vector.multi_reduction <add>, %115, %cst_51 [1] : vector<48x32xf32> to vector<48xf32>
    %121 = vector.shape_cast %120 : vector<48xf32> to vector<48x1xf32>
    %cst_52 = arith.constant 3.200000e+01 : f32
    %122 = vector.broadcast %cst_52 : f32 to vector<48x1xf32>
    %123 = arith.divf %121, %122 : vector<48x1xf32>
    %124 = vector.broadcast %123 : vector<48x1xf32> to vector<48x32xf32>
    %125 = arith.subf %115, %124 : vector<48x32xf32>
    %126 = arith.mulf %125, %125 : vector<48x32xf32>
    %cst_53 = arith.constant dense<0.000000e+00> : vector<48xf32>
    %127 = vector.multi_reduction <add>, %126, %cst_53 [1] : vector<48x32xf32> to vector<48xf32>
    %128 = vector.shape_cast %127 : vector<48xf32> to vector<48x1xf32>
    %cst_54 = arith.constant 3.200000e+01 : f32
    %129 = vector.broadcast %cst_54 : f32 to vector<48x1xf32>
    %130 = arith.divf %128, %129 : vector<48x1xf32>
    %131 = vector.broadcast %123 : vector<48x1xf32> to vector<48x32xf32>
    %132 = arith.subf %115, %131 : vector<48x32xf32>
    %cst_55 = arith.constant 9.99999996E-13 : f32
    %133 = vector.broadcast %cst_55 : f32 to vector<48x1xf32>
    %134 = arith.addf %130, %133 : vector<48x1xf32>
    %135 = math.rsqrt %134 : vector<48x1xf32>
    %136 = vector.broadcast %135 : vector<48x1xf32> to vector<48x32xf32>
    %137 = arith.mulf %132, %136 : vector<48x32xf32>
    %138 = vector.shape_cast %117 : vector<32xf32> to vector<1x32xf32>
    %139 = vector.broadcast %138 : vector<1x32xf32> to vector<48x32xf32>
    %140 = arith.mulf %137, %139 : vector<48x32xf32>
    %141 = vector.shape_cast %119 : vector<32xf32> to vector<1x32xf32>
    %142 = vector.broadcast %141 : vector<1x32xf32> to vector<48x32xf32>
    %143 = arith.addf %140, %142 : vector<48x32xf32>
    %144 = arith.truncf %143 : vector<48x32xf32> to vector<48x32xbf16>
    %cst_56 = arith.constant dense<0.000000e+00> : vector<48x64xf32>
    %145 = tpu.matmul %144, %49, %cst_56 {dimension_numbers = #tpu.dot_dimension_numbers<[1], [0], [0], [1], [0, 0, 1, 1], [], []>} : vector<48x32xbf16>, vector<32x64xbf16>, vector<48x64xf32> -> vector<48x64xf32>
    %146 = vector.broadcast %51 : vector<1x64xf32> to vector<48x64xf32>
    %147 = arith.addf %145, %146 : vector<48x64xf32>
    %cst_57 = arith.constant 5.000000e-01 : f32
    %148 = vector.broadcast %cst_57 : f32 to vector<48x64xf32>
    %149 = arith.mulf %148, %147 : vector<48x64xf32>
    %cst_58 = arith.constant 4.471500e-02 : f32
    %150 = vector.broadcast %cst_58 : f32 to vector<48x64xf32>
    %151 = arith.mulf %150, %147 : vector<48x64xf32>
    %152 = arith.mulf %151, %147 : vector<48x64xf32>
    %153 = arith.mulf %152, %147 : vector<48x64xf32>
    %154 = arith.addf %147, %153 : vector<48x64xf32>
    %cst_59 = arith.constant 0.797884583 : f32
    %155 = vector.broadcast %cst_59 : f32 to vector<48x64xf32>
    %156 = arith.mulf %155, %154 : vector<48x64xf32>
    %157 = math.tanh %156 : vector<48x64xf32>
    %cst_60 = arith.constant 1.000000e+00 : f32
    %158 = vector.broadcast %cst_60 : f32 to vector<48x64xf32>
    %159 = arith.addf %158, %157 : vector<48x64xf32>
    %160 = arith.mulf %149, %159 : vector<48x64xf32>
    %161 = arith.truncf %160 : vector<48x64xf32> to vector<48x64xbf16>
    %cst_61 = arith.constant dense<0.000000e+00> : vector<48x32xf32>
    %162 = tpu.matmul %161, %53, %cst_61 {dimension_numbers = #tpu.dot_dimension_numbers<[1], [0], [0], [1], [0, 0, 1, 1], [], []>} : vector<48x64xbf16>, vector<64x32xbf16>, vector<48x32xf32> -> vector<48x32xf32>
    %163 = vector.extract_strided_slice %55 {offsets = [3, 0], sizes = [1, 32], strides = [1, 1]} : vector<6x32xf32> to vector<1x32xf32>
    %164 = vector.shape_cast %163 : vector<1x32xf32> to vector<32xf32>
    %165 = vector.shape_cast %164 : vector<32xf32> to vector<1x32xf32>
    %166 = vector.broadcast %165 : vector<1x32xf32> to vector<48x32xf32>
    %167 = arith.addf %162, %166 : vector<48x32xf32>
    %168 = arith.addf %143, %167 : vector<48x32xf32>
    %169 = vector.extract_strided_slice %55 {offsets = [4, 0], sizes = [1, 32], strides = [1, 1]} : vector<6x32xf32> to vector<1x32xf32>
    %170 = vector.shape_cast %169 : vector<1x32xf32> to vector<32xf32>
    %171 = vector.extract_strided_slice %55 {offsets = [5, 0], sizes = [1, 32], strides = [1, 1]} : vector<6x32xf32> to vector<1x32xf32>
    %172 = vector.shape_cast %171 : vector<1x32xf32> to vector<32xf32>
    %cst_62 = arith.constant dense<0.000000e+00> : vector<48xf32>
    %173 = vector.multi_reduction <add>, %168, %cst_62 [1] : vector<48x32xf32> to vector<48xf32>
    %174 = vector.shape_cast %173 : vector<48xf32> to vector<48x1xf32>
    %cst_63 = arith.constant 3.200000e+01 : f32
    %175 = vector.broadcast %cst_63 : f32 to vector<48x1xf32>
    %176 = arith.divf %174, %175 : vector<48x1xf32>
    %177 = vector.broadcast %176 : vector<48x1xf32> to vector<48x32xf32>
    %178 = arith.subf %168, %177 : vector<48x32xf32>
    %179 = arith.mulf %178, %178 : vector<48x32xf32>
    %cst_64 = arith.constant dense<0.000000e+00> : vector<48xf32>
    %180 = vector.multi_reduction <add>, %179, %cst_64 [1] : vector<48x32xf32> to vector<48xf32>
    %181 = vector.shape_cast %180 : vector<48xf32> to vector<48x1xf32>
    %cst_65 = arith.constant 3.200000e+01 : f32
    %182 = vector.broadcast %cst_65 : f32 to vector<48x1xf32>
    %183 = arith.divf %181, %182 : vector<48x1xf32>
    %184 = vector.broadcast %176 : vector<48x1xf32> to vector<48x32xf32>
    %185 = arith.subf %168, %184 : vector<48x32xf32>
    %cst_66 = arith.constant 9.99999996E-13 : f32
    %186 = vector.broadcast %cst_66 : f32 to vector<48x1xf32>
    %187 = arith.addf %183, %186 : vector<48x1xf32>
    %188 = math.rsqrt %187 : vector<48x1xf32>
    %189 = vector.broadcast %188 : vector<48x1xf32> to vector<48x32xf32>
    %190 = arith.mulf %185, %189 : vector<48x32xf32>
    %191 = vector.shape_cast %170 : vector<32xf32> to vector<1x32xf32>
    %192 = vector.broadcast %191 : vector<1x32xf32> to vector<48x32xf32>
    %193 = arith.mulf %190, %192 : vector<48x32xf32>
    %194 = vector.shape_cast %172 : vector<32xf32> to vector<1x32xf32>
    %195 = vector.broadcast %194 : vector<1x32xf32> to vector<48x32xf32>
    %196 = arith.addf %193, %195 : vector<48x32xf32>
    %c1_67 = arith.constant 1 : index
    %c0_68 = arith.constant 0 : index
    %c0_69 = arith.constant 0 : index
    %197 = vector.load %arg6[%c1_67, %c0_68, %c0_69] : memref<2x32x96xbf16, #tpu.memory_space<vmem>>, vector<1x32x96xbf16>
    %198 = vector.shape_cast %197 : vector<1x32x96xbf16> to vector<32x96xbf16>
    %c1_70 = arith.constant 1 : index
    %c0_71 = arith.constant 0 : index
    %c0_72 = arith.constant 0 : index
    %199 = vector.load %arg7[%c1_70, %c0_71, %c0_72] : memref<2x1x96xf32, #tpu.memory_space<vmem>>, vector<1x1x96xf32>
    %200 = vector.shape_cast %199 : vector<1x1x96xf32> to vector<1x96xf32>
    %c1_73 = arith.constant 1 : index
    %c0_74 = arith.constant 0 : index
    %c0_75 = arith.constant 0 : index
    %c0_76 = arith.constant 0 : index
    %201 = vector.load %arg8[%c1_73, %c0_74, %c0_75, %c0_76] : memref<2x2x16x32xbf16, #tpu.memory_space<vmem>>, vector<1x2x16x32xbf16>
    %202 = vector.shape_cast %201 : vector<1x2x16x32xbf16> to vector<2x16x32xbf16>
    %c1_77 = arith.constant 1 : index
    %c0_78 = arith.constant 0 : index
    %c0_79 = arith.constant 0 : index
    %203 = vector.load %arg10[%c1_77, %c0_78, %c0_79] : memref<2x32x64xbf16, #tpu.memory_space<vmem>>, vector<1x32x64xbf16>
    %204 = vector.shape_cast %203 : vector<1x32x64xbf16> to vector<32x64xbf16>
    %c1_80 = arith.constant 1 : index
    %c0_81 = arith.constant 0 : index
    %c0_82 = arith.constant 0 : index
    %205 = vector.load %arg11[%c1_80, %c0_81, %c0_82] : memref<2x1x64xf32, #tpu.memory_space<vmem>>, vector<1x1x64xf32>
    %206 = vector.shape_cast %205 : vector<1x1x64xf32> to vector<1x64xf32>
    %c1_83 = arith.constant 1 : index
    %c0_84 = arith.constant 0 : index
    %c0_85 = arith.constant 0 : index
    %207 = vector.load %arg12[%c1_83, %c0_84, %c0_85] : memref<2x64x32xbf16, #tpu.memory_space<vmem>>, vector<1x64x32xbf16>
    %208 = vector.shape_cast %207 : vector<1x64x32xbf16> to vector<64x32xbf16>
    %c1_86 = arith.constant 1 : index
    %c0_87 = arith.constant 0 : index
    %c0_88 = arith.constant 0 : index
    %209 = vector.load %arg9[%c1_86, %c0_87, %c0_88] : memref<2x6x32xf32, #tpu.memory_space<vmem>>, vector<1x6x32xf32>
    %210 = vector.shape_cast %209 : vector<1x6x32xf32> to vector<6x32xf32>
    %211 = arith.truncf %196 : vector<48x32xf32> to vector<48x32xbf16>
    %cst_89 = arith.constant dense<0.000000e+00> : vector<48x96xf32>
    %212 = tpu.matmul %211, %198, %cst_89 {dimension_numbers = #tpu.dot_dimension_numbers<[1], [0], [0], [1], [0, 0, 1, 1], [], []>} : vector<48x32xbf16>, vector<32x96xbf16>, vector<48x96xf32> -> vector<48x96xf32>
    %213 = vector.broadcast %200 : vector<1x96xf32> to vector<48x96xf32>
    %214 = arith.addf %212, %213 : vector<48x96xf32>
    %215 = arith.truncf %214 : vector<48x96xf32> to vector<48x96xbf16>
    %cst_90 = arith.constant 0.000000e+00 : f32
    %216 = vector.broadcast %cst_90 : f32 to vector<48x32xf32>
    %217 = vector.extract_strided_slice %215 {offsets = [0, 0], sizes = [48, 16], strides = [1, 1]} : vector<48x96xbf16> to vector<48x16xbf16>
    %218 = vector.extract_strided_slice %215 {offsets = [0, 32], sizes = [48, 16], strides = [1, 1]} : vector<48x96xbf16> to vector<48x16xbf16>
    %219 = vector.extract_strided_slice %215 {offsets = [0, 64], sizes = [48, 16], strides = [1, 1]} : vector<48x96xbf16> to vector<48x16xbf16>
    %cst_91 = arith.constant dense<0.000000e+00> : vector<48x48xf32>
    %220 = tpu.matmul %217, %218, %cst_91 {dimension_numbers = #tpu.dot_dimension_numbers<[1], [1], [0], [0], [0, 0, 1, 0], [], []>} : vector<48x16xbf16>, vector<48x16xbf16>, vector<48x48xf32> -> vector<48x48xf32>
    %cst_92 = arith.constant 2.500000e-01 : f32
    %221 = vector.broadcast %cst_92 : f32 to vector<48x48xf32>
    %222 = arith.mulf %220, %221 : vector<48x48xf32>
    %223 = arith.addf %222, %0 : vector<48x48xf32>
    %cst_93 = arith.constant dense<0xFF800000> : vector<48xf32>
    %224 = vector.multi_reduction <maximumf>, %223, %cst_93 [1] : vector<48x48xf32> to vector<48xf32>
    %225 = vector.shape_cast %224 : vector<48xf32> to vector<48x1xf32>
    %226 = vector.broadcast %225 : vector<48x1xf32> to vector<48x48xf32>
    %227 = arith.subf %223, %226 : vector<48x48xf32>
    %228 = math.exp %227 : vector<48x48xf32>
    %cst_94 = arith.constant dense<0.000000e+00> : vector<48xf32>
    %229 = vector.multi_reduction <add>, %228, %cst_94 [1] : vector<48x48xf32> to vector<48xf32>
    %230 = vector.shape_cast %229 : vector<48xf32> to vector<48x1xf32>
    %231 = tpu.reciprocal %230 {approx = true} : vector<48x1xf32> -> vector<48x1xf32>
    %232 = vector.broadcast %231 : vector<48x1xf32> to vector<48x48xf32>
    %233 = arith.mulf %228, %232 : vector<48x48xf32>
    %234 = arith.truncf %233 : vector<48x48xf32> to vector<48x48xbf16>
    %cst_95 = arith.constant dense<0.000000e+00> : vector<48x16xf32>
    %235 = tpu.matmul %234, %219, %cst_95 {dimension_numbers = #tpu.dot_dimension_numbers<[1], [0], [0], [1], [0, 0, 1, 1], [], []>} : vector<48x48xbf16>, vector<48x16xbf16>, vector<48x16xf32> -> vector<48x16xf32>
    %236 = arith.truncf %235 : vector<48x16xf32> to vector<48x16xbf16>
    %237 = vector.extract_strided_slice %202 {offsets = [0, 0, 0], sizes = [1, 16, 32], strides = [1, 1, 1]} : vector<2x16x32xbf16> to vector<1x16x32xbf16>
    %238 = vector.shape_cast %237 : vector<1x16x32xbf16> to vector<16x32xbf16>
    %cst_96 = arith.constant dense<0.000000e+00> : vector<48x32xf32>
    %239 = tpu.matmul %236, %238, %cst_96 {dimension_numbers = #tpu.dot_dimension_numbers<[1], [0], [0], [1], [0, 0, 1, 1], [], []>} : vector<48x16xbf16>, vector<16x32xbf16>, vector<48x32xf32> -> vector<48x32xf32>
    %240 = arith.addf %216, %239 : vector<48x32xf32>
    %241 = vector.extract_strided_slice %215 {offsets = [0, 16], sizes = [48, 16], strides = [1, 1]} : vector<48x96xbf16> to vector<48x16xbf16>
    %242 = vector.extract_strided_slice %215 {offsets = [0, 48], sizes = [48, 16], strides = [1, 1]} : vector<48x96xbf16> to vector<48x16xbf16>
    %243 = vector.extract_strided_slice %215 {offsets = [0, 80], sizes = [48, 16], strides = [1, 1]} : vector<48x96xbf16> to vector<48x16xbf16>
    %cst_97 = arith.constant dense<0.000000e+00> : vector<48x48xf32>
    %244 = tpu.matmul %241, %242, %cst_97 {dimension_numbers = #tpu.dot_dimension_numbers<[1], [1], [0], [0], [0, 0, 1, 0], [], []>} : vector<48x16xbf16>, vector<48x16xbf16>, vector<48x48xf32> -> vector<48x48xf32>
    %cst_98 = arith.constant 2.500000e-01 : f32
    %245 = vector.broadcast %cst_98 : f32 to vector<48x48xf32>
    %246 = arith.mulf %244, %245 : vector<48x48xf32>
    %247 = arith.addf %246, %0 : vector<48x48xf32>
    %cst_99 = arith.constant dense<0xFF800000> : vector<48xf32>
    %248 = vector.multi_reduction <maximumf>, %247, %cst_99 [1] : vector<48x48xf32> to vector<48xf32>
    %249 = vector.shape_cast %248 : vector<48xf32> to vector<48x1xf32>
    %250 = vector.broadcast %249 : vector<48x1xf32> to vector<48x48xf32>
    %251 = arith.subf %247, %250 : vector<48x48xf32>
    %252 = math.exp %251 : vector<48x48xf32>
    %cst_100 = arith.constant dense<0.000000e+00> : vector<48xf32>
    %253 = vector.multi_reduction <add>, %252, %cst_100 [1] : vector<48x48xf32> to vector<48xf32>
    %254 = vector.shape_cast %253 : vector<48xf32> to vector<48x1xf32>
    %255 = tpu.reciprocal %254 {approx = true} : vector<48x1xf32> -> vector<48x1xf32>
    %256 = vector.broadcast %255 : vector<48x1xf32> to vector<48x48xf32>
    %257 = arith.mulf %252, %256 : vector<48x48xf32>
    %258 = arith.truncf %257 : vector<48x48xf32> to vector<48x48xbf16>
    %cst_101 = arith.constant dense<0.000000e+00> : vector<48x16xf32>
    %259 = tpu.matmul %258, %243, %cst_101 {dimension_numbers = #tpu.dot_dimension_numbers<[1], [0], [0], [1], [0, 0, 1, 1], [], []>} : vector<48x48xbf16>, vector<48x16xbf16>, vector<48x16xf32> -> vector<48x16xf32>
    %260 = arith.truncf %259 : vector<48x16xf32> to vector<48x16xbf16>
    %261 = vector.extract_strided_slice %202 {offsets = [1, 0, 0], sizes = [1, 16, 32], strides = [1, 1, 1]} : vector<2x16x32xbf16> to vector<1x16x32xbf16>
    %262 = vector.shape_cast %261 : vector<1x16x32xbf16> to vector<16x32xbf16>
    %cst_102 = arith.constant dense<0.000000e+00> : vector<48x32xf32>
    %263 = tpu.matmul %260, %262, %cst_102 {dimension_numbers = #tpu.dot_dimension_numbers<[1], [0], [0], [1], [0, 0, 1, 1], [], []>} : vector<48x16xbf16>, vector<16x32xbf16>, vector<48x32xf32> -> vector<48x32xf32>
    %264 = arith.addf %240, %263 : vector<48x32xf32>
    %265 = arith.addf %196, %264 : vector<48x32xf32>
    %266 = vector.extract_strided_slice %210 {offsets = [0, 0], sizes = [1, 32], strides = [1, 1]} : vector<6x32xf32> to vector<1x32xf32>
    %267 = vector.shape_cast %266 : vector<1x32xf32> to vector<32xf32>
    %268 = vector.shape_cast %267 : vector<32xf32> to vector<1x32xf32>
    %269 = vector.broadcast %268 : vector<1x32xf32> to vector<48x32xf32>
    %270 = arith.addf %265, %269 : vector<48x32xf32>
    %271 = vector.extract_strided_slice %210 {offsets = [1, 0], sizes = [1, 32], strides = [1, 1]} : vector<6x32xf32> to vector<1x32xf32>
    %272 = vector.shape_cast %271 : vector<1x32xf32> to vector<32xf32>
    %273 = vector.extract_strided_slice %210 {offsets = [2, 0], sizes = [1, 32], strides = [1, 1]} : vector<6x32xf32> to vector<1x32xf32>
    %274 = vector.shape_cast %273 : vector<1x32xf32> to vector<32xf32>
    %cst_103 = arith.constant dense<0.000000e+00> : vector<48xf32>
    %275 = vector.multi_reduction <add>, %270, %cst_103 [1] : vector<48x32xf32> to vector<48xf32>
    %276 = vector.shape_cast %275 : vector<48xf32> to vector<48x1xf32>
    %cst_104 = arith.constant 3.200000e+01 : f32
    %277 = vector.broadcast %cst_104 : f32 to vector<48x1xf32>
    %278 = arith.divf %276, %277 : vector<48x1xf32>
    %279 = vector.broadcast %278 : vector<48x1xf32> to vector<48x32xf32>
    %280 = arith.subf %270, %279 : vector<48x32xf32>
    %281 = arith.mulf %280, %280 : vector<48x32xf32>
    %cst_105 = arith.constant dense<0.000000e+00> : vector<48xf32>
    %282 = vector.multi_reduction <add>, %281, %cst_105 [1] : vector<48x32xf32> to vector<48xf32>
    %283 = vector.shape_cast %282 : vector<48xf32> to vector<48x1xf32>
    %cst_106 = arith.constant 3.200000e+01 : f32
    %284 = vector.broadcast %cst_106 : f32 to vector<48x1xf32>
    %285 = arith.divf %283, %284 : vector<48x1xf32>
    %286 = vector.broadcast %278 : vector<48x1xf32> to vector<48x32xf32>
    %287 = arith.subf %270, %286 : vector<48x32xf32>
    %cst_107 = arith.constant 9.99999996E-13 : f32
    %288 = vector.broadcast %cst_107 : f32 to vector<48x1xf32>
    %289 = arith.addf %285, %288 : vector<48x1xf32>
    %290 = math.rsqrt %289 : vector<48x1xf32>
    %291 = vector.broadcast %290 : vector<48x1xf32> to vector<48x32xf32>
    %292 = arith.mulf %287, %291 : vector<48x32xf32>
    %293 = vector.shape_cast %272 : vector<32xf32> to vector<1x32xf32>
    %294 = vector.broadcast %293 : vector<1x32xf32> to vector<48x32xf32>
    %295 = arith.mulf %292, %294 : vector<48x32xf32>
    %296 = vector.shape_cast %274 : vector<32xf32> to vector<1x32xf32>
    %297 = vector.broadcast %296 : vector<1x32xf32> to vector<48x32xf32>
    %298 = arith.addf %295, %297 : vector<48x32xf32>
    %299 = arith.truncf %298 : vector<48x32xf32> to vector<48x32xbf16>
    %cst_108 = arith.constant dense<0.000000e+00> : vector<48x64xf32>
    %300 = tpu.matmul %299, %204, %cst_108 {dimension_numbers = #tpu.dot_dimension_numbers<[1], [0], [0], [1], [0, 0, 1, 1], [], []>} : vector<48x32xbf16>, vector<32x64xbf16>, vector<48x64xf32> -> vector<48x64xf32>
    %301 = vector.broadcast %206 : vector<1x64xf32> to vector<48x64xf32>
    %302 = arith.addf %300, %301 : vector<48x64xf32>
    %cst_109 = arith.constant 5.000000e-01 : f32
    %303 = vector.broadcast %cst_109 : f32 to vector<48x64xf32>
    %304 = arith.mulf %303, %302 : vector<48x64xf32>
    %cst_110 = arith.constant 4.471500e-02 : f32
    %305 = vector.broadcast %cst_110 : f32 to vector<48x64xf32>
    %306 = arith.mulf %305, %302 : vector<48x64xf32>
    %307 = arith.mulf %306, %302 : vector<48x64xf32>
    %308 = arith.mulf %307, %302 : vector<48x64xf32>
    %309 = arith.addf %302, %308 : vector<48x64xf32>
    %cst_111 = arith.constant 0.797884583 : f32
    %310 = vector.broadcast %cst_111 : f32 to vector<48x64xf32>
    %311 = arith.mulf %310, %309 : vector<48x64xf32>
    %312 = math.tanh %311 : vector<48x64xf32>
    %cst_112 = arith.constant 1.000000e+00 : f32
    %313 = vector.broadcast %cst_112 : f32 to vector<48x64xf32>
    %314 = arith.addf %313, %312 : vector<48x64xf32>
    %315 = arith.mulf %304, %314 : vector<48x64xf32>
    %316 = arith.truncf %315 : vector<48x64xf32> to vector<48x64xbf16>
    %cst_113 = arith.constant dense<0.000000e+00> : vector<48x32xf32>
    %317 = tpu.matmul %316, %208, %cst_113 {dimension_numbers = #tpu.dot_dimension_numbers<[1], [0], [0], [1], [0, 0, 1, 1], [], []>} : vector<48x64xbf16>, vector<64x32xbf16>, vector<48x32xf32> -> vector<48x32xf32>
    %318 = vector.extract_strided_slice %210 {offsets = [3, 0], sizes = [1, 32], strides = [1, 1]} : vector<6x32xf32> to vector<1x32xf32>
    %319 = vector.shape_cast %318 : vector<1x32xf32> to vector<32xf32>
    %320 = vector.shape_cast %319 : vector<32xf32> to vector<1x32xf32>
    %321 = vector.broadcast %320 : vector<1x32xf32> to vector<48x32xf32>
    %322 = arith.addf %317, %321 : vector<48x32xf32>
    %323 = arith.addf %298, %322 : vector<48x32xf32>
    %324 = vector.extract_strided_slice %210 {offsets = [4, 0], sizes = [1, 32], strides = [1, 1]} : vector<6x32xf32> to vector<1x32xf32>
    %325 = vector.shape_cast %324 : vector<1x32xf32> to vector<32xf32>
    %326 = vector.extract_strided_slice %210 {offsets = [5, 0], sizes = [1, 32], strides = [1, 1]} : vector<6x32xf32> to vector<1x32xf32>
    %327 = vector.shape_cast %326 : vector<1x32xf32> to vector<32xf32>
    %cst_114 = arith.constant dense<0.000000e+00> : vector<48xf32>
    %328 = vector.multi_reduction <add>, %323, %cst_114 [1] : vector<48x32xf32> to vector<48xf32>
    %329 = vector.shape_cast %328 : vector<48xf32> to vector<48x1xf32>
    %cst_115 = arith.constant 3.200000e+01 : f32
    %330 = vector.broadcast %cst_115 : f32 to vector<48x1xf32>
    %331 = arith.divf %329, %330 : vector<48x1xf32>
    %332 = vector.broadcast %331 : vector<48x1xf32> to vector<48x32xf32>
    %333 = arith.subf %323, %332 : vector<48x32xf32>
    %334 = arith.mulf %333, %333 : vector<48x32xf32>
    %cst_116 = arith.constant dense<0.000000e+00> : vector<48xf32>
    %335 = vector.multi_reduction <add>, %334, %cst_116 [1] : vector<48x32xf32> to vector<48xf32>
    %336 = vector.shape_cast %335 : vector<48xf32> to vector<48x1xf32>
    %cst_117 = arith.constant 3.200000e+01 : f32
    %337 = vector.broadcast %cst_117 : f32 to vector<48x1xf32>
    %338 = arith.divf %336, %337 : vector<48x1xf32>
    %339 = vector.broadcast %331 : vector<48x1xf32> to vector<48x32xf32>
    %340 = arith.subf %323, %339 : vector<48x32xf32>
    %cst_118 = arith.constant 9.99999996E-13 : f32
    %341 = vector.broadcast %cst_118 : f32 to vector<48x1xf32>
    %342 = arith.addf %338, %341 : vector<48x1xf32>
    %343 = math.rsqrt %342 : vector<48x1xf32>
    %344 = vector.broadcast %343 : vector<48x1xf32> to vector<48x32xf32>
    %345 = arith.mulf %340, %344 : vector<48x32xf32>
    %346 = vector.shape_cast %325 : vector<32xf32> to vector<1x32xf32>
    %347 = vector.broadcast %346 : vector<1x32xf32> to vector<48x32xf32>
    %348 = arith.mulf %345, %347 : vector<48x32xf32>
    %349 = vector.shape_cast %327 : vector<32xf32> to vector<1x32xf32>
    %350 = vector.broadcast %349 : vector<1x32xf32> to vector<48x32xf32>
    %351 = arith.addf %348, %350 : vector<48x32xf32>
    %352 = vector.shape_cast %351 : vector<48x32xf32> to vector<6x8x32xf32>
    %353 = vector.extract_strided_slice %352 {offsets = [0, 0, 0], sizes = [6, 1, 32], strides = [1, 1, 1]} : vector<6x8x32xf32> to vector<6x1x32xf32>
    %354 = vector.shape_cast %353 : vector<6x1x32xf32> to vector<6x32xf32>
    %c0_119 = arith.constant 0 : index
    %c0_120 = arith.constant 0 : index
    %355 = vector.load %arg13[%c0_119, %c0_120] : memref<6x32xf32, #tpu.memory_space<vmem>>, vector<6x32xf32>
    tpu.vector_store %arg13[%c0_119, %c0_120], %354 {strides = array<i32>} : memref<6x32xf32, #tpu.memory_space<vmem>>, vector<6x32xf32>,
    return
  }
  func.func @transform_0(%arg0: i32) -> (i32, i32) {
    %c0_i32 = arith.constant 0 : i32
    %c0_i32_0 = arith.constant 0 : i32
    %c0_i32_1 = arith.constant 0 : i32
    return %c0_i32, %c0_i32_0 : i32, i32
  }
  func.func @transform_1(%arg0: i32) -> (i32, i32) {
    %c0_i32 = arith.constant 0 : i32
    %c0_i32_0 = arith.constant 0 : i32
    %c0_i32_1 = arith.constant 0 : i32
    return %c0_i32, %c0_i32_0 : i32, i32
  }
  func.func @transform_2(%arg0: i32) -> (i32, i32) {
    %c0_i32 = arith.constant 0 : i32
    %c0_i32_0 = arith.constant 0 : i32
    %c0_i32_1 = arith.constant 0 : i32
    return %c0_i32, %c0_i32_0 : i32, i32
  }
  func.func @transform_3(%arg0: i32) -> (i32, i32) {
    %c0_i32 = arith.constant 0 : i32
    %c0_i32_0 = arith.constant 0 : i32
    %c0_i32_1 = arith.constant 0 : i32
    return %c0_i32, %c0_i32_0 : i32, i32
  }
  func.func @transform_4(%arg0: i32) -> (i32, i32) {
    %c0_i32 = arith.constant 0 : i32
    %c0_i32_0 = arith.constant 0 : i32
    %c0_i32_1 = arith.constant 0 : i32
    return %c0_i32, %c0_i32_0 : i32, i32
  }
  func.func @transform_5(%arg0: i32) -> (i32, i32, i32) {
    %c0_i32 = arith.constant 0 : i32
    %c0_i32_0 = arith.constant 0 : i32
    %c0_i32_1 = arith.constant 0 : i32
    %c0_i32_2 = arith.constant 0 : i32
    return %c0_i32, %c0_i32_0, %c0_i32_1 : i32, i32, i32
  }
  func.func @transform_6(%arg0: i32) -> (i32, i32, i32) {
    %c0_i32 = arith.constant 0 : i32
    %c0_i32_0 = arith.constant 0 : i32
    %c0_i32_1 = arith.constant 0 : i32
    %c0_i32_2 = arith.constant 0 : i32
    return %c0_i32, %c0_i32_0, %c0_i32_1 : i32, i32, i32
  }
  func.func @transform_7(%arg0: i32) -> (i32, i32, i32, i32) {
    %c0_i32 = arith.constant 0 : i32
    %c0_i32_0 = arith.constant 0 : i32
    %c0_i32_1 = arith.constant 0 : i32
    %c0_i32_2 = arith.constant 0 : i32
    %c0_i32_3 = arith.constant 0 : i32
    return %c0_i32, %c0_i32_0, %c0_i32_1, %c0_i32_2 : i32, i32, i32, i32
  }
  func.func @transform_8(%arg0: i32) -> (i32, i32, i32) {
    %c0_i32 = arith.constant 0 : i32
    %c0_i32_0 = arith.constant 0 : i32
    %c0_i32_1 = arith.constant 0 : i32
    %c0_i32_2 = arith.constant 0 : i32
    return %c0_i32, %c0_i32_0, %c0_i32_1 : i32, i32, i32
  }
  func.func @transform_9(%arg0: i32) -> (i32, i32, i32) {
    %c0_i32 = arith.constant 0 : i32
    %c0_i32_0 = arith.constant 0 : i32
    %c0_i32_1 = arith.constant 0 : i32
    %c0_i32_2 = arith.constant 0 : i32
    return %c0_i32, %c0_i32_0, %c0_i32_1 : i32, i32, i32
  }
  func.func @transform_10(%arg0: i32) -> (i32, i32, i32) {
    %c0_i32 = arith.constant 0 : i32
    %c0_i32_0 = arith.constant 0 : i32
    %c0_i32_1 = arith.constant 0 : i32
    %c0_i32_2 = arith.constant 0 : i32
    return %c0_i32, %c0_i32_0, %c0_i32_1 : i32, i32, i32
  }
  func.func @transform_11(%arg0: i32) -> (i32, i32, i32) {
    %c0_i32 = arith.constant 0 : i32
    %c0_i32_0 = arith.constant 0 : i32
    %c0_i32_1 = arith.constant 0 : i32
    %c0_i32_2 = arith.constant 0 : i32
    return %c0_i32, %c0_i32_0, %c0_i32_1 : i32, i32, i32
  }
  func.func @transform_12(%arg0: i32) -> (i32, i32) {
    %c0_i32 = arith.constant 0 : i32
    %c0_i32_0 = arith.constant 0 : i32
    %c0_i32_1 = arith.constant 0 : i32
    return %c0_i32, %c0_i32_0 : i32, i32
  }
}

</mosaic_0001>

<bundles_post_ra>
// kernel: bert_embedder_forward.1
= control target key start
LH: loop header
LB: loop body
LE: loop exit
PB: predicated region body
PF: predicated region fallthrough
CT: control target
= control target key end

     0   :  { %v49_v0 = vlaneseq  ;;  %v3552_v2 = vmov 0.0   ;;  %vm3553_vm0 = vmmov 0   ;;  %vm176_vm1 = vcmask 1040384   ;;  %s3555_s16 = smov 80   ;;  %s3556_s17 = smov 112   ;;  %s4593_s0 = inlined_call_operand.vmem [shape: s32[6,8], index: 0, kind: input, shape index: {}]   ;;  %s4594_s2 = inlined_call_operand.vmem [shape: bf16[50,32], index: 2, kind: input, shape index: {}]   ;;  %s4595_s8 = inlined_call_operand.vmem [shape: f32[2,6,32], index: 8, kind: input, shape index: {}]   ;;  %s4596_s3 = inlined_call_operand.vmem [shape: f32[48,32], index: 3, kind: input, shape index: {}]   ;;  %s4597_s5 = inlined_call_operand.vmem [shape: bf16[2,32,96], index: 5, kind: input, shape index: {}]   ;;  %s4598_s4 = inlined_call_operand.vmem [shape: f32[2,32], index: 4, kind: input, shape index: {}]   ;;  %s4599_s6 = inlined_call_operand.vmem [shape: f32[2,1,96], index: 6, kind: input, shape index: {}]   ;;  %s4600_s1 = inlined_call_operand.vmem [shape: f32[48,48], index: 1, kind: input, shape index: {}]   ;;  %s4601_s7 = inlined_call_operand.vmem [shape: bf16[2,2,16,32], index: 7, kind: input, shape index: {}]   ;;  %s4602_s9 = inlined_call_operand.vmem [shape: bf16[2,32,64], index: 9, kind: input, shape index: {}]   ;;  %s4603_s11 = inlined_call_operand.vmem [shape: bf16[2,64,32], index: 11, kind: input, shape index: {}]   ;;  %s4604_s10 = inlined_call_operand.vmem [shape: f32[2,1,64], index: 10, kind: input, shape index: {}]   ;;  %s4605_s12 = inlined_call_operand.vmem [shape: f32[6,32], index: 12, kind: output, shape index: {}]  }
   0x1   :  { %v48_v1 = vld [vmem:[%s4593_s0] sm:$0x3f]  ;;  %3008 = vmatprep.subr.bf16.mxu0 %v3552_v2  ;;  %3028 = vmatprep.subr.bf16.mxu1 %v3552_v2  ;;  %v2860_v5 = vld [vmem:[%s4595_s8 + $0x8] sm:$0x3f]  ;;  %v3343_v27 = vld [vmem:[%s4594_s2 + $0x10] sm:$0xff]   ;;  %vm166_vm4 = vcmask 408576  }
   0x2   :  { %v50_v3 = vshrl.u32 %v49_v0, 7  ;;  %v3341_v4 = vld [vmem:[%s4594_s2] sm:$0xff]   ;;  %v3342_v10 = vld [vmem:[%s4594_s2 + $0x8] sm:$0xff]   ;;  %3016 = vmatprep.mubr.msk.bf16.mxu0 %vm3553_vm0, %v3552_v2  ;;  %3032 = vmatprep.mubr.msk.bf16.mxu1 %vm3553_vm0, %v3552_v2  ;;  %v3344_v30 = vld [vmem:[%s4594_s2 + $0x18] ss:$0 sps:$4 sm:$0x11]  }
   0x3   :  { %3009 = vmatpush3.bf16.msra.mxu0 %v3341_v4  ;;  %v361_v12 = vld [vmem:[%s4595_s8] sm:$0x3f]  ;;  %v178_v33 = vsel %vm176_vm1, %v3344_v30, 0  ;;  %v92_v34 = vand.u32 127, %v49_v0  ;;  %v125_v52 = vld [vmem:[%s4596_s3 + $0x8] sm:$0xff]  ;;  %vm239_vm9 = vcmask 261120  }
   0x4   :  { %v3635_v6 = vsub.s32 0, %v50_v3  ;;  %v65_v7 = vsub.s32 2, %v50_v3  ;;  %v58_v8 = vsub.s32 1, %v50_v3  ;;  %v72_v9 = vsub.s32 3, %v50_v3  ;;  %3010 = vmatprep.subr.bf16.mxu0 %v3552_v2  ;;  %v124_v50 = vld [vmem:[%s4596_s3] sm:$0xff]  ;;  %v126_v60 = vld [vmem:[%s4596_s3 + $0x10] sm:$0xff] }
   0x5   :  { %v86_v15 = vsub.s32 5, %v50_v3  ;;  %v79_v23 = vsub.s32 4, %v50_v3  ;;  %v127_v62 = vld [vmem:[%s4596_s3 + $0x18] sm:$0xff]  ;;  %s3554_s2 = smov 96   ;;  %s3557_s18 = smov 64   ;;  %vm461_vm10 = vcmask 130048  }
   0x6   :  { %v52_v11 = vrot.slane %v48_v1, %v3635_v6  ;;  %v3646_v13 = vrot.slane %v2860_v5, %v3635_v6  ;;  %v66_v14 = vrot.slane %v48_v1, %v65_v7  ;;  %v3650_v16 = vrot.slane %v361_v12, %v65_v7  ;;  %s3558_s29 = smov 48  }
   0x7   :  { %v3652_v17 = vrot.slane %v2860_v5, %v65_v7  ;;  %v59_v18 = vrot.slane %v48_v1, %v58_v8  ;;  %v3654_v19 = vrot.slane %v361_v12, %v58_v8  ;;  %v3658_v20 = vrot.slane %v2860_v5, %v58_v8  ;;  %3011 = vmatpush3.bf16.msra.mxu0 %v3342_v10  ;;  %v128_v7 = vld [vmem:[%s4596_s3 + $0x20] sm:$0xff]  ;;  %v129_v10 = vld [vmem:[%s4596_s3 + $0x28] sm:$0xff] }
   0x8   :  { %54 = vbcast.lane.b32.xlu0 %v52_v11, 256  ;;  %68 = vbcast.lane.b32.xlu1 %v66_v14, 256  ;;  %v73_v21 = vrot.slane %v48_v1, %v72_v9  ;;  %v3660_v22 = vrot.slane %v361_v12, %v72_v9  ;;  %v3662_v24 = vrot.slane %v2860_v5, %v72_v9  ;;  %vm549_vm11 = vcmask 392192  }
   0x9   :  { %v3664_v25 = vrot.slane %v361_v12, %v86_v15  ;;  %v3666_v26 = vrot.slane %v2860_v5, %v86_v15  ;;  %v3671_v28 = vrot.slane %v361_v12, %v79_v23  ;;  %v3673_v29 = vrot.slane %v2860_v5, %v79_v23  ;;  %3012 = vmatprep.subr.bf16.mxu0 %v3552_v2 }
   0xa   :  { %v87_v31 = vrot.slane %v48_v1, %v86_v15  ;;  %v80_v32 = vrot.slane %v48_v1, %v79_v23  ;;  %vm1373_vm12 = vcmask 523264   ;;  %vm2760_vm13 = vcmask 1041409  }
   0xb   :  { %3013 = vmatpush3.bf16.msra.mxu0 %v3343_v27  ;;  %vm2763_vm14 = vcmask 1042434   ;;  %vm2766_vm15 = vcmask 1043459   ;;  %vm2772_vm1 = vcmask 1045509  }
   0xc   :  { %61 = vbcast.lane.b32.xlu0 %v59_v18, 256  ;;  %75 = vbcast.lane.b32.xlu1 %v73_v21, 256 }
   0xd   :  { %3014 = vmatprep.subr.bf16.mxu0 %v3552_v2 }
   0xf   :  { %3015 = vmatpush3.bf16.msra.mxu0 %v178_v33 }
  0x10   :  { %89 = vbcast.lane.b32.xlu1 %v87_v31, 256  ;;  %82 = vbcast.lane.b32.xlu0 %v80_v32, 256 }
  0x11   :  { %3062 = vmatprep.subr.bf16.mxu0 %v3552_v2 }
  0x7a   :  { %v55_v35 = vpop.permute.xlu0 %54  ;;  %v69_v36 = vpop.permute.xlu1 %68 }
  0x7b   :  { %vm93_vm2 = vcmp.eq.s32.totalorder %v55_v35, %v92_v34  ;;  %vm95_vm5 = vcmp.eq.s32.totalorder %v69_v36, %v92_v34 }
  0x7c   :  { %v2781_v38 = vsel %vm93_vm2, 1.0, %v3552_v2  ;;  %v2783_v42 = vsel %vm95_vm5, 1.0, %v3552_v2  ;;  %vm2775_vm2 = vcmask 259072  }
  0x7e   :  { %v62_v37 = vpop.permute.xlu0 %61  ;;  %v76_v40 = vpop.permute.xlu1 %75 }
  0x7f   :  { %vm94_vm3 = vcmp.eq.s32.totalorder %v62_v37, %v92_v34  ;;  %vm96_vm6 = vcmp.eq.s32.totalorder %v76_v40, %v92_v34 }
  0x80   :  { %v2782_v39 = vsel %vm94_vm3, 1.0, %v3552_v2  ;;  %v2784_v43 = vsel %vm96_vm6, 1.0, %v3552_v2 }
  0x81   :  { %v2900_v41 = vpack.c.bf16 %v2782_v39, %v2781_v38  ;;  %v2901_v46 = vpack.c.bf16 %v2784_v43, %v2783_v42 }
  0x82   :  { %v90_v44 = vpop.permute.xlu1 %89  ;;  %v83_v45 = vpop.permute.xlu0 %82 }
  0x83   :  { %3017 = vmatmul.mubr.msk.bf16.vlgmr.msra.gmra.mrb[0].mxu0 %vm166_vm4, %v2900_v41  ;;  %vm98_vm7 = vcmp.eq.s32.totalorder %v90_v44, %v92_v34  ;;  %vm97_vm8 = vcmp.eq.s32.totalorder %v83_v45, %v92_v34 }
  0x84   :  { %3020 = vmatprep.mubr.msk.bf16.mxu0 %vm3553_vm0, %v3552_v2  ;;  %v2786_v47 = vsel %vm98_vm7, 1.0, %v3552_v2  ;;  %v2785_v48 = vsel %vm97_vm8, 1.0, %v3552_v2 }
  0x85   :  { %v2902_v49 = vpack.c.bf16 %v2786_v47, %v2785_v48 }
  0x8b   :  { %3021 = vmatmul.mubr.msk.bf16.gmra.mrb[4].mxu0 %vm166_vm4, %v2901_v46 }
  0x8c   :  { %3024 = vmatprep.mubr.msk.bf16.mxu0 %vm3553_vm0, %v3552_v2 }
  0x93   :  { %3025 = vmatmul.mubr.msk.bf16.gmra.mrb[8].mxu0 %vm166_vm4, %v2902_v49 }
  0x94   :  { %3068 = vmatprep.mubr.msk.bf16.mxu0 %vm3553_vm0, %v3552_v2 }
 0x156   :  { %v214_v51 = vpop.f32.mrb[0].mxu0 }
 0x157   :  { %v215_v53 = vadd.f32 %v214_v51, %v124_v50  ;;  %v3018_v54 = vpop.f32.mrb[1].mxu0 }
 0x158   :  { %v217_v55 = vpop.f32.mrb[2].mxu0 }
 0x159   :  { %v218_v56 = vadd.f32 %v217_v55, %v125_v52  ;;  %v3019_v57 = vpop.f32.mrb[3].mxu0  ;;  %v240_v58 = vsel %vm239_vm9, %v215_v53, 0.0 }
 0x15a   :  { %241 = vadd.xlane.f32.xlu0 %v240_v58 }
 0x15b   :  { %v243_v59 = vsel %vm239_vm9, %v218_v56, 0.0 }
 0x15c   :  { %244 = vadd.xlane.f32.xlu1 %v243_v59  ;;  %v3345_v59 = vld [vmem:[%s4597_s5] sm:$0xff]  }
 0x15d   :  { %3029 = vmatpush3.bf16.msra.mxu1 %v3345_v59 }
 0x15e   :  { %v222_v61 = vpop.f32.mrb[4].mxu0  ;;  %3030 = vmatprep.subr.bf16.mxu1 %v3552_v2 }
 0x15f   :  { %v223_v63 = vadd.f32 %v222_v61, %v126_v60  ;;  %v3022_v0 = vpop.f32.mrb[5].mxu0  ;;  %v3346_v60 = vld [vmem:[%s4597_s5 + $0x8] sm:$0xff]  }
 0x160   :  { %v225_v1 = vpop.f32.mrb[6].mxu0 }
 0x161   :  { %v226_v3 = vadd.f32 %v225_v1, %v127_v62  ;;  %v3023_v4 = vpop.f32.mrb[7].mxu0  ;;  %v246_v5 = vsel %vm239_vm9, %v223_v63, 0.0  ;;  %3031 = vmatpush3.bf16.msra.mxu1 %v3346_v60 }
 0x162   :  { %247 = vadd.xlane.f32.xlu0 %v246_v5  ;;  %3044 = vmatprep.subr.bf16.mxu1 %v3552_v2 }
 0x163   :  { %v249_v8 = vsel %vm239_vm9, %v226_v3, 0.0 }
 0x166   :  { %250 = vadd.xlane.f32.xlu0 %v249_v8  ;;  %v230_v9 = vpop.f32.mrb[8].mxu0 }
 0x167   :  { %v231_v11 = vadd.f32 %v230_v9, %v128_v7  ;;  %v3026_v12 = vpop.f32.mrb[9].mxu0 }
 0x168   :  { %v233_v14 = vpop.f32.mrb[10].mxu0  ;;  %v2797_v12 = vld [vmem:[%s4598_s4] ss:$0 sm:$0xff] }
 0x169   :  { %v234_v15 = vadd.f32 %v233_v14, %v129_v10  ;;  %v3027_v18 = vpop.f32.mrb[11].mxu0  ;;  %v252_v21 = vsel %vm239_vm9, %v231_v11, 0.0 }
 0x16a   :  { %253 = vadd.xlane.f32.xlu1 %v252_v21 }
 0x16b   :  { %v255_v23 = vsel %vm239_vm9, %v234_v15, 0.0 }
 0x16c   :  { %256 = vadd.xlane.f32.xlu0 %v255_v23 }
 0x1e7   :  { %v242_v27 = vpop.xlane.xlu0 %241 }
 0x1e8   :  { %v259_v30 = vmul.f32 0.03125, %v242_v27 }
 0x1e9   :  { %v245_v31 = vpop.xlane.xlu1 %244 }
 0x1ea   :  { %v265_v32 = vsub.f32 %v215_v53, %v259_v30  ;;  %v260_v33 = vmul.f32 0.03125, %v245_v31 }
 0x1ec   :  { %v266_v34 = vsub.f32 %v218_v56, %v260_v33  ;;  %v271_v35 = vmul.f32 %v265_v32, %v265_v32 }
 0x1ee   :  { %v277_v36 = vsel %vm239_vm9, %v271_v35, 0.0  ;;  %v272_v37 = vmul.f32 %v266_v34, %v266_v34  ;;  %v2798_v35 = vld [vmem:[%s4598_s4 + $0x1] ss:$0 sm:$0xff] }
 0x1ef   :  { %278 = vadd.xlane.f32.xlu1 %v277_v36  ;;  %v248_v38 = vpop.xlane.xlu0 %247 }
 0x1f0   :  { %v261_v39 = vmul.f32 0.03125, %v248_v38  ;;  %v280_v40 = vsel %vm239_vm9, %v272_v37, 0.0 }
 0x1f1   :  { %281 = vadd.xlane.f32.xlu0 %v280_v40 }
 0x1f2   :  { %v3722_v41 = vsub.f32 %v223_v63, %v261_v39 }
 0x1f3   :  { %v251_v42 = vpop.xlane.xlu0 %250 }
 0x1f4   :  { %v262_v43 = vmul.f32 0.03125, %v251_v42  ;;  %v273_v44 = vmul.f32 %v3722_v41, %v3722_v41 }
 0x1f6   :  { %v3726_v45 = vsub.f32 %v226_v3, %v262_v43  ;;  %v283_v46 = vsel %vm239_vm9, %v273_v44, 0.0 }
 0x1f7   :  { %v254_v47 = vpop.xlane.xlu1 %253  ;;  %284 = vadd.xlane.f32.xlu1 %v283_v46 }
 0x1f8   :  { %v263_v48 = vmul.f32 0.03125, %v254_v47  ;;  %v274_v49 = vmul.f32 %v3726_v45, %v3726_v45 }
 0x1f9   :  { %v257_v50 = vpop.xlane.xlu0 %256 }
 0x1fa   :  { %v3731_v51 = vsub.f32 %v231_v11, %v263_v48  ;;  %v264_v52 = vmul.f32 0.03125, %v257_v50  ;;  %v286_v53 = vsel %vm239_vm9, %v274_v49, 0.0 }
 0x1fb   :  { %287 = vadd.xlane.f32.xlu0 %v286_v53 }
 0x1fc   :  { %v3734_v54 = vsub.f32 %v234_v15, %v264_v52  ;;  %v275_v55 = vmul.f32 %v3731_v51, %v3731_v51 }
 0x1fe   :  { %v289_v56 = vsel %vm239_vm9, %v275_v55, 0.0  ;;  %v276_v57 = vmul.f32 %v3734_v54, %v3734_v54 }
 0x1ff   :  { %290 = vadd.xlane.f32.xlu1 %v289_v56 }
 0x200   :  { %v292_v58 = vsel %vm239_vm9, %v276_v57, 0.0 }
 0x201   :  { %293 = vadd.xlane.f32.xlu0 %v292_v58 }
 0x27c   :  { %v279_v61 = vpop.xlane.xlu1 %278 }
 0x27d   :  { %v295_v62 = vmul.f32 0.03125, %v279_v61 }
 0x27e   :  { %v282_v63 = vpop.xlane.xlu0 %281 }
 0x27f   :  { %v301_v0 = vadd.f32 1e-12, %v295_v62  ;;  %v296_v1 = vmul.f32 0.03125, %v282_v63 }
 0x281   :  { %3365 = vrsqrt.f32 %v301_v0  ;;  %v302_v3 = vadd.f32 1e-12, %v296_v1 }
 0x283   :  { %3367 = vrsqrt.f32 %v302_v3 }
 0x284   :  { %v285_v4 = vpop.xlane.xlu1 %284 }
 0x285   :  { %v297_v5 = vmul.f32 0.03125, %v285_v4 }
 0x287   :  { %v303_v7 = vadd.f32 1e-12, %v297_v5 }
 0x288   :  { %v288_v8 = vpop.xlane.xlu0 %287 }
 0x289   :  { %3369 = vrsqrt.f32 %v303_v7  ;;  %v298_v9 = vmul.f32 0.03125, %v288_v8 }
 0x28b   :  { %v3366_v10 = vpop.eup %3365  ;;  %v304_v11 = vadd.f32 1e-12, %v298_v9 }
 0x28c   :  { %v291_v14 = vpop.xlane.xlu1 %290  ;;  %v313_v15 = vmul.f32 %v3366_v10, %v265_v32 }
 0x28d   :  { %v3368_v18 = vpop.eup %3367  ;;  %3371 = vrsqrt.f32 %v304_v11  ;;  %v299_v21 = vmul.f32 0.03125, %v291_v14 }
 0x28e   :  { %v294_v23 = vpop.xlane.xlu0 %293  ;;  %v314_v27 = vmul.f32 %v3368_v18, %v266_v34  ;;  %v323_v30 = vmul.f32 %v2797_v12, %v313_v15 }
 0x28f   :  { %v305_v31 = vadd.f32 1e-12, %v299_v21  ;;  %v300_v33 = vmul.f32 0.03125, %v294_v23 }
 0x290   :  { %v324_v36 = vmul.f32 %v2797_v12, %v314_v27  ;;  %v3756_v38 = vadd.f32 %v2798_v35, %v323_v30 }
 0x291   :  { %3373 = vrsqrt.f32 %v305_v31  ;;  %v306_v37 = vadd.f32 1e-12, %v300_v33 }
 0x292   :  { %v3758_v39 = vadd.f32 %v2798_v35, %v324_v36 }
 0x293   :  { %v3370_v32 = vpop.eup %3369  ;;  %3375 = vrsqrt.f32 %v306_v37 }
 0x294   :  { %v362_v40 = vpack.c.bf16 %v3758_v39, %v3756_v38  ;;  %v315_v34 = vmul.f32 %v3370_v32, %v3722_v41 }
 0x296   :  { %3033 = vmatmul.mubr.msk.bf16.vlgmr.msra.gmra.mrb[0].mxu1 %vm239_vm9, %v362_v40  ;;  %v325_v44 = vmul.f32 %v2797_v12, %v315_v34 }
 0x297   :  { %v3372_v42 = vpop.eup %3371  ;;  %3036 = vmatprep.mubr.msk.bf16.mxu1 %vm3553_vm0, %v3552_v2 }
 0x298   :  { %v316_v43 = vmul.f32 %v3372_v42, %v3726_v45  ;;  %v3767_v48 = vadd.f32 %v2798_v35, %v325_v44 }
 0x29a   :  { %v326_v46 = vmul.f32 %v2797_v12, %v316_v43 }
 0x29b   :  { %v3374_v47 = vpop.eup %3373 }
 0x29c   :  { %v3769_v49 = vadd.f32 %v2798_v35, %v326_v46  ;;  %v317_v50 = vmul.f32 %v3374_v47, %v3731_v51 }
 0x29d   :  { %v3376_v52 = vpop.eup %3375 }
 0x29e   :  { %v363_v41 = vpack.c.bf16 %v3769_v49, %v3767_v48  ;;  %v318_v53 = vmul.f32 %v3376_v52, %v3734_v54  ;;  %v327_v55 = vmul.f32 %v2797_v12, %v317_v50  ;;  %v2799_v54 = vld [vmem:[%s4599_s6] ss:$0 sm:$0xff] }
 0x29f   :  { %v42_v52 = vld [vmem:[%s4600_s1] sm:$0xff] }
 0x2a0   :  { %3037 = vmatmul.mubr.msk.bf16.gmra.mrb[4].mxu1 %vm239_vm9, %v363_v41  ;;  %v328_v56 = vmul.f32 %v2797_v12, %v318_v53  ;;  %v3780_v57 = vadd.f32 %v2798_v35, %v327_v55 }
 0x2a1   :  { %3040 = vmatprep.mubr.msk.bf16.mxu1 %vm3553_vm0, %v3552_v2 }
 0x2a2   :  { %v3778_v45 = vadd.f32 %v2798_v35, %v328_v56  ;;  %v43_v56 = vld [vmem:[%s4600_s1 + $0x8] sm:$0xff] }
 0x2a4   :  { %v364_v51 = vpack.c.bf16 %v3778_v45, %v3780_v57 }
 0x2a8   :  { %3041 = vmatmul.mubr.msk.bf16.gmra.mrb[8].mxu1 %vm239_vm9, %v364_v51 }
 0x2a9   :  { %3050 = vmatprep.mubr.msk.bf16.mxu1 %vm3553_vm0, %v3552_v2 }
 0x369   :  { %v426_v58 = vpop.f32.mrb[0].mxu1 }
 0x36a   :  { %v3034_v59 = vpop.f32.mrb[1].mxu1  ;;  %v427_v61 = vadd.f32 %v2799_v54, %v426_v58 }
 0x36b   :  { %v429_v60 = vpop.f32.mrb[2].mxu1 }
 0x36c   :  { %v430_v62 = vadd.f32 %v2799_v54, %v429_v60  ;;  %v3035_v63 = vpop.f32.mrb[3].mxu1 }
 0x36d   :  { %v44_v63 = vld [vmem:[%s4600_s1 + $0x10] sm:$0xff] }
 0x36e   :  { %v3790_v0 = vpack.c.bf16 %v430_v62, %v427_v61 }
 0x370   :  { %455 = vrot.lane.b32.xlu1 %v3790_v0, %s3554_s2 }
 0x373   :  { %v434_v1 = vpop.f32.mrb[4].mxu1 }
 0x374   :  { %v3038_v3 = vpop.f32.mrb[5].mxu1  ;;  %v435_v5 = vadd.f32 %v2799_v54, %v434_v1 }
 0x375   :  { %v437_v4 = vpop.f32.mrb[6].mxu1 }
 0x376   :  { %v438_v7 = vadd.f32 %v2799_v54, %v437_v4  ;;  %v3039_v8 = vpop.f32.mrb[7].mxu1 }
 0x378   :  { %v3794_v9 = vpack.c.bf16 %v438_v7, %v435_v5  ;;  %v45_v5 = vld [vmem:[%s4600_s1 + $0x18] sm:$0xff] }
 0x37a   :  { %457 = vrot.lane.b32.xlu0 %v3794_v9, %s3554_s2 }
 0x37b   :  { %v442_v10 = vpop.f32.mrb[8].mxu1 }
 0x37c   :  { %v3042_v11 = vpop.f32.mrb[9].mxu1  ;;  %v443_v14 = vadd.f32 %v2799_v54, %v442_v10 }
 0x37d   :  { %v445_v12 = vpop.f32.mrb[10].mxu1 }
 0x37e   :  { %v446_v15 = vadd.f32 %v2799_v54, %v445_v12  ;;  %705 = vrot.lane.b32.xlu0 %v3794_v9, %s3555_s16  ;;  %v3043_v18 = vpop.f32.mrb[11].mxu1 }
 0x37f   :  { %v46_v18 = vld [vmem:[%s4600_s1 + $0x20] sm:$0xff] }
 0x380   :  { %v3800_v21 = vpack.c.bf16 %v446_v15, %v443_v14 }
 0x382   :  { %697 = vrot.lane.b32.xlu0 %v3790_v0, %s3556_s17  ;;  %459 = vrot.lane.b32.xlu1 %v3800_v21, %s3554_s2 }
 0x386   :  { %701 = vrot.lane.b32.xlu0 %v3800_v21, %s3556_s17  ;;  %703 = vrot.lane.b32.xlu1 %v3790_v0, %s3555_s16 }
 0x38a   :  { %619 = vrot.lane.b32.xlu0 %v3790_v0, %s3557_s18  ;;  %707 = vrot.lane.b32.xlu1 %v3800_v21, %s3555_s16 }
 0x38e   :  { %699 = vrot.lane.b32.xlu1 %v3794_v9, %s3556_s17 }
 0x3e2   :  { %v456_v23 = vpop.permute.xlu1 %455 }
 0x3e3   :  { %v472_v27 = vsel %vm461_vm10, %v456_v23, 0 }
 0x3e4   :  { %3045 = vmatpush3.bf16.xpose.msra.mxu1 %v472_v27 }
 0x3e5   :  { %3046 = vmatprep.subr.bf16.mxu1 %v3552_v2 }
 0x3ec   :  { %v458_v30 = vpop.permute.xlu0 %457 }
 0x3ed   :  { %v475_v31 = vsel %vm461_vm10, %v458_v30, 0 }
 0x3ee   :  { %3047 = vmatpush3.bf16.xpose.msra.mxu1 %v475_v31  ;;  %v47_v31 = vld [vmem:[%s4600_s1 + $0x28] sm:$0xff] }
 0x3ef   :  { %3048 = vmatprep.subr.bf16.mxu1 %v3552_v2 }
 0x3f0   :  { %v706_v33 = vpop.permute.xlu0 %705 }
 0x3f1   :  { %v722_v43 = vsel %vm461_vm10, %v706_v33, 0 }
 0x3f4   :  { %v460_v35 = vpop.permute.xlu1 %459  ;;  %v698_v36 = vpop.permute.xlu0 %697 }
 0x3f5   :  { %v478_v37 = vsel %vm461_vm10, %v460_v35, 0 }
 0x3f6   :  { %3049 = vmatpush3.bf16.xpose.msra.mxu1 %v478_v37 }
 0x3f7   :  { %3080 = vmatprep.subr.bf16.mxu1 %v3552_v2 }
 0x3f8   :  { %v702_v32 = vpop.permute.xlu0 %701  ;;  %v704_v40 = vpop.permute.xlu1 %703 }
 0x3f9   :  { %v719_v42 = vsel %vm461_vm10, %v704_v40, 0 }
 0x3fc   :  { %v620_v34 = vpop.permute.xlu0 %619  ;;  %v708_v44 = vpop.permute.xlu1 %707 }
 0x3fd   :  { %3051 = vmatmul.mubr.msk.bf16.vlgmr.msra.gmra.mrb[12].mxu1 %vm461_vm10, %v3790_v0  ;;  %3063 = vmatpush3.bf16.msra.mxu0 %v620_v34  ;;  %v725_v46 = vsel %vm461_vm10, %v708_v44, 0 }
 0x3fe   :  { %3081 = vmatpush3.bf16.xpose.msra.mxu1 %v719_v42  ;;  %3054 = vmatprep.mubr.msk.bf16.mxu1 %vm3553_vm0, %v3552_v2 }
 0x3ff   :  { %3082 = vmatprep.subr.bf16.mxu1 %v3552_v2  ;;  %3064 = vmatprep.subr.bf16.mxu0 %v3552_v2 }
 0x400   :  { %v700_v47 = vpop.permute.xlu1 %699 }
 0x405   :  { %3055 = vmatmul.mubr.msk.bf16.gmra.mrb[16].mxu1 %vm461_vm10, %v3794_v9 }
 0x406   :  { %3083 = vmatpush3.bf16.xpose.msra.mxu1 %v722_v43  ;;  %3058 = vmatprep.mubr.msk.bf16.mxu1 %vm3553_vm0, %v3552_v2 }
 0x407   :  { %3084 = vmatprep.subr.bf16.mxu1 %v3552_v2 }
 0x40d   :  { %3059 = vmatmul.mubr.msk.bf16.gmra.mrb[20].mxu1 %vm461_vm10, %v3800_v21 }
 0x40e   :  { %3085 = vmatpush3.bf16.xpose.msra.mxu1 %v725_v46  ;;  %3086 = vmatprep.mubr.msk.bf16.mxu1 %vm3553_vm0, %v3552_v2 }
 0x40f   :  { %3332 = vmatprep.subr.bf16.mxu1 %v3552_v2 }
 0x415   :  { %3087 = vmatmul.mubr.msk.bf16.vlgmr.msra.gmra.mrb[24].mxu1 %vm461_vm10, %v698_v36 }
 0x416   :  { %3090 = vmatprep.mubr.msk.bf16.mxu1 %vm3553_vm0, %v3552_v2 }
 0x41d   :  { %3091 = vmatmul.mubr.msk.bf16.gmra.mrb[28].mxu1 %vm461_vm10, %v700_v47 }
 0x41e   :  { %3094 = vmatprep.mubr.msk.bf16.mxu1 %vm3553_vm0, %v3552_v2 }
 0x425   :  { %3095 = vmatmul.mubr.msk.bf16.gmra.mrb[32].mxu1 %vm461_vm10, %v702_v32 }
 0x426   :  { %3122 = vmatprep.mubr.msk.bf16.mxu1 %vm3553_vm0, %v3552_v2 }
 0x4d0   :  { %v514_v50 = vpop.f32.mrb[12].mxu1 }
 0x4d1   :  { %v537_v41 = vmul.f32 0.25, %v514_v50  ;;  %v3052_v53 = vpop.f32.mrb[13].mxu1 }
 0x4d2   :  { %v517_v55 = vpop.f32.mrb[14].mxu1 }
 0x4d3   :  { %v538_v51 = vmul.f32 0.25, %v517_v55  ;;  %v3053_v54 = vpop.f32.mrb[15].mxu1  ;;  %v3856_v58 = vadd.f32 %v537_v41, %v42_v52 }
 0x4d5   :  { %v550_v59 = vsel %vm549_vm11, %v3856_v58, -inf  ;;  %v3860_v60 = vadd.f32 %v538_v51, %v43_v56 }
 0x4d6   :  { %551 = vmax.xlane.f32.xlu1 %v550_v59 }
 0x4d7   :  { %v553_v61 = vsel %vm549_vm11, %v3860_v60, -inf }
 0x4d8   :  { %554 = vmax.xlane.f32.xlu0 %v553_v61  ;;  %v522_v62 = vpop.f32.mrb[16].mxu1 }
 0x4d9   :  { %v539_v1 = vmul.f32 0.25, %v522_v62  ;;  %v3056_v3 = vpop.f32.mrb[17].mxu1 }
 0x4da   :  { %v525_v4 = vpop.f32.mrb[18].mxu1 }
 0x4db   :  { %v540_v7 = vmul.f32 0.25, %v525_v4  ;;  %v3057_v8 = vpop.f32.mrb[19].mxu1  ;;  %v3870_v10 = vadd.f32 %v539_v1, %v44_v63 }
 0x4dd   :  { %v556_v11 = vsel %vm549_vm11, %v3870_v10, -inf  ;;  %v3874_v12 = vadd.f32 %v540_v7, %v45_v5 }
 0x4de   :  { %557 = vmax.xlane.f32.xlu0 %v556_v11 }
 0x4df   :  { %v559_v14 = vsel %vm549_vm11, %v3874_v12, -inf }
 0x4e0   :  { %560 = vmax.xlane.f32.xlu1 %v559_v14  ;;  %v530_v15 = vpop.f32.mrb[20].mxu1 }
 0x4e1   :  { %v541_v23 = vmul.f32 0.25, %v530_v15  ;;  %v3060_v27 = vpop.f32.mrb[21].mxu1 }
 0x4e2   :  { %v533_v30 = vpop.f32.mrb[22].mxu1 }
 0x4e3   :  { %v542_v33 = vmul.f32 0.25, %v533_v30  ;;  %v3061_v35 = vpop.f32.mrb[23].mxu1  ;;  %v3884_v36 = vadd.f32 %v541_v23, %v46_v18 }
 0x4e5   :  { %v562_v37 = vsel %vm549_vm11, %v3884_v36, -inf  ;;  %v3888_v32 = vadd.f32 %v542_v33, %v47_v31 }
 0x4e6   :  { %563 = vmax.xlane.f32.xlu0 %v562_v37 }
 0x4e7   :  { %v565_v40 = vsel %vm549_vm11, %v3888_v32, -inf }
 0x4e8   :  { %566 = vmax.xlane.f32.xlu1 %v565_v40  ;;  %v761_v34 = vpop.f32.mrb[24].mxu1 }
 0x4e9   :  { %v784_v42 = vmul.f32 0.25, %v761_v34  ;;  %v3088_v43 = vpop.f32.mrb[25].mxu1 }
 0x4ea   :  { %v764_v44 = vpop.f32.mrb[26].mxu1 }
 0x4eb   :  { %v785_v46 = vmul.f32 0.25, %v764_v44  ;;  %v3089_v47 = vpop.f32.mrb[27].mxu1  ;;  %v3892_v50 = vadd.f32 %v784_v42, %v42_v52 }
 0x4ed   :  { %v796_v41 = vsel %vm549_vm11, %v3892_v50, -inf  ;;  %v3896_v53 = vadd.f32 %v785_v46, %v43_v56 }
 0x4ee   :  { %797 = vmax.xlane.f32.xlu0 %v796_v41 }
 0x4ef   :  { %v799_v55 = vsel %vm549_vm11, %v3896_v53, -inf }
 0x4f0   :  { %800 = vmax.xlane.f32.xlu1 %v799_v55  ;;  %v769_v51 = vpop.f32.mrb[28].mxu1 }
 0x4f1   :  { %v786_v54 = vmul.f32 0.25, %v769_v51  ;;  %v3092_v59 = vpop.f32.mrb[29].mxu1 }
 0x4f2   :  { %v772_v61 = vpop.f32.mrb[30].mxu1 }
 0x4f3   :  { %v787_v62 = vmul.f32 0.25, %v772_v61  ;;  %v3093_v1 = vpop.f32.mrb[31].mxu1  ;;  %v3900_v3 = vadd.f32 %v786_v54, %v44_v63 }
 0x4f5   :  { %v802_v52 = vsel %vm549_vm11, %v3900_v3, -inf  ;;  %v3904_v4 = vadd.f32 %v787_v62, %v45_v5 }
 0x4f6   :  { %803 = vmax.xlane.f32.xlu0 %v802_v52 }
 0x4f7   :  { %v805_v56 = vsel %vm549_vm11, %v3904_v4, -inf }
 0x4f8   :  { %806 = vmax.xlane.f32.xlu1 %v805_v56  ;;  %v777_v7 = vpop.f32.mrb[32].mxu1 }
 0x4f9   :  { %v788_v8 = vmul.f32 0.25, %v777_v7  ;;  %v3096_v11 = vpop.f32.mrb[33].mxu1 }
 0x4fa   :  { %v780_v14 = vpop.f32.mrb[34].mxu1 }
 0x4fb   :  { %v789_v15 = vmul.f32 0.25, %v780_v14  ;;  %v3097_v23 = vpop.f32.mrb[35].mxu1  ;;  %v3908_v27 = vadd.f32 %v788_v8, %v46_v18 }
 0x4fd   :  { %v808_v63 = vsel %vm549_vm11, %v3908_v27, -inf  ;;  %v3912_v30 = vadd.f32 %v789_v15, %v47_v31 }
 0x4fe   :  { %809 = vmax.xlane.f32.xlu0 %v808_v63 }
 0x4ff   :  { %v811_v5 = vsel %vm549_vm11, %v3912_v30, -inf }
 0x500   :  { %812 = vmax.xlane.f32.xlu1 %v811_v5 }
 0x511   :  { %621 = vrot.lane.b32.xlu1 %v3794_v9, %s3557_s18 }
 0x514   :  { %623 = vrot.lane.b32.xlu0 %v3800_v21, %s3557_s18 }
 0x563   :  { %v552_v33 = vpop.xlane.xlu1 %551 }
 0x564   :  { %v568_v18 = vsub.f32 %v3856_v58, %v552_v33 }
 0x565   :  { %v555_v35 = vpop.xlane.xlu0 %554 }
 0x566   :  { %v574_v37 = vmul.f32 1.442695, %v568_v18  ;;  %v569_v40 = vsub.f32 %v3860_v60, %v555_v35 }
 0x568   :  { %3377 = vpow2.f32 %v574_v37  ;;  %v576_v31 = vmul.f32 1.442695, %v569_v40 }
 0x56a   :  { %3379 = vpow2.f32 %v576_v31 }
 0x56b   :  { %v558_v34 = vpop.xlane.xlu0 %557 }
 0x56c   :  { %v570_v42 = vsub.f32 %v3870_v10, %v558_v34 }
 0x56d   :  { %v561_v43 = vpop.xlane.xlu1 %560 }
 0x56e   :  { %v578_v44 = vmul.f32 1.442695, %v570_v42  ;;  %v571_v46 = vsub.f32 %v3874_v12, %v561_v43 }
 0x570   :  { %3381 = vpow2.f32 %v578_v44  ;;  %v580_v47 = vmul.f32 1.442695, %v571_v46 }
 0x572   :  { %v3924_v41 = vpop.eup %3377  ;;  %3383 = vpow2.f32 %v580_v47 }
 0x573   :  { %v564_v58 = vpop.xlane.xlu0 %563  ;;  %v586_v55 = vsel %vm549_vm11, %v3924_v41, 0.0 }
 0x574   :  { %v3928_v60 = vpop.eup %3379  ;;  %v572_v51 = vsub.f32 %v3884_v36, %v564_v58  ;;  %587 = vadd.xlane.f32.xlu0 %v586_v55 }
 0x575   :  { %v567_v54 = vpop.xlane.xlu1 %566  ;;  %v589_v10 = vsel %vm549_vm11, %v3928_v60, 0.0 }
 0x576   :  { %v582_v59 = vmul.f32 1.442695, %v572_v51  ;;  %v573_v12 = vsub.f32 %v3888_v32, %v567_v54  ;;  %590 = vadd.xlane.f32.xlu1 %v589_v10 }
 0x578   :  { %3385 = vpow2.f32 %v582_v59  ;;  %v584_v61 = vmul.f32 1.442695, %v573_v12 }
 0x57a   :  { %v3934_v62 = vpop.eup %3381  ;;  %3387 = vpow2.f32 %v584_v61 }
 0x57b   :  { %v798_v1 = vpop.xlane.xlu0 %797  ;;  %v592_v52 = vsel %vm549_vm11, %v3934_v62, 0.0 }
 0x57c   :  { %v3938_v56 = vpop.eup %3383  ;;  %v814_v36 = vsub.f32 %v3892_v50, %v798_v1  ;;  %593 = vadd.xlane.f32.xlu0 %v592_v52 }
 0x57d   :  { %v801_v7 = vpop.xlane.xlu1 %800  ;;  %v595_v8 = vsel %vm549_vm11, %v3938_v56, 0.0 }
 0x57e   :  { %v820_v32 = vmul.f32 1.442695, %v814_v36  ;;  %v815_v11 = vsub.f32 %v3896_v53, %v801_v7  ;;  %596 = vadd.xlane.f32.xlu1 %v595_v8 }
 0x580   :  { %3389 = vpow2.f32 %v820_v32  ;;  %v822_v14 = vmul.f32 1.442695, %v815_v11 }
 0x582   :  { %v3944_v15 = vpop.eup %3385  ;;  %3391 = vpow2.f32 %v822_v14 }
 0x583   :  { %v804_v23 = vpop.xlane.xlu0 %803  ;;  %v598_v63 = vsel %vm549_vm11, %v3944_v15, 0.0 }
 0x584   :  { %v3948_v5 = vpop.eup %3387  ;;  %v816_v50 = vsub.f32 %v3900_v3, %v804_v23  ;;  %599 = vadd.xlane.f32.xlu0 %v598_v63 }
 0x585   :  { %v807_v33 = vpop.xlane.xlu1 %806  ;;  %v601_v18 = vsel %vm549_vm11, %v3948_v5, 0.0 }
 0x586   :  { %v824_v53 = vmul.f32 1.442695, %v816_v50  ;;  %v817_v35 = vsub.f32 %v3904_v4, %v807_v33  ;;  %602 = vadd.xlane.f32.xlu1 %v601_v18 }
 0x588   :  { %3393 = vpow2.f32 %v824_v53  ;;  %v826_v37 = vmul.f32 1.442695, %v817_v35 }
 0x58a   :  { %v3954_v40 = vpop.eup %3389  ;;  %3395 = vpow2.f32 %v826_v37 }
 0x58b   :  { %v832_v31 = vsel %vm549_vm11, %v3954_v40, 0.0  ;;  %v810_v43 = vpop.xlane.xlu0 %809 }
 0x58c   :  { %v3958_v34 = vpop.eup %3391  ;;  %833 = vadd.xlane.f32.xlu1 %v832_v31  ;;  %v818_v51 = vsub.f32 %v3908_v27, %v810_v43 }
 0x58d   :  { %v813_v3 = vpop.xlane.xlu1 %812  ;;  %v835_v42 = vsel %vm549_vm11, %v3958_v34, 0.0 }
 0x58e   :  { %836 = vadd.xlane.f32.xlu0 %v835_v42  ;;  %v828_v54 = vmul.f32 1.442695, %v818_v51  ;;  %v819_v10 = vsub.f32 %v3912_v30, %v813_v3 }
 0x58f   :  { %v624_v58 = vpop.permute.xlu0 %623 }
 0x590   :  { %3397 = vpow2.f32 %v828_v54  ;;  %v830_v59 = vmul.f32 1.442695, %v819_v10 }
 0x591   :  { %v622_v44 = vpop.permute.xlu1 %621 }
 0x592   :  { %v3962_v4 = vpop.eup %3393  ;;  %3065 = vmatpush3.bf16.msra.mxu0 %v622_v44  ;;  %3399 = vpow2.f32 %v830_v59 }
 0x593   :  { %v838_v46 = vsel %vm549_vm11, %v3962_v4, 0.0  ;;  %3066 = vmatprep.subr.bf16.mxu0 %v3552_v2 }
 0x594   :  { %v3967_v47 = vpop.eup %3395  ;;  %839 = vadd.xlane.f32.xlu1 %v838_v46 }
 0x595   :  { %v841_v55 = vsel %vm549_vm11, %v3967_v47, 0.0 }
 0x596   :  { %3067 = vmatpush3.bf16.msra.mxu0 %v624_v58 }
 0x597   :  { %3098 = vmatprep.subr.bf16.mxu0 %v3552_v2 }
 0x598   :  { %842 = vadd.xlane.f32.xlu1 %v841_v55 }
 0x59a   :  { %v3978_v12 = vpop.eup %3397 }
 0x59b   :  { %v844_v61 = vsel %vm549_vm11, %v3978_v12, 0.0 }
 0x59c   :  { %v3982_v1 = vpop.eup %3399 }
 0x5a4   :  { %867 = vrot.lane.b32.xlu0 %v3794_v9, %s3558_s29  ;;  %v847_v9 = vsel %vm549_vm11, %v3982_v1, 0.0 }
 0x5a9   :  { %865 = vrot.lane.b32.xlu1 %v3790_v0, %s3558_s29 }
 0x5c3   :  { %845 = vadd.xlane.f32.xlu0 %v844_v61 }
 0x5cd   :  { %848 = vadd.xlane.f32.xlu1 %v847_v9 }
 0x5d9   :  { %869 = vrot.lane.b32.xlu0 %v3800_v21, %s3558_s29 }
 0x601   :  { %v588_v0 = vpop.xlane.xlu0 %587 }
 0x602   :  { %3401 = vrcp.f32 %v588_v0 }
 0x603   :  { %v591_v27 = vpop.xlane.xlu1 %590 }
 0x604   :  { %3403 = vrcp.f32 %v591_v27 }
 0x609   :  { %v594_v30 = vpop.xlane.xlu0 %593 }
 0x60a   :  { %3405 = vrcp.f32 %v594_v30 }
 0x60b   :  { %v597_v52 = vpop.xlane.xlu1 %596 }
 0x60c   :  { %v3402_v36 = vpop.eup %3401  ;;  %3407 = vrcp.f32 %v597_v52 }
 0x60d   :  { %v610_v8 = vmul.f32 %v3402_v36, %v3924_v41 }
 0x60e   :  { %v3404_v7 = vpop.eup %3403 }
 0x60f   :  { %v611_v32 = vmul.f32 %v3404_v7, %v3928_v60 }
 0x611   :  { %v616_v11 = vpack.c.bf16 %v611_v32, %v610_v8  ;;  %v600_v14 = vpop.xlane.xlu0 %599 }
 0x612   :  { %3409 = vrcp.f32 %v600_v14 }
 0x613   :  { %v603_v23 = vpop.xlane.xlu1 %602  ;;  %3069 = vmatmul.mubr.msk.bf16.vlgmr.msra.gmra.mrb[12].mxu0 %vm549_vm11, %v616_v11 }
 0x614   :  { %v3406_v21 = vpop.eup %3405  ;;  %3411 = vrcp.f32 %v603_v23  ;;  %3072 = vmatprep.mubr.msk.bf16.mxu0 %vm3553_vm0, %v3552_v2 }
 0x615   :  { %v612_v50 = vmul.f32 %v3406_v21, %v3934_v62 }
 0x616   :  { %v3408_v63 = vpop.eup %3407 }
 0x617   :  { %v613_v33 = vmul.f32 %v3408_v63, %v3938_v56 }
 0x619   :  { %v617_v18 = vpack.c.bf16 %v613_v33, %v612_v50  ;;  %v834_v60 = vpop.xlane.xlu1 %833 }
 0x61b   :  { %3073 = vmatmul.mubr.msk.bf16.gmra.mrb[16].mxu0 %vm549_vm11, %v617_v18  ;;  %v837_v56 = vpop.xlane.xlu0 %836 }
 0x61c   :  { %v3410_v41 = vpop.eup %3409  ;;  %3076 = vmatprep.mubr.msk.bf16.mxu0 %vm3553_vm0, %v3552_v2  ;;  %3413 = vrcp.f32 %v837_v56 }
 0x61d   :  { %v614_v35 = vmul.f32 %v3410_v41, %v3944_v15  ;;  %3415 = vrcp.f32 %v834_v60 }
 0x61e   :  { %v3412_v53 = vpop.eup %3411 }
 0x61f   :  { %v615_v37 = vmul.f32 %v3412_v53, %v3948_v5  ;;  %v868_v43 = vpop.permute.xlu0 %867 }
 0x621   :  { %v840_v31 = vpop.xlane.xlu1 %839  ;;  %v618_v3 = vpack.c.bf16 %v615_v37, %v614_v35  ;;  %v3348_v35 = vld [vmem:[%s4601_s7] sm:$0xff]  }
 0x623   :  { %3077 = vmatmul.mubr.msk.bf16.gmra.mrb[20].mxu0 %vm549_vm11, %v618_v3 }
 0x624   :  { %3104 = vmatprep.mubr.msk.bf16.mxu0 %vm3553_vm0, %v3552_v2 }
 0x625   :  { %v843_v62 = vpop.xlane.xlu1 %842 }
 0x626   :  { %3417 = vrcp.f32 %v843_v62  ;;  %v3414_v15 = vpop.eup %3413 }
 0x627   :  { %3419 = vrcp.f32 %v840_v31  ;;  %v3416_v44 = vpop.eup %3415  ;;  %v857_v46 = vmul.f32 %v3414_v15, %v3958_v34 }
 0x628   :  { %v856_v58 = vmul.f32 %v3416_v44, %v3954_v40 }
 0x629   :  { %v866_v42 = vpop.permute.xlu1 %865 }
 0x62a   :  { %3099 = vmatpush3.bf16.msra.mxu0 %v866_v42  ;;  %v862_v51 = vpack.c.bf16 %v857_v46, %v856_v58 }
 0x62b   :  { %3100 = vmatprep.subr.bf16.mxu0 %v3552_v2 }
 0x62e   :  { %3101 = vmatpush3.bf16.msra.mxu0 %v868_v43 }
 0x62f   :  { %3102 = vmatprep.subr.bf16.mxu0 %v3552_v2 }
 0x630   :  { %v3418_v54 = vpop.eup %3417 }
 0x631   :  { %v3420_v10 = vpop.eup %3419  ;;  %v859_v61 = vmul.f32 %v3418_v54, %v3967_v47 }
 0x632   :  { %v858_v34 = vmul.f32 %v3420_v10, %v3962_v4  ;;  %v3347_v4 = vld [vmem:[%s4601_s7 + $0x8] sm:$0xff]  }
 0x633   :  { %3333 = vmatpush3.bf16.msra.mxu1 %v3347_v4 }
 0x634   :  { %v863_v40 = vpack.c.bf16 %v859_v61, %v858_v34  ;;  %3144 = vmatprep.subr.bf16.mxu1 %v3552_v2  ;;  %v3545_v34 = vld [vmem:[%s4595_s8] sm:$0x3f] }
 0x650   :  { %v846_v5 = vpop.xlane.xlu0 %845 }
 0x651   :  { %3421 = vrcp.f32 %v846_v5 }
 0x654   :  { %v870_v55 = vpop.permute.xlu0 %869 }
 0x655   :  { %3103 = vmatpush3.bf16.msra.mxu0 %v870_v55 }
 0x656   :  { %3116 = vmatprep.subr.bf16.mxu0 %v3552_v2 }
 0x658   :  { %3105 = vmatmul.mubr.msk.bf16.vlgmr.msra.gmra.mrb[24].mxu0 %vm549_vm11, %v862_v51 }
 0x659   :  { %3108 = vmatprep.mubr.msk.bf16.mxu0 %vm3553_vm0, %v3552_v2  ;;  %3117 = vmatpush3.bf16.msra.mxu0 %v3347_v4 }
 0x65a   :  { %v849_v59 = vpop.xlane.xlu1 %848  ;;  %3130 = vmatprep.subr.bf16.mxu0 %v3552_v2 }
 0x65b   :  { %3423 = vrcp.f32 %v849_v59  ;;  %v3422_v9 = vpop.eup %3421 }
 0x65c   :  { %v860_v27 = vmul.f32 %v3422_v9, %v3978_v12 }
 0x660   :  { %3109 = vmatmul.mubr.msk.bf16.gmra.mrb[28].mxu0 %vm549_vm11, %v863_v40  ;;  %v1096_v40 = vrot.slane %v3545_v34, %v3635_v6 }
 0x661   :  { %3112 = vmatprep.mubr.msk.bf16.mxu0 %vm3553_vm0, %v3552_v2 }
 0x665   :  { %v3424_v0 = vpop.eup %3423 }
 0x666   :  { %v861_v30 = vmul.f32 %v3424_v0, %v3982_v1 }
 0x668   :  { %v864_v52 = vpack.c.bf16 %v861_v30, %v860_v27 }
 0x66a   :  { %3113 = vmatmul.mubr.msk.bf16.gmra.mrb[32].mxu0 %vm549_vm11, %v864_v52 }
 0x66b   :  { %3118 = vmatprep.mubr.msk.bf16.mxu0 %vm3553_vm0, %v3552_v2 }
 0x6e6   :  { %v671_v47 = vpop.f32.mrb[12].mxu0 }
 0x6e7   :  { %v3070_v12 = vpop.f32.mrb[13].mxu0 }
 0x6e8   :  { %v674_v36 = vpop.f32.mrb[14].mxu0 }
 0x6e9   :  { %v694_v1 = vpack.c.bf16 %v674_v36, %v671_v47  ;;  %v3071_v7 = vpop.f32.mrb[15].mxu0 }
 0x6ee   :  { %v679_v8 = vpop.f32.mrb[16].mxu0 }
 0x6ef   :  { %v3074_v32 = vpop.f32.mrb[17].mxu0 }
 0x6f0   :  { %v682_v11 = vpop.f32.mrb[18].mxu0 }
 0x6f1   :  { %v695_v14 = vpack.c.bf16 %v682_v11, %v679_v8  ;;  %v3075_v23 = vpop.f32.mrb[19].mxu0 }
 0x6f6   :  { %v687_v21 = vpop.f32.mrb[20].mxu0 }
 0x6f7   :  { %v3078_v63 = vpop.f32.mrb[21].mxu0 }
 0x6f8   :  { %v690_v50 = vpop.f32.mrb[22].mxu0 }
 0x6f9   :  { %v696_v33 = vpack.c.bf16 %v690_v50, %v687_v21  ;;  %v3079_v18 = vpop.f32.mrb[23].mxu0 }
 0x72b   :  { %v917_v41 = vpop.f32.mrb[24].mxu0 }
 0x72c   :  { %v3106_v60 = vpop.f32.mrb[25].mxu0 }
 0x72d   :  { %v920_v53 = vpop.f32.mrb[26].mxu0 }
 0x72e   :  { %v940_v37 = vpack.c.bf16 %v920_v53, %v917_v41  ;;  %v3107_v31 = vpop.f32.mrb[27].mxu0 }
 0x730   :  { %3119 = vmatmul.mubr.msk.bf16.vlgmr.msra.gmra.mrb[36].mxu0 %vm461_vm10, %v940_v37 }
 0x731   :  { %3131 = vmatpush3.bf16.msra.mxu0 %v3348_v35  ;;  %3132 = vmatprep.mubr.msk.bf16.mxu0 %vm3553_vm0, %v3552_v2 }
 0x732   :  { %3160 = vmatprep.subr.bf16.mxu0 %v3552_v2 }
 0x733   :  { %v925_v3 = vpop.f32.mrb[28].mxu0 }
 0x734   :  { %v3110_v62 = vpop.f32.mrb[29].mxu0 }
 0x735   :  { %v928_v56 = vpop.f32.mrb[30].mxu0 }
 0x736   :  { %v941_v42 = vpack.c.bf16 %v928_v56, %v925_v3  ;;  %v3111_v43 = vpop.f32.mrb[31].mxu0 }
 0x738   :  { %3123 = vmatmul.mubr.msk.bf16.vlgmr.msra.gmra.mrb[36].mxu1 %vm461_vm10, %v941_v42  ;;  %3133 = vmatmul.mubr.msk.bf16.vlgmr.msra.gmra.mrb[40].mxu0 %vm461_vm10, %v694_v1 }
 0x739   :  { %3136 = vmatprep.mubr.msk.bf16.mxu0 %vm3553_vm0, %v3552_v2  ;;  %3126 = vmatprep.mubr.msk.bf16.mxu1 %vm3553_vm0, %v3552_v2 }
 0x73d   :  { %v933_v15 = vpop.f32.mrb[32].mxu0 }
 0x73e   :  { %v3114_v5 = vpop.f32.mrb[33].mxu0 }
 0x73f   :  { %v936_v44 = vpop.f32.mrb[34].mxu0 }
 0x740   :  { %v942_v46 = vpack.c.bf16 %v936_v44, %v933_v15  ;;  %v3115_v58 = vpop.f32.mrb[35].mxu0  ;;  %3137 = vmatmul.mubr.msk.bf16.gmra.mrb[44].mxu0 %vm461_vm10, %v695_v14 }
 0x741   :  { %3140 = vmatprep.mubr.msk.bf16.mxu0 %vm3553_vm0, %v3552_v2 }
 0x742   :  { %3127 = vmatmul.mubr.msk.bf16.gmra.mrb[40].mxu1 %vm461_vm10, %v942_v46 }
 0x743   :  { %3148 = vmatprep.mubr.msk.bf16.mxu1 %vm3553_vm0, %v3552_v2 }
 0x748   :  { %3141 = vmatmul.mubr.msk.bf16.gmra.mrb[48].mxu0 %vm461_vm10, %v696_v33 }
 0x749   :  { %3168 = vmatprep.mubr.msk.bf16.mxu0 %vm3553_vm0, %v3552_v2 }
 0x803   :  { %v992_v55 = vpop.f32.mrb[36].mxu0 }
 0x804   :  { %v3120_v51 = vpop.f32.mrb[37].mxu0 }
 0x805   :  { %v995_v54 = vpop.f32.mrb[38].mxu0 }
 0x806   :  { %v3121_v10 = vpop.f32.mrb[39].mxu0 }
 0x80b   :  { %v1000_v59 = vpop.f32.mrb[36].mxu1  ;;  %v1064_v61 = vpop.f32.mrb[40].mxu0 }
 0x80c   :  { %v1065_v9 = vadd.f32 %v1064_v61, %v992_v55  ;;  %v3124_v0 = vpop.f32.mrb[37].mxu1  ;;  %v3134_v27 = vpop.f32.mrb[41].mxu0 }
 0x80d   :  { %v1003_v30 = vpop.f32.mrb[38].mxu1  ;;  %v1067_v52 = vpop.f32.mrb[42].mxu0 }
 0x80e   :  { %v1087_v4 = vadd.f32 %v1065_v9, %v3756_v38  ;;  %v1068_v47 = vadd.f32 %v1067_v52, %v995_v54  ;;  %v3125_v12 = vpop.f32.mrb[39].mxu1  ;;  %v3135_v36 = vpop.f32.mrb[43].mxu0 }
 0x810   :  { %v1088_v1 = vadd.f32 %v1068_v47, %v3758_v39  ;;  %v1097_v7 = vadd.f32 %v1096_v40, %v1087_v4 }
 0x812   :  { %v1103_v8 = vsel %vm239_vm9, %v1097_v7, 0.0  ;;  %v1098_v32 = vadd.f32 %v1096_v40, %v1088_v1 }
 0x813   :  { %1104 = vadd.xlane.f32.xlu1 %v1103_v8  ;;  %v1072_v11 = vpop.f32.mrb[44].mxu0 }
 0x814   :  { %v1073_v14 = vadd.f32 %v1072_v11, %v1000_v59  ;;  %v3138_v6 = vpop.f32.mrb[45].mxu0  ;;  %v1106_v18 = vsel %vm239_vm9, %v1098_v32, 0.0 }
 0x815   :  { %v1008_v23 = vpop.f32.mrb[40].mxu1  ;;  %v1075_v21 = vpop.f32.mrb[46].mxu0 }
 0x816   :  { %v1089_v63 = vadd.f32 %v1073_v14, %v3767_v48  ;;  %v1076_v50 = vadd.f32 %v1075_v21, %v1003_v30  ;;  %v3128_v33 = vpop.f32.mrb[41].mxu1  ;;  %v3139_v38 = vpop.f32.mrb[47].mxu0 }
 0x817   :  { %v1011_v41 = vpop.f32.mrb[42].mxu1  ;;  %1107 = vadd.xlane.f32.xlu1 %v1106_v18  ;;  %v3349_v33 = vld [vmem:[%s4602_s9] sm:$0xff]   ;;  %v3350_v38 = vld [vmem:[%s4602_s9 + $0x8] sm:$0xff]  }
 0x818   :  { %v1090_v39 = vadd.f32 %v1076_v50, %v3769_v49  ;;  %v3129_v60 = vpop.f32.mrb[43].mxu1  ;;  %v1099_v53 = vadd.f32 %v1096_v40, %v1089_v63  ;;  %3145 = vmatpush3.bf16.msra.mxu1 %v3349_v33 }
 0x819   :  { %3146 = vmatprep.subr.bf16.mxu1 %v3552_v2 }
 0x81a   :  { %v1109_v35 = vsel %vm239_vm9, %v1099_v53, 0.0  ;;  %v1100_v37 = vadd.f32 %v1096_v40, %v1090_v39 }
 0x81b   :  { %1110 = vadd.xlane.f32.xlu1 %v1109_v35  ;;  %v1080_v31 = vpop.f32.mrb[48].mxu0 }
 0x81c   :  { %v1081_v3 = vadd.f32 %v1080_v31, %v1008_v23  ;;  %v3142_v62 = vpop.f32.mrb[49].mxu0  ;;  %v1112_v15 = vsel %vm239_vm9, %v1100_v37, 0.0  ;;  %3147 = vmatpush3.bf16.msra.mxu1 %v3350_v38 }
 0x81d   :  { %v1083_v56 = vpop.f32.mrb[50].mxu0  ;;  %3180 = vmatprep.subr.bf16.mxu1 %v3552_v2 }
 0x81e   :  { %v1091_v48 = vadd.f32 %v1081_v3, %v3780_v57  ;;  %v1084_v42 = vadd.f32 %v1083_v56, %v1011_v41  ;;  %v3143_v43 = vpop.f32.mrb[51].mxu0 }
 0x81f   :  { %1113 = vadd.xlane.f32.xlu1 %v1112_v15 }
 0x820   :  { %v1092_v5 = vadd.f32 %v1084_v42, %v3778_v45  ;;  %v1101_v49 = vadd.f32 %v1096_v40, %v1091_v48 }
 0x822   :  { %v1115_v44 = vsel %vm239_vm9, %v1101_v49, 0.0  ;;  %v1102_v46 = vadd.f32 %v1096_v40, %v1092_v5 }
 0x823   :  { %1116 = vadd.xlane.f32.xlu1 %v1115_v44 }
 0x824   :  { %v1118_v58 = vsel %vm239_vm9, %v1102_v46, 0.0 }
 0x825   :  { %1119 = vadd.xlane.f32.xlu0 %v1118_v58 }
 0x8a0   :  { %v1105_v55 = vpop.xlane.xlu1 %1104 }
 0x8a1   :  { %v1121_v51 = vmul.f32 0.03125, %v1105_v55 }
 0x8a3   :  { %v1127_v54 = vsub.f32 %v1097_v7, %v1121_v51 }
 0x8a4   :  { %v1108_v10 = vpop.xlane.xlu1 %1107 }
 0x8a5   :  { %v1122_v57 = vmul.f32 0.03125, %v1108_v10  ;;  %v1133_v59 = vmul.f32 %v1127_v54, %v1127_v54 }
 0x8a7   :  { %v1128_v61 = vsub.f32 %v1098_v32, %v1122_v57  ;;  %v1139_v34 = vsel %vm239_vm9, %v1133_v59, 0.0 }
 0x8a8   :  { %v1111_v9 = vpop.xlane.xlu1 %1110  ;;  %1140 = vadd.xlane.f32.xlu1 %v1139_v34 }
 0x8a9   :  { %v1123_v45 = vmul.f32 0.03125, %v1111_v9  ;;  %v1134_v0 = vmul.f32 %v1128_v61, %v1128_v61 }
 0x8ab   :  { %v4065_v27 = vsub.f32 %v1099_v53, %v1123_v45  ;;  %v1142_v40 = vsel %vm239_vm9, %v1134_v0, 0.0 }
 0x8ac   :  { %v1114_v30 = vpop.xlane.xlu1 %1113  ;;  %1143 = vadd.xlane.f32.xlu1 %v1142_v40 }
 0x8ad   :  { %v1124_v52 = vmul.f32 0.03125, %v1114_v30  ;;  %v1135_v4 = vmul.f32 %v4065_v27, %v4065_v27 }
 0x8af   :  { %v1130_v47 = vsub.f32 %v1100_v37, %v1124_v52  ;;  %v1145_v12 = vsel %vm239_vm9, %v1135_v4, 0.0 }
 0x8b0   :  { %1146 = vadd.xlane.f32.xlu1 %v1145_v12  ;;  %v1117_v36 = vpop.xlane.xlu1 %1116 }
 0x8b1   :  { %v1125_v1 = vmul.f32 0.03125, %v1117_v36  ;;  %v1136_v7 = vmul.f32 %v1130_v47, %v1130_v47 }
 0x8b2   :  { %v1120_v8 = vpop.xlane.xlu0 %1119 }
 0x8b3   :  { %v1131_v32 = vsub.f32 %v1101_v49, %v1125_v1  ;;  %v1126_v11 = vmul.f32 0.03125, %v1120_v8  ;;  %v1148_v14 = vsel %vm239_vm9, %v1136_v7, 0.0 }
 0x8b4   :  { %1149 = vadd.xlane.f32.xlu1 %v1148_v14 }
 0x8b5   :  { %v1132_v6 = vsub.f32 %v1102_v46, %v1126_v11  ;;  %v1137_v23 = vmul.f32 %v1131_v32, %v1131_v32 }
 0x8b7   :  { %v1151_v21 = vsel %vm239_vm9, %v1137_v23, 0.0  ;;  %v1138_v63 = vmul.f32 %v1132_v6, %v1132_v6  ;;  %v3354_v23 = vld [vmem:[%s4603_s11 + $0x18] sm:$0xff]  }
 0x8b8   :  { %1152 = vadd.xlane.f32.xlu1 %v1151_v21  ;;  %v2825_v21 = vld [vmem:[%s4604_s10] ss:$0 sm:$0xff] }
 0x8b9   :  { %v1154_v50 = vsel %vm239_vm9, %v1138_v63, 0.0 }
 0x8bc   :  { %1155 = vadd.xlane.f32.xlu1 %v1154_v50 }
 0x935   :  { %v1141_v18 = vpop.xlane.xlu1 %1140 }
 0x936   :  { %v1157_v41 = vmul.f32 0.03125, %v1141_v18 }
 0x938   :  { %v1163_v39 = vadd.f32 1e-12, %v1157_v41 }
 0x939   :  { %v1144_v60 = vpop.xlane.xlu1 %1143 }
 0x93a   :  { %3425 = vrsqrt.f32 %v1163_v39  ;;  %v1158_v53 = vmul.f32 0.03125, %v1144_v60 }
 0x93c   :  { %v1164_v35 = vadd.f32 1e-12, %v1158_v53 }
 0x93d   :  { %v1147_v37 = vpop.xlane.xlu1 %1146 }
 0x93e   :  { %3427 = vrsqrt.f32 %v1164_v35  ;;  %v1159_v31 = vmul.f32 0.03125, %v1147_v37 }
 0x940   :  { %v1165_v3 = vadd.f32 1e-12, %v1159_v31 }
 0x941   :  { %v1150_v62 = vpop.xlane.xlu1 %1149 }
 0x942   :  { %3429 = vrsqrt.f32 %v1165_v3  ;;  %v1160_v56 = vmul.f32 0.03125, %v1150_v62 }
 0x944   :  { %v3426_v48 = vpop.eup %3425  ;;  %v1166_v42 = vadd.f32 1e-12, %v1160_v56 }
 0x945   :  { %v1175_v43 = vmul.f32 %v3426_v48, %v1127_v54  ;;  %v1153_v15 = vpop.xlane.xlu1 %1152 }
 0x946   :  { %3431 = vrsqrt.f32 %v1166_v42  ;;  %v1161_v5 = vmul.f32 0.03125, %v1153_v15 }
 0x947   :  { %v1185_v49 = vmul.f32 %v3654_v19, %v1175_v43 }
 0x948   :  { %v3428_v44 = vpop.eup %3427  ;;  %v1167_v46 = vadd.f32 1e-12, %v1161_v5 }
 0x949   :  { %v4084_v58 = vadd.f32 %v3650_v16, %v1185_v49  ;;  %v1176_v55 = vmul.f32 %v3428_v44, %v1128_v61  ;;  %v1156_v51 = vpop.xlane.xlu1 %1155 }
 0x94a   :  { %3433 = vrsqrt.f32 %v1167_v46  ;;  %v1162_v10 = vmul.f32 0.03125, %v1156_v51 }
 0x94b   :  { %v1186_v57 = vmul.f32 %v3654_v19, %v1176_v55 }
 0x94c   :  { %v3430_v59 = vpop.eup %3429  ;;  %v1168_v34 = vadd.f32 1e-12, %v1162_v10 }
 0x94d   :  { %v4088_v54 = vadd.f32 %v3650_v16, %v1186_v57  ;;  %v1177_v9 = vmul.f32 %v3430_v59, %v4065_v27 }
 0x94e   :  { %3435 = vrsqrt.f32 %v1168_v34 }
 0x94f   :  { %v1201_v45 = vpack.c.bf16 %v4088_v54, %v4084_v58  ;;  %v1187_v0 = vmul.f32 %v3654_v19, %v1177_v9 }
 0x950   :  { %v3432_v40 = vpop.eup %3431 }
 0x951   :  { %v1178_v61 = vmul.f32 %v3432_v40, %v1130_v47  ;;  %3149 = vmatmul.mubr.msk.bf16.vlgmr.msra.gmra.mrb[44].mxu1 %vm239_vm9, %v1201_v45  ;;  %v4096_v30 = vadd.f32 %v3650_v16, %v1187_v0 }
 0x952   :  { %3152 = vmatprep.mubr.msk.bf16.mxu1 %vm3553_vm0, %v3552_v2 }
 0x953   :  { %v1188_v52 = vmul.f32 %v3654_v19, %v1178_v61 }
 0x954   :  { %v3434_v4 = vpop.eup %3433 }
 0x955   :  { %v1179_v27 = vmul.f32 %v3434_v4, %v1131_v32  ;;  %v4102_v12 = vadd.f32 %v3650_v16, %v1188_v52 }
 0x957   :  { %v1202_v36 = vpack.c.bf16 %v4102_v12, %v4096_v30  ;;  %v1189_v47 = vmul.f32 %v3654_v19, %v1179_v27 }
 0x958   :  { %v3436_v1 = vpop.eup %3435 }
 0x959   :  { %v1180_v7 = vmul.f32 %v3436_v1, %v1132_v6  ;;  %3153 = vmatmul.mubr.msk.bf16.gmra.mrb[48].mxu1 %vm239_vm9, %v1202_v36  ;;  %v4109_v8 = vadd.f32 %v3650_v16, %v1189_v47  ;;  %v3351_v6 = vld [vmem:[%s4603_s11] sm:$0xff]  }
 0x95a   :  { %3156 = vmatprep.mubr.msk.bf16.mxu1 %vm3553_vm0, %v3552_v2  ;;  %3161 = vmatpush3.bf16.msra.mxu0 %v3351_v6 }
 0x95b   :  { %v1190_v32 = vmul.f32 %v3654_v19, %v1180_v7  ;;  %3162 = vmatprep.subr.bf16.mxu0 %v3552_v2  ;;  %v3353_v19 = vld [vmem:[%s4603_s11 + $0x10] sm:$0xff]  }
 0x95d   :  { %v4115_v11 = vadd.f32 %v3650_v16, %v1190_v32  ;;  %v3352_v16 = vld [vmem:[%s4603_s11 + $0x8] sm:$0xff]  }
 0x95e   :  { %3163 = vmatpush3.bf16.msra.mxu0 %v3352_v16 }
 0x95f   :  { %v1203_v14 = vpack.c.bf16 %v4115_v11, %v4109_v8  ;;  %3164 = vmatprep.subr.bf16.mxu0 %v3552_v2 }
 0x961   :  { %3157 = vmatmul.mubr.msk.bf16.gmra.mrb[52].mxu1 %vm239_vm9, %v1203_v14 }
 0x962   :  { %3184 = vmatprep.mubr.msk.bf16.mxu1 %vm3553_vm0, %v3552_v2  ;;  %3165 = vmatpush3.bf16.msra.mxu0 %v3353_v19 }
 0x963   :  { %3166 = vmatprep.subr.bf16.mxu0 %v3552_v2 }
 0x966   :  { %3167 = vmatpush3.bf16.msra.mxu0 %v3354_v23 }
 0x967   :  { %3196 = vmatprep.subr.bf16.mxu0 %v3552_v2 }
 0xa24   :  { %v1265_v63 = vpop.f32.mrb[44].mxu1 }
 0xa25   :  { %v1266_v50 = vadd.f32 %v2825_v21, %v1265_v63  ;;  %v3150_v33 = vpop.f32.mrb[45].mxu1 }
 0xa26   :  { %v1268_v38 = vpop.f32.mrb[46].mxu1 }
 0xa27   :  { %v1294_v18 = vmul.f32 0.044715, %v1266_v50  ;;  %v1269_v41 = vadd.f32 %v2825_v21, %v1268_v38  ;;  %v3151_v39 = vpop.f32.mrb[47].mxu1  ;;  %v1288_v33 = vmul.f32 0.5, %v1266_v50 }
 0xa29   :  { %v1300_v60 = vmul.f32 %v1294_v18, %v1266_v50  ;;  %v1295_v53 = vmul.f32 0.044715, %v1269_v41  ;;  %v1289_v38 = vmul.f32 0.5, %v1269_v41 }
 0xa2b   :  { %v1306_v35 = vmul.f32 %v1300_v60, %v1266_v50  ;;  %v1301_v37 = vmul.f32 %v1295_v53, %v1269_v41 }
 0xa2c   :  { %v1273_v31 = vpop.f32.mrb[48].mxu1 }
 0xa2d   :  { %v1312_v3 = vadd.f32 %v1306_v35, %v1266_v50  ;;  %v1307_v62 = vmul.f32 %v1301_v37, %v1269_v41  ;;  %v1274_v56 = vadd.f32 %v2825_v21, %v1273_v31  ;;  %v3154_v48 = vpop.f32.mrb[49].mxu1 }
 0xa2e   :  { %v1276_v42 = vpop.f32.mrb[50].mxu1 }
 0xa2f   :  { %v1318_v43 = vmul.f32 0.7978846, %v1312_v3  ;;  %v1313_v15 = vadd.f32 %v1307_v62, %v1269_v41  ;;  %v1296_v5 = vmul.f32 0.044715, %v1274_v56  ;;  %v1277_v49 = vadd.f32 %v2825_v21, %v1276_v42  ;;  %v3155_v44 = vpop.f32.mrb[51].mxu1 }
 0xa30   :  { %v1290_v50 = vmul.f32 0.5, %v1274_v56 }
 0xa31   :  { %3437 = vtanh.f32 %v1318_v43  ;;  %v1319_v46 = vmul.f32 0.7978846, %v1313_v15  ;;  %v1302_v55 = vmul.f32 %v1296_v5, %v1274_v56  ;;  %v1297_v51 = vmul.f32 0.044715, %v1277_v49 }
 0xa32   :  { %v1291_v41 = vmul.f32 0.5, %v1277_v49 }
 0xa33   :  { %3439 = vtanh.f32 %v1319_v46  ;;  %v1308_v10 = vmul.f32 %v1302_v55, %v1274_v56  ;;  %v1303_v57 = vmul.f32 %v1297_v51, %v1277_v49 }
 0xa34   :  { %v1281_v59 = vpop.f32.mrb[52].mxu1 }
 0xa35   :  { %v1314_v34 = vadd.f32 %v1308_v10, %v1274_v56  ;;  %v1309_v9 = vmul.f32 %v1303_v57, %v1277_v49  ;;  %v1282_v45 = vadd.f32 %v2825_v21, %v1281_v59  ;;  %v3158_v0 = vpop.f32.mrb[53].mxu1 }
 0xa36   :  { %v1284_v40 = vpop.f32.mrb[54].mxu1 }
 0xa37   :  { %v1320_v61 = vmul.f32 0.7978846, %v1314_v34  ;;  %v1315_v52 = vadd.f32 %v1309_v9, %v1277_v49  ;;  %v1298_v4 = vmul.f32 0.044715, %v1282_v45  ;;  %v1285_v27 = vadd.f32 %v2825_v21, %v1284_v40  ;;  %v3159_v36 = vpop.f32.mrb[55].mxu1 }
 0xa38   :  { %v1292_v55 = vmul.f32 0.5, %v1282_v45 }
 0xa39   :  { %3441 = vtanh.f32 %v1320_v61  ;;  %v1321_v47 = vmul.f32 0.7978846, %v1315_v52  ;;  %v1304_v1 = vmul.f32 %v1298_v4, %v1282_v45  ;;  %v1299_v7 = vmul.f32 0.044715, %v1285_v27 }
 0xa3a   :  { %v1293_v51 = vmul.f32 0.5, %v1285_v27 }
 0xa3b   :  { %v3438_v32 = vpop.eup %3437  ;;  %3443 = vtanh.f32 %v1321_v47  ;;  %v1310_v14 = vmul.f32 %v1304_v1, %v1282_v45  ;;  %v1305_v6 = vmul.f32 %v1299_v7, %v1285_v27 }
 0xa3c   :  { %v1330_v16 = vadd.f32 1.0, %v3438_v32 }
 0xa3d   :  { %v3440_v19 = vpop.eup %3439  ;;  %v1316_v23 = vadd.f32 %v1310_v14, %v1282_v45  ;;  %v1311_v63 = vmul.f32 %v1305_v6, %v1285_v27 }
 0xa3e   :  { %v1331_v18 = vadd.f32 1.0, %v3440_v19  ;;  %v1336_v53 = vmul.f32 %v1330_v16, %v1288_v33 }
 0xa3f   :  { %v1322_v39 = vmul.f32 0.7978846, %v1316_v23  ;;  %v1317_v60 = vadd.f32 %v1311_v63, %v1285_v27 }
 0xa40   :  { %v1337_v21 = vmul.f32 %v1331_v18, %v1289_v38 }
 0xa41   :  { %3445 = vtanh.f32 %v1322_v39  ;;  %v1323_v35 = vmul.f32 0.7978846, %v1317_v60 }
 0xa42   :  { %v1342_v37 = vpack.c.bf16 %v1337_v21, %v1336_v53 }
 0xa43   :  { %v3442_v31 = vpop.eup %3441  ;;  %3447 = vtanh.f32 %v1323_v35 }
 0xa44   :  { %3169 = vmatmul.mubr.msk.bf16.vlgmr.msra.gmra.mrb[52].mxu0 %vm1373_vm12, %v1342_v37  ;;  %v1332_v3 = vadd.f32 1.0, %v3442_v31 }
 0xa45   :  { %v3444_v62 = vpop.eup %3443  ;;  %3172 = vmatprep.mubr.msk.bf16.mxu0 %vm3553_vm0, %v3552_v2 }
 0xa46   :  { %v1333_v48 = vadd.f32 1.0, %v3444_v62  ;;  %v1338_v42 = vmul.f32 %v1332_v3, %v1290_v50 }
 0xa48   :  { %v1339_v43 = vmul.f32 %v1333_v48, %v1291_v41 }
 0xa4a   :  { %v1343_v15 = vpack.c.bf16 %v1339_v43, %v1338_v42 }
 0xa4b   :  { %v3446_v5 = vpop.eup %3445 }
 0xa4c   :  { %3173 = vmatmul.mubr.msk.bf16.gmra.mrb[56].mxu0 %vm1373_vm12, %v1343_v15  ;;  %v1334_v44 = vadd.f32 1.0, %v3446_v5 }
 0xa4d   :  { %v3448_v46 = vpop.eup %3447  ;;  %3176 = vmatprep.mubr.msk.bf16.mxu0 %vm3553_vm0, %v3552_v2 }
 0xa4e   :  { %v1335_v10 = vadd.f32 1.0, %v3448_v46  ;;  %v1340_v57 = vmul.f32 %v1334_v44, %v1292_v55 }
 0xa50   :  { %v1341_v59 = vmul.f32 %v1335_v10, %v1293_v51 }
 0xa52   :  { %v1344_v34 = vpack.c.bf16 %v1341_v59, %v1340_v57 }
 0xa54   :  { %3177 = vmatmul.mubr.msk.bf16.gmra.mrb[60].mxu0 %vm1373_vm12, %v1344_v34 }
 0xa55   :  { %3202 = vmatprep.mubr.msk.bf16.mxu0 %vm3553_vm0, %v3552_v2 }
 0xb17   :  { %v1417_v56 = vpop.f32.mrb[52].mxu0 }
 0xb18   :  { %v1418_v49 = vadd.f32 %v1417_v56, %v3660_v22  ;;  %v3170_v9 = vpop.f32.mrb[53].mxu0 }
 0xb19   :  { %v1420_v0 = vpop.f32.mrb[54].mxu0 }
 0xb1a   :  { %v1421_v40 = vadd.f32 %v1420_v0, %v3660_v22  ;;  %v3171_v61 = vpop.f32.mrb[55].mxu0  ;;  %v1440_v45 = vadd.f32 %v1418_v49, %v4084_v58 }
 0xb1b   :  { %v3355_v61 = vld [vmem:[%s4597_s5 + $0x10] sm:$0xff]  }
 0xb1c   :  { %v1446_v52 = vsel %vm239_vm9, %v1440_v45, 0.0  ;;  %v1441_v4 = vadd.f32 %v1421_v40, %v4088_v54  ;;  %3181 = vmatpush3.bf16.msra.mxu1 %v3355_v61 }
 0xb1d   :  { %1447 = vadd.xlane.f32.xlu1 %v1446_v52  ;;  %3182 = vmatprep.subr.bf16.mxu1 %v3552_v2 }
 0xb1e   :  { %v1449_v27 = vsel %vm239_vm9, %v1441_v4, 0.0 }
 0xb1f   :  { %1450 = vadd.xlane.f32.xlu0 %v1449_v27  ;;  %v1425_v36 = vpop.f32.mrb[56].mxu0 }
 0xb20   :  { %v1426_v47 = vadd.f32 %v1425_v36, %v3660_v22  ;;  %v3174_v1 = vpop.f32.mrb[57].mxu0 }
 0xb21   :  { %v1428_v7 = vpop.f32.mrb[58].mxu0 }
 0xb22   :  { %v1429_v32 = vadd.f32 %v1428_v7, %v3660_v22  ;;  %v3175_v14 = vpop.f32.mrb[59].mxu0  ;;  %v1442_v6 = vadd.f32 %v1426_v47, %v4096_v30 }
 0xb24   :  { %v1452_v58 = vsel %vm239_vm9, %v1442_v6, 0.0  ;;  %v1443_v16 = vadd.f32 %v1429_v32, %v4102_v12 }
 0xb25   :  { %1453 = vadd.xlane.f32.xlu1 %v1452_v58 }
 0xb26   :  { %v1455_v54 = vsel %vm239_vm9, %v1443_v16, 0.0 }
 0xb27   :  { %1456 = vadd.xlane.f32.xlu0 %v1455_v54  ;;  %v1433_v19 = vpop.f32.mrb[60].mxu0 }
 0xb28   :  { %v1434_v23 = vadd.f32 %v1433_v19, %v3660_v22  ;;  %v3178_v63 = vpop.f32.mrb[61].mxu0 }
 0xb29   :  { %v1436_v33 = vpop.f32.mrb[62].mxu0 }
 0xb2a   :  { %v1437_v38 = vadd.f32 %v1436_v33, %v3660_v22  ;;  %v3179_v18 = vpop.f32.mrb[63].mxu0  ;;  %v1444_v39 = vadd.f32 %v1434_v23, %v4109_v8 }
 0xb2c   :  { %v1458_v30 = vsel %vm239_vm9, %v1444_v39, 0.0  ;;  %v1445_v60 = vadd.f32 %v1437_v38, %v4115_v11 }
 0xb2d   :  { %1459 = vadd.xlane.f32.xlu1 %v1458_v30 }
 0xb2e   :  { %v1461_v12 = vsel %vm239_vm9, %v1445_v60, 0.0 }
 0xb2f   :  { %1462 = vadd.xlane.f32.xlu0 %v1461_v12 }
 0xbaa   :  { %v1448_v53 = vpop.xlane.xlu1 %1447 }
 0xbab   :  { %v1464_v21 = vmul.f32 0.03125, %v1448_v53 }
 0xbac   :  { %v1451_v35 = vpop.xlane.xlu0 %1450 }
 0xbad   :  { %v1470_v37 = vsub.f32 %v1440_v45, %v1464_v21  ;;  %v1465_v31 = vmul.f32 0.03125, %v1451_v35  ;;  %v3356_v45 = vld [vmem:[%s4597_s5 + $0x18] sm:$0xff]  }
 0xbae   :  { %3183 = vmatpush3.bf16.msra.mxu1 %v3356_v45 }
 0xbaf   :  { %v1471_v3 = vsub.f32 %v1441_v4, %v1465_v31  ;;  %v1476_v62 = vmul.f32 %v1470_v37, %v1470_v37  ;;  %3214 = vmatprep.subr.bf16.mxu1 %v3552_v2 }
 0xbb1   :  { %v1482_v22 = vsel %vm239_vm9, %v1476_v62, 0.0  ;;  %v1477_v50 = vmul.f32 %v1471_v3, %v1471_v3 }
 0xbb2   :  { %v1454_v41 = vpop.xlane.xlu1 %1453  ;;  %1483 = vadd.xlane.f32.xlu1 %v1482_v22 }
 0xbb3   :  { %v1466_v8 = vmul.f32 0.03125, %v1454_v41  ;;  %v1485_v48 = vsel %vm239_vm9, %v1477_v50, 0.0 }
 0xbb4   :  { %v1457_v11 = vpop.xlane.xlu0 %1456  ;;  %1486 = vadd.xlane.f32.xlu0 %v1485_v48 }
 0xbb5   :  { %v1472_v42 = vsub.f32 %v1442_v6, %v1466_v8  ;;  %v1467_v43 = vmul.f32 0.03125, %v1457_v11 }
 0xbb7   :  { %v1473_v15 = vsub.f32 %v1443_v16, %v1467_v43  ;;  %v1478_v5 = vmul.f32 %v1472_v42, %v1472_v42 }
 0xbb9   :  { %v1488_v44 = vsel %vm239_vm9, %v1478_v5, 0.0  ;;  %v1479_v46 = vmul.f32 %v1473_v15, %v1473_v15 }
 0xbba   :  { %1489 = vadd.xlane.f32.xlu1 %v1488_v44  ;;  %v1460_v55 = vpop.xlane.xlu1 %1459 }
 0xbbb   :  { %v1468_v51 = vmul.f32 0.03125, %v1460_v55  ;;  %v1491_v10 = vsel %vm239_vm9, %v1479_v46, 0.0 }
 0xbbc   :  { %1492 = vadd.xlane.f32.xlu0 %v1491_v10  ;;  %v1463_v57 = vpop.xlane.xlu0 %1462 }
 0xbbd   :  { %v1474_v59 = vsub.f32 %v1444_v39, %v1468_v51  ;;  %v1469_v34 = vmul.f32 0.03125, %v1463_v57  ;;  %v2861_v57 = vld [vmem:[%s4599_s6 + $0x1] ss:$0 sm:$0xff] }
 0xbbf   :  { %v1475_v56 = vsub.f32 %v1445_v60, %v1469_v34  ;;  %v1480_v49 = vmul.f32 %v1474_v59, %v1474_v59 }
 0xbc1   :  { %v1494_v9 = vsel %vm239_vm9, %v1480_v49, 0.0  ;;  %v1481_v0 = vmul.f32 %v1475_v56, %v1475_v56 }
 0xbc2   :  { %1495 = vadd.xlane.f32.xlu1 %v1494_v9 }
 0xbc3   :  { %v1497_v40 = vsel %vm239_vm9, %v1481_v0, 0.0 }
 0xbc4   :  { %1498 = vadd.xlane.f32.xlu0 %v1497_v40 }
 0xc3f   :  { %v1484_v52 = vpop.xlane.xlu1 %1483 }
 0xc40   :  { %v1500_v4 = vmul.f32 0.03125, %v1484_v52 }
 0xc41   :  { %v1487_v27 = vpop.xlane.xlu0 %1486 }
 0xc42   :  { %v1506_v36 = vadd.f32 1e-12, %v1500_v4  ;;  %v1501_v47 = vmul.f32 0.03125, %v1487_v27 }
 0xc44   :  { %3449 = vrsqrt.f32 %v1506_v36  ;;  %v1507_v1 = vadd.f32 1e-12, %v1501_v47 }
 0xc46   :  { %3451 = vrsqrt.f32 %v1507_v1 }
 0xc47   :  { %v1490_v7 = vpop.xlane.xlu1 %1489 }
 0xc48   :  { %v1502_v32 = vmul.f32 0.03125, %v1490_v7 }
 0xc49   :  { %v1493_v14 = vpop.xlane.xlu0 %1492 }
 0xc4a   :  { %v1508_v6 = vadd.f32 1e-12, %v1502_v32  ;;  %v1503_v58 = vmul.f32 0.03125, %v1493_v14 }
 0xc4c   :  { %3453 = vrsqrt.f32 %v1508_v6  ;;  %v1509_v16 = vadd.f32 1e-12, %v1503_v58 }
 0xc4e   :  { %v3450_v54 = vpop.eup %3449  ;;  %3455 = vrsqrt.f32 %v1509_v16 }
 0xc4f   :  { %v1518_v19 = vmul.f32 %v3450_v54, %v1470_v37  ;;  %v1496_v23 = vpop.xlane.xlu1 %1495 }
 0xc50   :  { %v3452_v63 = vpop.eup %3451  ;;  %v1504_v33 = vmul.f32 0.03125, %v1496_v23 }
 0xc51   :  { %v1528_v38 = vmul.f32 %v3671_v28, %v1518_v19  ;;  %v1519_v18 = vmul.f32 %v3452_v63, %v1471_v3  ;;  %v1499_v39 = vpop.xlane.xlu0 %1498 }
 0xc52   :  { %v1510_v30 = vadd.f32 1e-12, %v1504_v33  ;;  %v1505_v60 = vmul.f32 0.03125, %v1499_v39 }
 0xc53   :  { %v4184_v12 = vadd.f32 %v3664_v25, %v1528_v38  ;;  %v1529_v53 = vmul.f32 %v3671_v28, %v1519_v18 }
 0xc54   :  { %3457 = vrsqrt.f32 %v1510_v30  ;;  %v1511_v21 = vadd.f32 1e-12, %v1505_v60 }
 0xc55   :  { %v4188_v35 = vadd.f32 %v3664_v25, %v1529_v53 }
 0xc56   :  { %v3454_v37 = vpop.eup %3453  ;;  %3459 = vrsqrt.f32 %v1511_v21 }
 0xc57   :  { %v1520_v31 = vmul.f32 %v3454_v37, %v1472_v42  ;;  %v1574_v62 = vpack.c.bf16 %v4188_v35, %v4184_v12 }
 0xc58   :  { %v3456_v3 = vpop.eup %3455 }
 0xc59   :  { %v1521_v22 = vmul.f32 %v3456_v3, %v1473_v15  ;;  %3185 = vmatmul.mubr.msk.bf16.vlgmr.msra.gmra.mrb[56].mxu1 %vm239_vm9, %v1574_v62  ;;  %v1530_v50 = vmul.f32 %v3671_v28, %v1520_v31 }
 0xc5a   :  { %3188 = vmatprep.mubr.msk.bf16.mxu1 %vm3553_vm0, %v3552_v2 }
 0xc5b   :  { %v1531_v41 = vmul.f32 %v3671_v28, %v1521_v22  ;;  %v4198_v8 = vadd.f32 %v3664_v25, %v1530_v50 }
 0xc5d   :  { %v4201_v48 = vadd.f32 %v3664_v25, %v1531_v41 }
 0xc5e   :  { %v3458_v11 = vpop.eup %3457 }
 0xc5f   :  { %v1522_v42 = vmul.f32 %v3458_v11, %v1474_v59  ;;  %v1575_v43 = vpack.c.bf16 %v4201_v48, %v4198_v8  ;;  %v3546_v11 = vld [vmem:[%s4600_s1] sm:$0xff] }
 0xc60   :  { %v3460_v15 = vpop.eup %3459 }
 0xc61   :  { %v1523_v5 = vmul.f32 %v3460_v15, %v1475_v56  ;;  %3189 = vmatmul.mubr.msk.bf16.gmra.mrb[60].mxu1 %vm239_vm9, %v1575_v43  ;;  %v1532_v44 = vmul.f32 %v3671_v28, %v1522_v42  ;;  %v3547_v43 = vld [vmem:[%s4600_s1 + $0x8] sm:$0xff] }
 0xc62   :  { %3192 = vmatprep.mubr.msk.bf16.mxu1 %vm3553_vm0, %v3552_v2 }
 0xc63   :  { %v1533_v46 = vmul.f32 %v3671_v28, %v1523_v5  ;;  %v4211_v55 = vadd.f32 %v3664_v25, %v1532_v44 }
 0xc65   :  { %v4214_v51 = vadd.f32 %v3664_v25, %v1533_v46 }
 0xc67   :  { %v1576_v10 = vpack.c.bf16 %v4214_v51, %v4211_v55 }
 0xc69   :  { %3193 = vmatmul.mubr.msk.bf16.gmra.mrb[64].mxu1 %vm239_vm9, %v1576_v10 }
 0xc6a   :  { %3220 = vmatprep.mubr.msk.bf16.mxu1 %vm3553_vm0, %v3552_v2 }
 0xd2c   :  { %v1638_v59 = vpop.f32.mrb[56].mxu1 }
 0xd2d   :  { %v3186_v28 = vpop.f32.mrb[57].mxu1  ;;  %v1639_v56 = vadd.f32 %v2861_v57, %v1638_v59 }
 0xd2e   :  { %v1641_v34 = vpop.f32.mrb[58].mxu1 }
 0xd2f   :  { %v1642_v49 = vadd.f32 %v2861_v57, %v1641_v34  ;;  %v3187_v9 = vpop.f32.mrb[59].mxu1 }
 0xd31   :  { %v4224_v25 = vpack.c.bf16 %v1642_v49, %v1639_v56  ;;  %v3548_v56 = vld [vmem:[%s4600_s1 + $0x10] sm:$0xff] }
 0xd33   :  { %1667 = vrot.lane.b32.xlu1 %v4224_v25, %s3554_s2 }
 0xd34   :  { %v1646_v0 = vpop.f32.mrb[60].mxu1 }
 0xd35   :  { %v3190_v40 = vpop.f32.mrb[61].mxu1  ;;  %v1647_v45 = vadd.f32 %v2861_v57, %v1646_v0  ;;  %v3549_v0 = vld [vmem:[%s4600_s1 + $0x18] sm:$0xff] }
 0xd36   :  { %v1649_v61 = vpop.f32.mrb[62].mxu1 }
 0xd37   :  { %v1650_v52 = vadd.f32 %v2861_v57, %v1649_v61  ;;  %v3191_v4 = vpop.f32.mrb[63].mxu1 }
 0xd39   :  { %v4228_v27 = vpack.c.bf16 %v1650_v52, %v1647_v45 }
 0xd3b   :  { %1669 = vrot.lane.b32.xlu0 %v4228_v27, %s3554_s2 }
 0xd3c   :  { %v1654_v36 = vpop.f32.mrb[64].mxu1 }
 0xd3d   :  { %v3194_v47 = vpop.f32.mrb[65].mxu1  ;;  %v1655_v7 = vadd.f32 %v2861_v57, %v1654_v36 }
 0xd3e   :  { %v1657_v1 = vpop.f32.mrb[66].mxu1 }
 0xd3f   :  { %v1658_v32 = vadd.f32 %v2861_v57, %v1657_v1  ;;  %v3195_v14 = vpop.f32.mrb[67].mxu1 }
 0xd40   :  { %v3551_v14 = vld [vmem:[%s4600_s1 + $0x28] sm:$0xff] }
 0xd41   :  { %v4232_v6 = vpack.c.bf16 %v1658_v32, %v1655_v7  ;;  %v3550_v7 = vld [vmem:[%s4600_s1 + $0x20] sm:$0xff] }
 0xd43   :  { %1917 = vrot.lane.b32.xlu0 %v4232_v6, %s3555_s16  ;;  %1671 = vrot.lane.b32.xlu1 %v4232_v6, %s3554_s2 }
 0xd47   :  { %1909 = vrot.lane.b32.xlu0 %v4228_v27, %s3556_s17  ;;  %1913 = vrot.lane.b32.xlu1 %v4224_v25, %s3555_s16 }
 0xd4b   :  { %1915 = vrot.lane.b32.xlu1 %v4228_v27, %s3555_s16 }
 0xd4f   :  { %1907 = vrot.lane.b32.xlu1 %v4224_v25, %s3556_s17 }
 0xd53   :  { %1911 = vrot.lane.b32.xlu1 %v4232_v6, %s3556_s17 }
 0xda5   :  { %v1668_v58 = vpop.permute.xlu1 %1667 }
 0xda6   :  { %v1683_v16 = vsel %vm461_vm10, %v1668_v58, 0 }
 0xda7   :  { %3197 = vmatpush3.bf16.xpose.msra.mxu0 %v1683_v16 }
 0xda8   :  { %3198 = vmatprep.subr.bf16.mxu0 %v3552_v2 }
 0xdad   :  { %v1670_v54 = vpop.permute.xlu0 %1669 }
 0xdae   :  { %v1686_v19 = vsel %vm461_vm10, %v1670_v54, 0 }
 0xdaf   :  { %3199 = vmatpush3.bf16.xpose.msra.mxu0 %v1686_v19 }
 0xdb0   :  { %3200 = vmatprep.subr.bf16.mxu0 %v3552_v2 }
 0xdb5   :  { %v1672_v23 = vpop.permute.xlu1 %1671  ;;  %v1918_v30 = vpop.permute.xlu0 %1917 }
 0xdb6   :  { %v1689_v63 = vsel %vm461_vm10, %v1672_v23, 0  ;;  %v1935_v60 = vsel %vm461_vm10, %v1918_v30, 0 }
 0xdb7   :  { %3201 = vmatpush3.bf16.xpose.msra.mxu0 %v1689_v63 }
 0xdb8   :  { %3232 = vmatprep.subr.bf16.mxu0 %v3552_v2 }
 0xdb9   :  { %v1914_v33 = vpop.permute.xlu1 %1913  ;;  %v1910_v21 = vpop.permute.xlu0 %1909 }
 0xdba   :  { %v1929_v38 = vsel %vm461_vm10, %v1914_v33, 0 }
 0xdbd   :  { %v1916_v18 = vpop.permute.xlu1 %1915 }
 0xdbe   :  { %3203 = vmatmul.mubr.msk.bf16.vlgmr.msra.gmra.mrb[64].mxu0 %vm461_vm10, %v4224_v25  ;;  %v1932_v39 = vsel %vm461_vm10, %v1916_v18, 0 }
 0xdbf   :  { %3233 = vmatpush3.bf16.xpose.msra.mxu0 %v1929_v38  ;;  %3206 = vmatprep.mubr.msk.bf16.mxu0 %vm3553_vm0, %v3552_v2 }
 0xdc0   :  { %3234 = vmatprep.subr.bf16.mxu0 %v3552_v2 }
 0xdc1   :  { %v1908_v53 = vpop.permute.xlu1 %1907 }
 0xdc5   :  { %v1912_v37 = vpop.permute.xlu1 %1911 }
 0xdc6   :  { %3207 = vmatmul.mubr.msk.bf16.gmra.mrb[68].mxu0 %vm461_vm10, %v4228_v27 }
 0xdc7   :  { %3235 = vmatpush3.bf16.xpose.msra.mxu0 %v1932_v39  ;;  %3210 = vmatprep.mubr.msk.bf16.mxu0 %vm3553_vm0, %v3552_v2 }
 0xdc8   :  { %3236 = vmatprep.subr.bf16.mxu0 %v3552_v2 }
 0xdce   :  { %3211 = vmatmul.mubr.msk.bf16.gmra.mrb[72].mxu0 %vm461_vm10, %v4232_v6 }
 0xdcf   :  { %3237 = vmatpush3.bf16.xpose.msra.mxu0 %v1935_v60  ;;  %3238 = vmatprep.mubr.msk.bf16.mxu0 %vm3553_vm0, %v3552_v2 }
 0xdd0   :  { %3268 = vmatprep.subr.bf16.mxu0 %v3552_v2 }
 0xdd6   :  { %3239 = vmatmul.mubr.msk.bf16.vlgmr.msra.gmra.mrb[76].mxu0 %vm461_vm10, %v1908_v53 }
 0xdd7   :  { %3242 = vmatprep.mubr.msk.bf16.mxu0 %vm3553_vm0, %v3552_v2 }
 0xdde   :  { %3243 = vmatmul.mubr.msk.bf16.gmra.mrb[80].mxu0 %vm461_vm10, %v1910_v21 }
 0xddf   :  { %3246 = vmatprep.mubr.msk.bf16.mxu0 %vm3553_vm0, %v3552_v2 }
 0xde6   :  { %3247 = vmatmul.mubr.msk.bf16.gmra.mrb[84].mxu0 %vm461_vm10, %v1912_v37 }
 0xde7   :  { %3270 = vmatprep.mubr.msk.bf16.mxu0 %vm3553_vm0, %v3552_v2 }
 0xe91   :  { %v1725_v31 = vpop.f32.mrb[64].mxu0 }
 0xe92   :  { %v1748_v62 = vmul.f32 0.25, %v1725_v31  ;;  %v3204_v3 = vpop.f32.mrb[65].mxu0 }
 0xe93   :  { %v1728_v22 = vpop.f32.mrb[66].mxu0 }
 0xe94   :  { %v1749_v50 = vmul.f32 0.25, %v1728_v22  ;;  %v3205_v41 = vpop.f32.mrb[67].mxu0  ;;  %v4284_v42 = vadd.f32 %v3546_v11, %v1748_v62 }
 0xe96   :  { %v4289_v15 = vadd.f32 %v3547_v43, %v1749_v50  ;;  %v1760_v5 = vsel %vm549_vm11, %v4284_v42, -inf }
 0xe97   :  { %1761 = vmax.xlane.f32.xlu0 %v1760_v5 }
 0xe98   :  { %v1763_v44 = vsel %vm549_vm11, %v4289_v15, -inf }
 0xe99   :  { %1764 = vmax.xlane.f32.xlu1 %v1763_v44  ;;  %v1733_v46 = vpop.f32.mrb[68].mxu0 }
 0xe9a   :  { %v1750_v10 = vmul.f32 0.25, %v1733_v46  ;;  %v3208_v57 = vpop.f32.mrb[69].mxu0 }
 0xe9b   :  { %v1736_v59 = vpop.f32.mrb[70].mxu0 }
 0xe9c   :  { %v1751_v28 = vmul.f32 0.25, %v1736_v59  ;;  %v3209_v34 = vpop.f32.mrb[71].mxu0  ;;  %v4298_v49 = vadd.f32 %v3548_v56, %v1750_v10 }
 0xe9e   :  { %v1766_v9 = vsel %vm549_vm11, %v4298_v49, -inf  ;;  %v4305_v40 = vadd.f32 %v3549_v0, %v1751_v28 }
 0xe9f   :  { %1767 = vmax.xlane.f32.xlu0 %v1766_v9 }
 0xea0   :  { %v1769_v4 = vsel %vm549_vm11, %v4305_v40, -inf }
 0xea1   :  { %v1741_v61 = vpop.f32.mrb[72].mxu0 }
 0xea2   :  { %v1752_v45 = vmul.f32 0.25, %v1741_v61  ;;  %v3212_v52 = vpop.f32.mrb[73].mxu0 }
 0xea3   :  { %1770 = vmax.xlane.f32.xlu0 %v1769_v4  ;;  %v1744_v36 = vpop.f32.mrb[74].mxu0 }
 0xea4   :  { %v1753_v47 = vmul.f32 0.25, %v1744_v36  ;;  %v3213_v1 = vpop.f32.mrb[75].mxu0  ;;  %v4312_v32 = vadd.f32 %v3550_v7, %v1752_v45 }
 0xea6   :  { %v4317_v58 = vadd.f32 %v3551_v14, %v1753_v47  ;;  %v1772_v16 = vsel %vm549_vm11, %v4312_v32, -inf }
 0xea7   :  { %1773 = vmax.xlane.f32.xlu0 %v1772_v16 }
 0xea8   :  { %v1775_v54 = vsel %vm549_vm11, %v4317_v58, -inf }
 0xea9   :  { %1776 = vmax.xlane.f32.xlu1 %v1775_v54  ;;  %v1971_v19 = vpop.f32.mrb[76].mxu0 }
 0xeaa   :  { %v1994_v23 = vmul.f32 0.25, %v1971_v19  ;;  %v3240_v63 = vpop.f32.mrb[77].mxu0 }
 0xeab   :  { %v1974_v33 = vpop.f32.mrb[78].mxu0 }
 0xeac   :  { %v1995_v38 = vmul.f32 0.25, %v1974_v33  ;;  %v3241_v18 = vpop.f32.mrb[79].mxu0  ;;  %v2000_v39 = vadd.f32 %v3546_v11, %v1994_v23 }
 0xeae   :  { %v4323_v30 = vadd.f32 %v3547_v43, %v1995_v38  ;;  %v2006_v60 = vsel %vm549_vm11, %v2000_v39, -inf }
 0xeaf   :  { %2007 = vmax.xlane.f32.xlu0 %v2006_v60 }
 0xeb0   :  { %v2009_v53 = vsel %vm549_vm11, %v4323_v30, -inf }
 0xeb1   :  { %2010 = vmax.xlane.f32.xlu1 %v2009_v53  ;;  %v1979_v21 = vpop.f32.mrb[80].mxu0 }
 0xeb2   :  { %v1996_v37 = vmul.f32 0.25, %v1979_v21  ;;  %v3244_v31 = vpop.f32.mrb[81].mxu0 }
 0xeb3   :  { %v1982_v62 = vpop.f32.mrb[82].mxu0 }
 0xeb4   :  { %v1997_v3 = vmul.f32 0.25, %v1982_v62  ;;  %v3245_v22 = vpop.f32.mrb[83].mxu0  ;;  %v2002_v50 = vadd.f32 %v3548_v56, %v1996_v37 }
 0xeb6   :  { %v2003_v41 = vadd.f32 %v3549_v0, %v1997_v3  ;;  %v2012_v5 = vsel %vm549_vm11, %v2002_v50, -inf }
 0xeb7   :  { %2013 = vmax.xlane.f32.xlu0 %v2012_v5 }
 0xeb8   :  { %v2015_v11 = vsel %vm549_vm11, %v2003_v41, -inf }
 0xeb9   :  { %2016 = vmax.xlane.f32.xlu1 %v2015_v11  ;;  %v1987_v43 = vpop.f32.mrb[84].mxu0 }
 0xeba   :  { %v3248_v44 = vpop.f32.mrb[85].mxu0  ;;  %v1998_v34 = vmul.f32 0.25, %v1987_v43 }
 0xebb   :  { %v1990_v46 = vpop.f32.mrb[86].mxu0 }
 0xebc   :  { %v1999_v10 = vmul.f32 0.25, %v1990_v46  ;;  %v3249_v57 = vpop.f32.mrb[87].mxu0  ;;  %v4338_v56 = vadd.f32 %v3550_v7, %v1998_v34 }
 0xebe   :  { %v4330_v59 = vadd.f32 %v3551_v14, %v1999_v10  ;;  %v2018_v9 = vsel %vm549_vm11, %v4338_v56, -inf }
 0xec0   :  { %v2021_v28 = vsel %vm549_vm11, %v4330_v59, -inf }
 0xec1   :  { %2022 = vmax.xlane.f32.xlu1 %v2021_v28 }
 0xecd   :  { %1829 = vrot.lane.b32.xlu0 %v4224_v25, %s3557_s18 }
 0xed2   :  { %1831 = vrot.lane.b32.xlu1 %v4228_v27, %s3557_s18 }
 0xeec   :  { %2019 = vmax.xlane.f32.xlu0 %v2018_v9 }
 0xf24   :  { %v1762_v0 = vpop.xlane.xlu0 %1761 }
 0xf25   :  { %v1778_v61 = vsub.f32 %v4284_v42, %v1762_v0 }
 0xf26   :  { %v1765_v45 = vpop.xlane.xlu1 %1764 }
 0xf27   :  { %v1784_v52 = vmul.f32 1.442695, %v1778_v61  ;;  %v1779_v4 = vsub.f32 %v4289_v15, %v1765_v45 }
 0xf29   :  { %3461 = vpow2.f32 %v1784_v52  ;;  %v1786_v36 = vmul.f32 1.442695, %v1779_v4 }
 0xf2b   :  { %3463 = vpow2.f32 %v1786_v36 }
 0xf2c   :  { %v1768_v47 = vpop.xlane.xlu0 %1767 }
 0xf2d   :  { %v1780_v10 = vsub.f32 %v4298_v49, %v1768_v47 }
 0xf2f   :  { %v1788_v34 = vmul.f32 1.442695, %v1780_v10 }
 0xf30   :  { %v1771_v1 = vpop.xlane.xlu0 %1770 }
 0xf31   :  { %v1781_v14 = vsub.f32 %v4305_v40, %v1771_v1 }
 0xf33   :  { %v4345_v7 = vpop.eup %3461  ;;  %v1790_v16 = vmul.f32 1.442695, %v1781_v14 }
 0xf34   :  { %v1796_v54 = vsel %vm549_vm11, %v4345_v7, 0.0  ;;  %v1774_v63 = vpop.xlane.xlu0 %1773 }
 0xf35   :  { %v4349_v19 = vpop.eup %3463  ;;  %3465 = vpow2.f32 %v1790_v16  ;;  %1797 = vadd.xlane.f32.xlu0 %v1796_v54  ;;  %v1782_v9 = vsub.f32 %v4312_v32, %v1774_v63 }
 0xf36   :  { %v1777_v42 = vpop.xlane.xlu1 %1776  ;;  %v1799_v15 = vsel %vm549_vm11, %v4349_v19, 0.0 }
 0xf37   :  { %v1783_v23 = vsub.f32 %v4317_v58, %v1777_v42  ;;  %1800 = vadd.xlane.f32.xlu1 %v1799_v15  ;;  %v1792_v61 = vmul.f32 1.442695, %v1782_v9 }
 0xf39   :  { %v1794_v33 = vmul.f32 1.442695, %v1783_v23 }
 0xf3b   :  { %3467 = vpow2.f32 %v1794_v33 }
 0xf3c   :  { %v2008_v40 = vpop.xlane.xlu0 %2007 }
 0xf3d   :  { %v2024_v38 = vsub.f32 %v2000_v39, %v2008_v40 }
 0xf3e   :  { %v2011_v21 = vpop.xlane.xlu1 %2010 }
 0xf3f   :  { %v4354_v18 = vpop.eup %3465  ;;  %v2030_v60 = vmul.f32 1.442695, %v2024_v38  ;;  %v2025_v45 = vsub.f32 %v4323_v30, %v2011_v21 }
 0xf40   :  { %v1805_v53 = vsel %vm549_vm11, %v4354_v18, 0.0 }
 0xf41   :  { %3469 = vpow2.f32 %v2030_v60  ;;  %1806 = vadd.xlane.f32.xlu1 %v1805_v53  ;;  %v2032_v49 = vmul.f32 1.442695, %v2025_v45 }
 0xf44   :  { %v2014_v37 = vpop.xlane.xlu0 %2013 }
 0xf45   :  { %v4358_v31 = vpop.eup %3467  ;;  %v2026_v62 = vsub.f32 %v2002_v50, %v2014_v37 }
 0xf46   :  { %v2017_v58 = vpop.xlane.xlu1 %2016  ;;  %v1811_v3 = vsel %vm549_vm11, %v4358_v31, 0.0 }
 0xf47   :  { %v2034_v22 = vmul.f32 1.442695, %v2026_v62  ;;  %v2027_v5 = vsub.f32 %v2003_v41, %v2017_v58  ;;  %1812 = vadd.xlane.f32.xlu1 %v1811_v3 }
 0xf48   :  { %v1830_v39 = vpop.permute.xlu0 %1829 }
 0xf49   :  { %3471 = vpow2.f32 %v2034_v22  ;;  %v2036_v11 = vmul.f32 1.442695, %v2027_v5  ;;  %3215 = vmatpush3.bf16.msra.mxu1 %v1830_v39 }
 0xf4a   :  { %3216 = vmatprep.subr.bf16.mxu1 %v3552_v2 }
 0xf4b   :  { %v4363_v43 = vpop.eup %3469  ;;  %3473 = vpow2.f32 %v2036_v11  ;;  %1833 = vrot.lane.b32.xlu0 %v4232_v6, %s3557_s18 }
 0xf4c   :  { %v2042_v50 = vsel %vm549_vm11, %v4363_v43, 0.0  ;;  %3475 = vpow2.f32 %v1788_v34 }
 0xf4d   :  { %2043 = vadd.xlane.f32.xlu1 %v2042_v50  ;;  %3477 = vpow2.f32 %v1792_v61 }
 0xf4e   :  { %v2023_v44 = vpop.xlane.xlu1 %2022  ;;  %3479 = vpow2.f32 %v2032_v49 }
 0xf4f   :  { %v2029_v14 = vsub.f32 %v4330_v59, %v2023_v44 }
 0xf51   :  { %v2040_v54 = vmul.f32 1.442695, %v2029_v14 }
 0xf52   :  { %v1832_v46 = vpop.permute.xlu1 %1831 }
 0xf53   :  { %v4369_v41 = vpop.eup %3471  ;;  %3217 = vmatpush3.bf16.msra.mxu1 %v1832_v46 }
 0xf54   :  { %v2048_v57 = vsel %vm549_vm11, %v4369_v41, 0.0  ;;  %3218 = vmatprep.subr.bf16.mxu1 %v3552_v2 }
 0xf55   :  { %v4375_v28 = vpop.eup %3473  ;;  %2049 = vadd.xlane.f32.xlu1 %v2048_v57 }
 0xf56   :  { %v2051_v0 = vsel %vm549_vm11, %v4375_v28, 0.0  ;;  %v3476_v52 = vpop.eup %3475 }
 0xf57   :  { %v1802_v4 = vsel %vm549_vm11, %v3476_v52, 0.0  ;;  %v3478_v36 = vpop.eup %3477 }
 0xf58   :  { %v1808_v47 = vsel %vm549_vm11, %v3478_v36, 0.0  ;;  %v4383_v1 = vpop.eup %3479 }
 0xf59   :  { %2052 = vadd.xlane.f32.xlu1 %v2051_v0  ;;  %v2045_v32 = vsel %vm549_vm11, %v4383_v1, 0.0 }
 0xf6a   :  { %1803 = vadd.xlane.f32.xlu0 %v1802_v4 }
 0xf6e   :  { %1809 = vadd.xlane.f32.xlu0 %v1808_v47 }
 0xf72   :  { %2046 = vadd.xlane.f32.xlu0 %v2045_v32 }
 0xf79   :  { %v2020_v30 = vpop.xlane.xlu0 %2019 }
 0xf7a   :  { %v2028_v16 = vsub.f32 %v4338_v56, %v2020_v30 }
 0xf7c   :  { %v2038_v42 = vmul.f32 1.442695, %v2028_v16 }
 0xf7e   :  { %3481 = vpow2.f32 %v2038_v42 }
 0xf7f   :  { %3483 = vpow2.f32 %v2040_v54 }
 0xf88   :  { %v4389_v15 = vpop.eup %3481  ;;  %2077 = vrot.lane.b32.xlu0 %v4228_v27, %s3558_s29 }
 0xf89   :  { %v2054_v23 = vsel %vm549_vm11, %v4389_v15, 0.0  ;;  %v4395_v63 = vpop.eup %3483 }
 0xf8a   :  { %2055 = vadd.xlane.f32.xlu1 %v2054_v23  ;;  %v2057_v59 = vsel %vm549_vm11, %v4395_v63, 0.0 }
 0xf8c   :  { %2079 = vrot.lane.b32.xlu0 %v4232_v6, %s3558_s29 }
 0xf8e   :  { %2058 = vadd.xlane.f32.xlu1 %v2057_v59 }
 0xf9f   :  { %2075 = vrot.lane.b32.xlu1 %v4224_v25, %s3558_s29 }
 0xfc2   :  { %v1798_v56 = vpop.xlane.xlu0 %1797 }
 0xfc3   :  { %3485 = vrcp.f32 %v1798_v56 }
 0xfc4   :  { %v1801_v33 = vpop.xlane.xlu1 %1800 }
 0xfc5   :  { %3487 = vrcp.f32 %v1801_v33 }
 0xfc6   :  { %v1834_v27 = vpop.permute.xlu0 %1833 }
 0xfc7   :  { %3219 = vmatpush3.bf16.msra.mxu1 %v1834_v27 }
 0xfc8   :  { %3250 = vmatprep.subr.bf16.mxu1 %v3552_v2 }
 0xfcd   :  { %v3486_v40 = vpop.eup %3485 }
 0xfce   :  { %v1820_v60 = vmul.f32 %v3486_v40, %v4345_v7  ;;  %v1807_v25 = vpop.xlane.xlu1 %1806 }
 0xfcf   :  { %v3488_v38 = vpop.eup %3487  ;;  %3489 = vrcp.f32 %v1807_v25 }
 0xfd0   :  { %v1821_v6 = vmul.f32 %v3488_v38, %v4349_v19 }
 0xfd2   :  { %v1826_v53 = vpack.c.bf16 %v1821_v6, %v1820_v60 }
 0xfd4   :  { %3221 = vmatmul.mubr.msk.bf16.vlgmr.msra.gmra.mrb[68].mxu1 %vm549_vm11, %v1826_v53  ;;  %v1813_v37 = vpop.xlane.xlu1 %1812 }
 0xfd5   :  { %3224 = vmatprep.mubr.msk.bf16.mxu1 %vm3553_vm0, %v3552_v2 }
 0xfd9   :  { %v3490_v58 = vpop.eup %3489 }
 0xfda   :  { %v1823_v7 = vmul.f32 %v3490_v58, %v4354_v18  ;;  %v2044_v11 = vpop.xlane.xlu1 %2043 }
 0xfe2   :  { %v2050_v46 = vpop.xlane.xlu1 %2049 }
 0xfe6   :  { %v2053_v18 = vpop.xlane.xlu1 %2052 }
 0xff7   :  { %v1804_v21 = vpop.xlane.xlu0 %1803 }
 0xff8   :  { %3491 = vrcp.f32 %v1804_v21 }
 0xffb   :  { %v1810_v62 = vpop.xlane.xlu0 %1809 }
 0xffc   :  { %3493 = vrcp.f32 %v1810_v62 }
 0xffd   :  { %3495 = vrcp.f32 %v1813_v37 }
 0xfff   :  { %v2047_v57 = vpop.xlane.xlu0 %2046 }
0x1000   :  { %3497 = vrcp.f32 %v2047_v57 }
0x1001   :  { %3499 = vrcp.f32 %v2044_v11 }
0x1002   :  { %v3492_v3 = vpop.eup %3491  ;;  %3501 = vrcp.f32 %v2053_v18 }
0x1003   :  { %v1822_v22 = vmul.f32 %v3492_v3, %v3476_v52  ;;  %v2078_v61 = vpop.permute.xlu0 %2077  ;;  %3503 = vrcp.f32 %v2050_v46 }
0x1005   :  { %v1827_v19 = vpack.c.bf16 %v1823_v7, %v1822_v22 }
0x1006   :  { %v3494_v5 = vpop.eup %3493 }
0x1007   :  { %3225 = vmatmul.mubr.msk.bf16.gmra.mrb[72].mxu1 %vm549_vm11, %v1827_v19  ;;  %v3496_v39 = vpop.eup %3495  ;;  %v1824_v50 = vmul.f32 %v3494_v5, %v3478_v36  ;;  %v2080_v4 = vpop.permute.xlu0 %2079  ;;  %v3357_v36 = vld [vmem:[%s4601_s7 + $0x10] sm:$0xff]  }
0x1008   :  { %3228 = vmatprep.mubr.msk.bf16.mxu1 %vm3553_vm0, %v3552_v2  ;;  %v1825_v44 = vmul.f32 %v3496_v39, %v4358_v31 }
0x100a   :  { %v1828_v10 = vpack.c.bf16 %v1825_v44, %v1824_v50  ;;  %v3498_v31 = vpop.eup %3497 }
0x100b   :  { %v3500_v45 = vpop.eup %3499  ;;  %v2067_v49 = vmul.f32 %v3498_v31, %v4383_v1 }
0x100c   :  { %v2066_v52 = vmul.f32 %v3500_v45, %v4363_v43  ;;  %v3502_v32 = vpop.eup %3501 }
0x100d   :  { %v3504_v14 = vpop.eup %3503  ;;  %v2069_v43 = vmul.f32 %v3502_v32, %v4375_v28 }
0x100e   :  { %v2072_v47 = vpack.c.bf16 %v2067_v49, %v2066_v52  ;;  %v2068_v1 = vmul.f32 %v3504_v14, %v4369_v41  ;;  %v3358_v41 = vld [vmem:[%s4601_s7 + $0x18] sm:$0xff]  }
0x100f   :  { %3229 = vmatmul.mubr.msk.bf16.gmra.mrb[76].mxu1 %vm549_vm11, %v1828_v10  ;;  %3269 = vmatpush3.bf16.msra.mxu0 %v3358_v41 }
0x1010   :  { %3256 = vmatprep.mubr.msk.bf16.mxu1 %vm3553_vm0, %v3552_v2  ;;  %v2073_v30 = vpack.c.bf16 %v2069_v43, %v2068_v1  ;;  %3296 = vmatprep.subr.bf16.mxu0 %v3552_v2 }
0x1017   :  { %v2056_v34 = vpop.xlane.xlu1 %2055 }
0x101b   :  { %v2059_v9 = vpop.xlane.xlu1 %2058 }
0x101c   :  { %3505 = vrcp.f32 %v2059_v9 }
0x101d   :  { %3507 = vrcp.f32 %v2056_v34 }
0x101f   :  { %v2076_v0 = vpop.permute.xlu1 %2075 }
0x1020   :  { %3251 = vmatpush3.bf16.msra.mxu1 %v2076_v0 }
0x1021   :  { %3252 = vmatprep.subr.bf16.mxu1 %v3552_v2 }
0x1024   :  { %3253 = vmatpush3.bf16.msra.mxu1 %v2078_v61 }
0x1025   :  { %3254 = vmatprep.subr.bf16.mxu1 %v3552_v2 }
0x1026   :  { %v3506_v16 = vpop.eup %3505 }
0x1027   :  { %v3508_v54 = vpop.eup %3507  ;;  %v2071_v42 = vmul.f32 %v3506_v16, %v4395_v63 }
0x1028   :  { %3255 = vmatpush3.bf16.msra.mxu1 %v2080_v4  ;;  %v2070_v23 = vmul.f32 %v3508_v54, %v4389_v15 }
0x1029   :  { %3282 = vmatprep.subr.bf16.mxu1 %v3552_v2 }
0x102a   :  { %v2074_v59 = vpack.c.bf16 %v2071_v42, %v2070_v23 }
0x102b   :  { %3257 = vmatmul.mubr.msk.bf16.vlgmr.msra.gmra.mrb[80].mxu1 %vm549_vm11, %v2072_v47 }
0x102c   :  { %3260 = vmatprep.mubr.msk.bf16.mxu1 %vm3553_vm0, %v3552_v2  ;;  %3283 = vmatpush3.bf16.msra.mxu1 %v3357_v36 }
0x102d   :  { %3312 = vmatprep.subr.bf16.mxu1 %v3552_v2 }
0x1033   :  { %3261 = vmatmul.mubr.msk.bf16.gmra.mrb[84].mxu1 %vm549_vm11, %v2073_v30 }
0x1034   :  { %3264 = vmatprep.mubr.msk.bf16.mxu1 %vm3553_vm0, %v3552_v2 }
0x103b   :  { %3265 = vmatmul.mubr.msk.bf16.gmra.mrb[88].mxu1 %vm549_vm11, %v2074_v59 }
0x103c   :  { %3284 = vmatprep.mubr.msk.bf16.mxu1 %vm3553_vm0, %v3552_v2 }
0x10a7   :  { %v1881_v28 = vpop.f32.mrb[68].mxu1 }
0x10a8   :  { %v3222_v56 = vpop.f32.mrb[69].mxu1 }
0x10a9   :  { %v1884_v33 = vpop.f32.mrb[70].mxu1 }
0x10aa   :  { %v1904_v27 = vpack.c.bf16 %v1884_v33, %v1881_v28  ;;  %v3223_v63 = vpop.f32.mrb[71].mxu1 }
0x10ac   :  { %3285 = vmatmul.mubr.msk.bf16.vlgmr.msra.gmra.mrb[92].mxu1 %vm461_vm10, %v1904_v27 }
0x10ad   :  { %3288 = vmatprep.mubr.msk.bf16.mxu1 %vm3553_vm0, %v3552_v2 }
0x10da   :  { %v1889_v15 = vpop.f32.mrb[72].mxu1 }
0x10db   :  { %v3226_v40 = vpop.f32.mrb[73].mxu1 }
0x10dc   :  { %v1892_v38 = vpop.f32.mrb[74].mxu1 }
0x10dd   :  { %v1905_v60 = vpack.c.bf16 %v1892_v38, %v1889_v15  ;;  %v3227_v6 = vpop.f32.mrb[75].mxu1 }
0x10df   :  { %3289 = vmatmul.mubr.msk.bf16.gmra.mrb[96].mxu1 %vm461_vm10, %v1905_v60 }
0x10e0   :  { %3292 = vmatprep.mubr.msk.bf16.mxu1 %vm3553_vm0, %v3552_v2 }
0x10e2   :  { %v1897_v53 = vpop.f32.mrb[76].mxu1 }
0x10e3   :  { %v3230_v25 = vpop.f32.mrb[77].mxu1 }
0x10e4   :  { %v1900_v21 = vpop.f32.mrb[78].mxu1 }
0x10e5   :  { %v1906_v37 = vpack.c.bf16 %v1900_v21, %v1897_v53  ;;  %v3231_v62 = vpop.f32.mrb[79].mxu1 }
0x10e7   :  { %3293 = vmatmul.mubr.msk.bf16.gmra.mrb[100].mxu1 %vm461_vm10, %v1906_v37 }
0x10e8   :  { %3320 = vmatprep.mubr.msk.bf16.mxu1 %vm3553_vm0, %v3552_v2 }
0x10fe   :  { %v2127_v58 = vpop.f32.mrb[80].mxu1 }
0x10ff   :  { %v3258_v3 = vpop.f32.mrb[81].mxu1 }
0x1100   :  { %v2130_v22 = vpop.f32.mrb[82].mxu1 }
0x1101   :  { %v2150_v7 = vpack.c.bf16 %v2130_v22, %v2127_v58  ;;  %v3259_v19 = vpop.f32.mrb[83].mxu1 }
0x1103   :  { %3271 = vmatmul.mubr.msk.bf16.vlgmr.msra.gmra.mrb[88].mxu0 %vm461_vm10, %v2150_v7 }
0x1104   :  { %3274 = vmatprep.mubr.msk.bf16.mxu0 %vm3553_vm0, %v3552_v2 }
0x1106   :  { %v2135_v5 = vpop.f32.mrb[84].mxu1 }
0x1107   :  { %v3262_v39 = vpop.f32.mrb[85].mxu1 }
0x1108   :  { %v2138_v11 = vpop.f32.mrb[86].mxu1 }
0x1109   :  { %v2151_v50 = vpack.c.bf16 %v2138_v11, %v2135_v5  ;;  %v3263_v44 = vpop.f32.mrb[87].mxu1 }
0x110b   :  { %3275 = vmatmul.mubr.msk.bf16.gmra.mrb[92].mxu0 %vm461_vm10, %v2151_v50 }
0x110c   :  { %3278 = vmatprep.mubr.msk.bf16.mxu0 %vm3553_vm0, %v3552_v2 }
0x110e   :  { %v2143_v46 = vpop.f32.mrb[88].mxu1 }
0x110f   :  { %v3266_v10 = vpop.f32.mrb[89].mxu1 }
0x1110   :  { %v2146_v18 = vpop.f32.mrb[90].mxu1 }
0x1111   :  { %v2152_v57 = vpack.c.bf16 %v2146_v18, %v2143_v46  ;;  %v3267_v34 = vpop.f32.mrb[91].mxu1 }
0x1113   :  { %3279 = vmatmul.mubr.msk.bf16.gmra.mrb[96].mxu0 %vm461_vm10, %v2152_v57 }
0x1114   :  { %3300 = vmatprep.mubr.msk.bf16.mxu0 %vm3553_vm0, %v3552_v2 }
0x117f   :  { %v2274_v9 = vpop.f32.mrb[92].mxu1 }
0x1180   :  { %v3286_v0 = vpop.f32.mrb[93].mxu1 }
0x1181   :  { %v2277_v61 = vpop.f32.mrb[94].mxu1 }
0x1182   :  { %v3287_v31 = vpop.f32.mrb[95].mxu1 }
0x11b2   :  { %v2282_v45 = vpop.f32.mrb[96].mxu1 }
0x11b3   :  { %v3290_v49 = vpop.f32.mrb[97].mxu1 }
0x11b4   :  { %v2285_v52 = vpop.f32.mrb[98].mxu1 }
0x11b5   :  { %v3291_v4 = vpop.f32.mrb[99].mxu1 }
0x11ba   :  { %v2290_v36 = vpop.f32.mrb[100].mxu1 }
0x11bb   :  { %v3294_v47 = vpop.f32.mrb[101].mxu1 }
0x11bc   :  { %v2293_v32 = vpop.f32.mrb[102].mxu1 }
0x11bd   :  { %v3295_v14 = vpop.f32.mrb[103].mxu1 }
0x11d6   :  { %v2202_v43 = vpop.f32.mrb[88].mxu0 }
0x11d7   :  { %v2275_v1 = vadd.f32 %v2274_v9, %v2202_v43  ;;  %v3272_v30 = vpop.f32.mrb[89].mxu0 }
0x11d8   :  { %v2205_v16 = vpop.f32.mrb[90].mxu0 }
0x11d9   :  { %v2297_v54 = vadd.f32 %v2275_v1, %v4184_v12  ;;  %v2278_v42 = vadd.f32 %v2277_v61, %v2205_v16  ;;  %v3273_v23 = vpop.f32.mrb[91].mxu0 }
0x11db   :  { %v2298_v59 = vadd.f32 %v2278_v42, %v4188_v35  ;;  %v2307_v41 = vadd.f32 %v3646_v13, %v2297_v54 }
0x11dd   :  { %v2313_v28 = vsel %vm239_vm9, %v2307_v41, 0.0  ;;  %v2308_v56 = vadd.f32 %v3646_v13, %v2298_v59 }
0x11de   :  { %2314 = vadd.xlane.f32.xlu0 %v2313_v28  ;;  %v2210_v33 = vpop.f32.mrb[92].mxu0  ;;  %v3360_v28 = vld [vmem:[%s4602_s9 + $0x18] sm:$0xff]  }
0x11df   :  { %v2283_v27 = vadd.f32 %v2282_v45, %v2210_v33  ;;  %v3276_v63 = vpop.f32.mrb[93].mxu0  ;;  %v2316_v15 = vsel %vm239_vm9, %v2308_v56, 0.0 }
0x11e0   :  { %2317 = vadd.xlane.f32.xlu1 %v2316_v15  ;;  %v2213_v40 = vpop.f32.mrb[94].mxu0 }
0x11e1   :  { %v2299_v12 = vadd.f32 %v2283_v27, %v4198_v8  ;;  %v2286_v38 = vadd.f32 %v2285_v52, %v2213_v40  ;;  %v3277_v60 = vpop.f32.mrb[95].mxu0 }
0x11e3   :  { %v2300_v35 = vadd.f32 %v2286_v38, %v4201_v48  ;;  %v2309_v6 = vadd.f32 %v3646_v13, %v2299_v12 }
0x11e5   :  { %v2319_v53 = vsel %vm239_vm9, %v2309_v6, 0.0  ;;  %v2310_v25 = vadd.f32 %v3646_v13, %v2300_v35 }
0x11e6   :  { %2320 = vadd.xlane.f32.xlu0 %v2319_v53  ;;  %v2218_v21 = vpop.f32.mrb[96].mxu0 }
0x11e7   :  { %v2291_v37 = vadd.f32 %v2290_v36, %v2218_v21  ;;  %v3280_v62 = vpop.f32.mrb[97].mxu0  ;;  %v2322_v8 = vsel %vm239_vm9, %v2310_v25, 0.0 }
0x11e8   :  { %v2221_v58 = vpop.f32.mrb[98].mxu0 }
0x11e9   :  { %v2301_v3 = vadd.f32 %v2291_v37, %v4211_v55  ;;  %v2294_v22 = vadd.f32 %v2293_v32, %v2221_v58  ;;  %v3281_v7 = vpop.f32.mrb[99].mxu0 }
0x11ea   :  { %2323 = vadd.xlane.f32.xlu0 %v2322_v8 }
0x11eb   :  { %v2302_v48 = vadd.f32 %v2294_v22, %v4214_v51  ;;  %v2311_v19 = vadd.f32 %v3646_v13, %v2301_v3 }
0x11ed   :  { %v2325_v5 = vsel %vm239_vm9, %v2311_v19, 0.0  ;;  %v2312_v39 = vadd.f32 %v3646_v13, %v2302_v48 }
0x11ee   :  { %2326 = vadd.xlane.f32.xlu0 %v2325_v5 }
0x11ef   :  { %v2328_v11 = vsel %vm239_vm9, %v2312_v39, 0.0 }
0x11f0   :  { %2329 = vadd.xlane.f32.xlu1 %v2328_v11 }
0x126b   :  { %v2315_v50 = vpop.xlane.xlu0 %2314 }
0x126c   :  { %v2331_v44 = vmul.f32 0.03125, %v2315_v50 }
0x126d   :  { %v2318_v55 = vpop.xlane.xlu1 %2317 }
0x126e   :  { %v2337_v46 = vsub.f32 %v2307_v41, %v2331_v44  ;;  %v2332_v10 = vmul.f32 0.03125, %v2318_v55  ;;  %v3359_v41 = vld [vmem:[%s4602_s9 + $0x10] sm:$0xff]  }
0x126f   :  { %3297 = vmatpush3.bf16.msra.mxu0 %v3359_v41 }
0x1270   :  { %v2338_v18 = vsub.f32 %v2308_v56, %v2332_v10  ;;  %v2343_v57 = vmul.f32 %v2337_v46, %v2337_v46  ;;  %3298 = vmatprep.subr.bf16.mxu0 %v3552_v2 }
0x1272   :  { %v2349_v34 = vsel %vm239_vm9, %v2343_v57, 0.0  ;;  %v2344_v51 = vmul.f32 %v2338_v18, %v2338_v18 }
0x1273   :  { %v2321_v9 = vpop.xlane.xlu0 %2320  ;;  %2350 = vadd.xlane.f32.xlu0 %v2349_v34  ;;  %3299 = vmatpush3.bf16.msra.mxu0 %v3360_v28 }
0x1274   :  { %v2333_v0 = vmul.f32 0.03125, %v2321_v9  ;;  %v2352_v61 = vsel %vm239_vm9, %v2344_v51, 0.0 }
0x1275   :  { %2353 = vadd.xlane.f32.xlu1 %v2352_v61 }
0x1276   :  { %v2339_v13 = vsub.f32 %v2309_v6, %v2333_v0 }
0x1277   :  { %v2324_v31 = vpop.xlane.xlu0 %2323 }
0x1278   :  { %v2334_v45 = vmul.f32 0.03125, %v2324_v31  ;;  %v2345_v49 = vmul.f32 %v2339_v13, %v2339_v13 }
0x127a   :  { %v2340_v52 = vsub.f32 %v2310_v25, %v2334_v45  ;;  %v2355_v4 = vsel %vm239_vm9, %v2345_v49, 0.0 }
0x127b   :  { %2356 = vadd.xlane.f32.xlu0 %v2355_v4  ;;  %v2327_v36 = vpop.xlane.xlu0 %2326 }
0x127c   :  { %v2335_v47 = vmul.f32 0.03125, %v2327_v36  ;;  %v2346_v32 = vmul.f32 %v2340_v52, %v2340_v52 }
0x127d   :  { %v2330_v14 = vpop.xlane.xlu1 %2329 }
0x127e   :  { %v2341_v43 = vsub.f32 %v2311_v19, %v2335_v47  ;;  %v2336_v1 = vmul.f32 0.03125, %v2330_v14  ;;  %v2358_v30 = vsel %vm239_vm9, %v2346_v32, 0.0  ;;  %v3361_v47 = vld [vmem:[%s4603_s11 + $0x20] sm:$0xff]   ;;  %v3364_v32 = vld [vmem:[%s4603_s11 + $0x38] sm:$0xff]  }
0x127f   :  { %2359 = vadd.xlane.f32.xlu1 %v2358_v30  ;;  %3313 = vmatpush3.bf16.msra.mxu1 %v3361_v47  ;;  %v2887_v14 = vld [vmem:[%s4604_s10 + $0x1] ss:$0 sm:$0xff] }
0x1280   :  { %v2342_v16 = vsub.f32 %v2312_v39, %v2336_v1  ;;  %v2347_v54 = vmul.f32 %v2341_v43, %v2341_v43  ;;  %3314 = vmatprep.subr.bf16.mxu1 %v3552_v2 }
0x1282   :  { %v2361_v42 = vsel %vm239_vm9, %v2347_v54, 0.0  ;;  %v2348_v23 = vmul.f32 %v2342_v16, %v2342_v16 }
0x1283   :  { %2362 = vadd.xlane.f32.xlu0 %v2361_v42 }
0x1284   :  { %v2364_v59 = vsel %vm239_vm9, %v2348_v23, 0.0 }
0x1285   :  { %2365 = vadd.xlane.f32.xlu1 %v2364_v59 }
0x1300   :  { %v2351_v56 = vpop.xlane.xlu0 %2350 }
0x1301   :  { %v2367_v33 = vmul.f32 0.03125, %v2351_v56 }
0x1302   :  { %v2354_v27 = vpop.xlane.xlu1 %2353 }
0x1303   :  { %v2373_v63 = vadd.f32 1e-12, %v2367_v33  ;;  %v2368_v15 = vmul.f32 0.03125, %v2354_v27 }
0x1305   :  { %3509 = vrsqrt.f32 %v2373_v63  ;;  %v2374_v40 = vadd.f32 1e-12, %v2368_v15 }
0x1307   :  { %3511 = vrsqrt.f32 %v2374_v40 }
0x1308   :  { %v2357_v12 = vpop.xlane.xlu0 %2356 }
0x1309   :  { %v2369_v38 = vmul.f32 0.03125, %v2357_v12 }
0x130b   :  { %v2375_v60 = vadd.f32 1e-12, %v2369_v38 }
0x130c   :  { %v2360_v35 = vpop.xlane.xlu1 %2359 }
0x130d   :  { %3513 = vrsqrt.f32 %v2375_v60  ;;  %v2370_v6 = vmul.f32 0.03125, %v2360_v35 }
0x130f   :  { %v3510_v53 = vpop.eup %3509  ;;  %v2376_v25 = vadd.f32 1e-12, %v2370_v6 }
0x1310   :  { %v2385_v21 = vmul.f32 %v3510_v53, %v2337_v46  ;;  %v2363_v37 = vpop.xlane.xlu0 %2362 }
0x1311   :  { %v3512_v62 = vpop.eup %3511  ;;  %3515 = vrsqrt.f32 %v2376_v25  ;;  %v2371_v58 = vmul.f32 0.03125, %v2363_v37 }
0x1312   :  { %v2395_v3 = vmul.f32 %v3658_v20, %v2385_v21  ;;  %v2386_v22 = vmul.f32 %v3512_v62, %v2338_v18  ;;  %v2366_v7 = vpop.xlane.xlu1 %2365 }
0x1313   :  { %v2377_v8 = vadd.f32 1e-12, %v2371_v58  ;;  %v2372_v48 = vmul.f32 0.03125, %v2366_v7 }
0x1314   :  { %v4494_v19 = vadd.f32 %v3652_v17, %v2395_v3  ;;  %v2396_v5 = vmul.f32 %v3658_v20, %v2386_v22 }
0x1315   :  { %3517 = vrsqrt.f32 %v2377_v8  ;;  %v2378_v39 = vadd.f32 1e-12, %v2372_v48 }
0x1316   :  { %v4498_v11 = vadd.f32 %v3652_v17, %v2396_v5 }
0x1317   :  { %v3514_v50 = vpop.eup %3513  ;;  %3519 = vrsqrt.f32 %v2378_v39 }
0x1318   :  { %v2387_v44 = vmul.f32 %v3514_v50, %v2339_v13  ;;  %v2411_v55 = vpack.c.bf16 %v4498_v11, %v4494_v19 }
0x131a   :  { %3301 = vmatmul.mubr.msk.bf16.vlgmr.msra.gmra.mrb[100].mxu0 %vm239_vm9, %v2411_v55  ;;  %v2397_v46 = vmul.f32 %v3658_v20, %v2387_v44 }
0x131b   :  { %v3516_v10 = vpop.eup %3515  ;;  %3304 = vmatprep.mubr.msk.bf16.mxu0 %vm3553_vm0, %v3552_v2 }
0x131c   :  { %v2388_v18 = vmul.f32 %v3516_v10, %v2340_v52  ;;  %v4507_v57 = vadd.f32 %v3652_v17, %v2397_v46 }
0x131e   :  { %v2398_v34 = vmul.f32 %v3658_v20, %v2388_v18 }
0x131f   :  { %v3518_v51 = vpop.eup %3517 }
0x1320   :  { %v2389_v9 = vmul.f32 %v3518_v51, %v2341_v43  ;;  %v4511_v0 = vadd.f32 %v3652_v17, %v2398_v34 }
0x1321   :  { %v3520_v61 = vpop.eup %3519 }
0x1322   :  { %v2390_v13 = vmul.f32 %v3520_v61, %v2342_v16  ;;  %v2412_v31 = vpack.c.bf16 %v4511_v0, %v4507_v57  ;;  %v2399_v45 = vmul.f32 %v3658_v20, %v2389_v9 }
0x1324   :  { %3305 = vmatmul.mubr.msk.bf16.gmra.mrb[104].mxu0 %vm239_vm9, %v2412_v31  ;;  %v2400_v49 = vmul.f32 %v3658_v20, %v2390_v13  ;;  %v4519_v52 = vadd.f32 %v3652_v17, %v2399_v45  ;;  %v3362_v20 = vld [vmem:[%s4603_s11 + $0x28] sm:$0xff]  }
0x1325   :  { %3308 = vmatprep.mubr.msk.bf16.mxu0 %vm3553_vm0, %v3552_v2  ;;  %3315 = vmatpush3.bf16.msra.mxu1 %v3362_v20 }
0x1326   :  { %v4524_v4 = vadd.f32 %v3652_v17, %v2400_v49  ;;  %3316 = vmatprep.subr.bf16.mxu1 %v3552_v2  ;;  %v3363_v17 = vld [vmem:[%s4603_s11 + $0x30] sm:$0xff]  }
0x1328   :  { %v2413_v36 = vpack.c.bf16 %v4524_v4, %v4519_v52 }
0x1329   :  { %3317 = vmatpush3.bf16.msra.mxu1 %v3363_v17 }
0x132a   :  { %3318 = vmatprep.subr.bf16.mxu1 %v3552_v2 }
0x132c   :  { %3309 = vmatmul.mubr.msk.bf16.gmra.mrb[108].mxu0 %vm239_vm9, %v2413_v36 }
0x132d   :  { %3319 = vmatpush3.bf16.msra.mxu1 %v3364_v32 }
0x13ed   :  { %v2475_v43 = vpop.f32.mrb[100].mxu0 }
0x13ee   :  { %v2476_v1 = vadd.f32 %v2887_v14, %v2475_v43  ;;  %v3302_v30 = vpop.f32.mrb[101].mxu0 }
0x13ef   :  { %v2478_v16 = vpop.f32.mrb[102].mxu0 }
0x13f0   :  { %v2504_v54 = vmul.f32 0.044715, %v2476_v1  ;;  %v2479_v42 = vadd.f32 %v2887_v14, %v2478_v16  ;;  %v3303_v23 = vpop.f32.mrb[103].mxu0  ;;  %v2498_v45 = vmul.f32 0.5, %v2476_v1 }
0x13f2   :  { %v2510_v59 = vmul.f32 %v2504_v54, %v2476_v1  ;;  %v2505_v41 = vmul.f32 0.044715, %v2479_v42  ;;  %v2499_v49 = vmul.f32 0.5, %v2479_v42 }
0x13f4   :  { %v2516_v28 = vmul.f32 %v2510_v59, %v2476_v1  ;;  %v2511_v56 = vmul.f32 %v2505_v41, %v2479_v42 }
0x13f6   :  { %v2522_v33 = vadd.f32 %v2516_v28, %v2476_v1  ;;  %v2517_v27 = vmul.f32 %v2511_v56, %v2479_v42 }
0x13f7   :  { %v2483_v63 = vpop.f32.mrb[104].mxu0 }
0x13f8   :  { %v2528_v15 = vmul.f32 0.7978846, %v2522_v33  ;;  %v2523_v40 = vadd.f32 %v2517_v27, %v2479_v42  ;;  %v2484_v12 = vadd.f32 %v2887_v14, %v2483_v63  ;;  %v3306_v38 = vpop.f32.mrb[105].mxu0 }
0x13f9   :  { %v2486_v60 = vpop.f32.mrb[106].mxu0 }
0x13fa   :  { %3521 = vtanh.f32 %v2528_v15  ;;  %v2529_v35 = vmul.f32 0.7978846, %v2523_v40  ;;  %v2506_v6 = vmul.f32 0.044715, %v2484_v12  ;;  %v2487_v53 = vadd.f32 %v2887_v14, %v2486_v60  ;;  %v3307_v25 = vpop.f32.mrb[107].mxu0 }
0x13fb   :  { %v2500_v42 = vmul.f32 0.5, %v2484_v12 }
0x13fc   :  { %3523 = vtanh.f32 %v2529_v35  ;;  %v2512_v21 = vmul.f32 %v2506_v6, %v2484_v12  ;;  %v2507_v37 = vmul.f32 0.044715, %v2487_v53  ;;  %v2501_v59 = vmul.f32 0.5, %v2487_v53 }
0x13fe   :  { %v2518_v62 = vmul.f32 %v2512_v21, %v2484_v12  ;;  %v2513_v58 = vmul.f32 %v2507_v37, %v2487_v53 }
0x13ff   :  { %v2491_v3 = vpop.f32.mrb[108].mxu0 }
0x1400   :  { %v2524_v22 = vadd.f32 %v2518_v62, %v2484_v12  ;;  %v2519_v7 = vmul.f32 %v2513_v58, %v2487_v53  ;;  %v2492_v8 = vadd.f32 %v2887_v14, %v2491_v3  ;;  %v3310_v48 = vpop.f32.mrb[109].mxu0 }
0x1401   :  { %v2494_v5 = vpop.f32.mrb[110].mxu0 }
0x1402   :  { %v2530_v39 = vmul.f32 0.7978846, %v2524_v22  ;;  %v2525_v50 = vadd.f32 %v2519_v7, %v2487_v53  ;;  %v2508_v44 = vmul.f32 0.044715, %v2492_v8  ;;  %v2495_v55 = vadd.f32 %v2887_v14, %v2494_v5  ;;  %v3311_v46 = vpop.f32.mrb[111].mxu0 }
0x1403   :  { %v2502_v40 = vmul.f32 0.5, %v2492_v8 }
0x1404   :  { %v3522_v10 = vpop.eup %3521  ;;  %3525 = vtanh.f32 %v2530_v39  ;;  %v2531_v18 = vmul.f32 0.7978846, %v2525_v50  ;;  %v2514_v34 = vmul.f32 %v2508_v44, %v2492_v8  ;;  %v2509_v51 = vmul.f32 0.044715, %v2495_v55 }
0x1405   :  { %v2540_v9 = vadd.f32 1.0, %v3522_v10  ;;  %v2503_v38 = vmul.f32 0.5, %v2495_v55 }
0x1406   :  { %v3524_v61 = vpop.eup %3523  ;;  %3527 = vtanh.f32 %v2531_v18  ;;  %v2520_v13 = vmul.f32 %v2514_v34, %v2492_v8  ;;  %v2515_v31 = vmul.f32 %v2509_v51, %v2495_v55 }
0x1407   :  { %v2541_v36 = vadd.f32 1.0, %v3524_v61  ;;  %v2546_v17 = vmul.f32 %v2540_v9, %v2498_v45 }
0x1408   :  { %v2526_v47 = vadd.f32 %v2520_v13, %v2492_v8  ;;  %v2521_v20 = vmul.f32 %v2515_v31, %v2495_v55 }
0x1409   :  { %v2547_v32 = vmul.f32 %v2541_v36, %v2499_v49 }
0x140a   :  { %v2532_v43 = vmul.f32 0.7978846, %v2526_v47  ;;  %v2527_v14 = vadd.f32 %v2521_v20, %v2495_v55 }
0x140b   :  { %v2552_v30 = vpack.c.bf16 %v2547_v32, %v2546_v17 }
0x140c   :  { %3529 = vtanh.f32 %v2532_v43  ;;  %v2533_v16 = vmul.f32 0.7978846, %v2527_v14 }
0x140d   :  { %3321 = vmatmul.mubr.msk.bf16.vlgmr.msra.gmra.mrb[104].mxu1 %vm1373_vm12, %v2552_v30 }
0x140e   :  { %v3526_v54 = vpop.eup %3525  ;;  %3531 = vtanh.f32 %v2533_v16  ;;  %3324 = vmatprep.mubr.msk.bf16.mxu1 %vm3553_vm0, %v3552_v2 }
0x140f   :  { %v2542_v23 = vadd.f32 1.0, %v3526_v54 }
0x1410   :  { %v3528_v1 = vpop.eup %3527 }
0x1411   :  { %v2543_v41 = vadd.f32 1.0, %v3528_v1  ;;  %v2548_v28 = vmul.f32 %v2542_v23, %v2500_v42 }
0x1413   :  { %v2549_v56 = vmul.f32 %v2543_v41, %v2501_v59 }
0x1415   :  { %v2553_v33 = vpack.c.bf16 %v2549_v56, %v2548_v28 }
0x1416   :  { %v3530_v27 = vpop.eup %3529 }
0x1417   :  { %3325 = vmatmul.mubr.msk.bf16.gmra.mrb[108].mxu1 %vm1373_vm12, %v2553_v33  ;;  %v2544_v63 = vadd.f32 1.0, %v3530_v27 }
0x1418   :  { %v3532_v15 = vpop.eup %3531  ;;  %3328 = vmatprep.mubr.msk.bf16.mxu1 %vm3553_vm0, %v3552_v2  ;;  %vm2769_vm0 = vcmask 1044484  }
0x1419   :  { %v2545_v60 = vadd.f32 1.0, %v3532_v15  ;;  %v2550_v35 = vmul.f32 %v2544_v63, %v2502_v40 }
0x141b   :  { %v2551_v6 = vmul.f32 %v2545_v60, %v2503_v38 }
0x141d   :  { %v2554_v25 = vpack.c.bf16 %v2551_v6, %v2550_v35 }
0x141f   :  { %3329 = vmatmul.mubr.msk.bf16.gmra.mrb[112].mxu1 %vm1373_vm12, %v2554_v25 }
0x14e0   :  { %v2626_v12 = vpop.f32.mrb[104].mxu1 }
0x14e1   :  { %v2627_v53 = vadd.f32 %v2626_v12, %v3662_v24  ;;  %v3322_v21 = vpop.f32.mrb[105].mxu1 }
0x14e2   :  { %v2629_v37 = vpop.f32.mrb[106].mxu1 }
0x14e3   :  { %v2649_v62 = vadd.f32 %v2627_v53, %v4494_v19  ;;  %v2630_v58 = vadd.f32 %v2629_v37, %v3662_v24  ;;  %v3323_v3 = vpop.f32.mrb[107].mxu1 }
0x14e5   :  { %v2650_v2 = vadd.f32 %v2630_v58, %v4498_v11  ;;  %v2655_v22 = vsel %vm239_vm9, %v2649_v62, 0.0 }
0x14e6   :  { %2656 = vadd.xlane.f32.xlu0 %v2655_v22 }
0x14e7   :  { %v2658_v7 = vsel %vm239_vm9, %v2650_v2, 0.0 }
0x14ea   :  { %2659 = vadd.xlane.f32.xlu0 %v2658_v7  ;;  %v2634_v8 = vpop.f32.mrb[108].mxu1 }
0x14eb   :  { %v2635_v48 = vadd.f32 %v2634_v8, %v3662_v24  ;;  %v3326_v5 = vpop.f32.mrb[109].mxu1 }
0x14ec   :  { %v2637_v39 = vpop.f32.mrb[110].mxu1 }
0x14ed   :  { %v2651_v50 = vadd.f32 %v2635_v48, %v4507_v57  ;;  %v2638_v19 = vadd.f32 %v2637_v39, %v3662_v24  ;;  %v3327_v44 = vpop.f32.mrb[111].mxu1 }
0x14ef   :  { %v2652_v55 = vadd.f32 %v2638_v19, %v4511_v0  ;;  %v2661_v11 = vsel %vm239_vm9, %v2651_v50, 0.0 }
0x14f0   :  { %2662 = vadd.xlane.f32.xlu1 %v2661_v11 }
0x14f1   :  { %v2664_v34 = vsel %vm239_vm9, %v2652_v55, 0.0 }
0x14f2   :  { %v2642_v46 = vpop.f32.mrb[112].mxu1 }
0x14f3   :  { %v2643_v10 = vadd.f32 %v2642_v46, %v3662_v24  ;;  %v3330_v18 = vpop.f32.mrb[113].mxu1 }
0x14f4   :  { %2665 = vadd.xlane.f32.xlu1 %v2664_v34  ;;  %v2645_v51 = vpop.f32.mrb[114].mxu1 }
0x14f5   :  { %v2653_v9 = vadd.f32 %v2643_v10, %v4519_v52  ;;  %v2646_v57 = vadd.f32 %v2645_v51, %v3662_v24  ;;  %v3331_v61 = vpop.f32.mrb[115].mxu1 }
0x14f7   :  { %v2654_v13 = vadd.f32 %v2646_v57, %v4524_v4  ;;  %v2667_v0 = vsel %vm239_vm9, %v2653_v9, 0.0 }
0x14f8   :  { %2668 = vadd.xlane.f32.xlu0 %v2667_v0 }
0x14f9   :  { %v2670_v31 = vsel %vm239_vm9, %v2654_v13, 0.0 }
0x14fa   :  { %2671 = vadd.xlane.f32.xlu1 %v2670_v31 }
0x1573   :  { %v2657_v45 = vpop.xlane.xlu0 %2656 }
0x1574   :  { %v2673_v49 = vmul.f32 0.03125, %v2657_v45 }
0x1576   :  { %v2679_v36 = vsub.f32 %v2649_v62, %v2673_v49 }
0x1577   :  { %v2660_v47 = vpop.xlane.xlu0 %2659 }
0x1578   :  { %v2674_v20 = vmul.f32 0.03125, %v2660_v47  ;;  %v2685_v17 = vmul.f32 %v2679_v36, %v2679_v36 }
0x157a   :  { %v2680_v32 = vsub.f32 %v2650_v2, %v2674_v20  ;;  %v2691_v52 = vsel %vm239_vm9, %v2685_v17, 0.0 }
0x157b   :  { %2692 = vadd.xlane.f32.xlu0 %v2691_v52 }
0x157c   :  { %v2686_v24 = vmul.f32 %v2680_v32, %v2680_v32 }
0x157d   :  { %v2663_v43 = vpop.xlane.xlu1 %2662 }
0x157e   :  { %v2675_v14 = vmul.f32 0.03125, %v2663_v43  ;;  %v2694_v4 = vsel %vm239_vm9, %v2686_v24, 0.0 }
0x157f   :  { %2695 = vadd.xlane.f32.xlu0 %v2694_v4 }
0x1580   :  { %v2681_v30 = vsub.f32 %v2651_v50, %v2675_v14 }
0x1581   :  { %v2666_v16 = vpop.xlane.xlu1 %2665 }
0x1582   :  { %v2676_v54 = vmul.f32 0.03125, %v2666_v16  ;;  %v2687_v23 = vmul.f32 %v2681_v30, %v2681_v30 }
0x1584   :  { %v2682_v1 = vsub.f32 %v2652_v55, %v2676_v54  ;;  %v2697_v42 = vsel %vm239_vm9, %v2687_v23, 0.0 }
0x1585   :  { %v2669_v59 = vpop.xlane.xlu0 %2668  ;;  %2698 = vadd.xlane.f32.xlu1 %v2697_v42 }
0x1586   :  { %v2677_v41 = vmul.f32 0.03125, %v2669_v59  ;;  %v2688_v28 = vmul.f32 %v2682_v1, %v2682_v1 }
0x1587   :  { %v2672_v56 = vpop.xlane.xlu1 %2671 }
0x1588   :  { %v2683_v33 = vsub.f32 %v2653_v9, %v2677_v41  ;;  %v2678_v27 = vmul.f32 0.03125, %v2672_v56  ;;  %v2700_v63 = vsel %vm239_vm9, %v2688_v28, 0.0 }
0x1589   :  { %2701 = vadd.xlane.f32.xlu1 %v2700_v63 }
0x158a   :  { %v2684_v15 = vsub.f32 %v2654_v13, %v2678_v27  ;;  %v2689_v40 = vmul.f32 %v2683_v33, %v2683_v33 }
0x158c   :  { %v2703_v38 = vsel %vm239_vm9, %v2689_v40, 0.0  ;;  %v2690_v60 = vmul.f32 %v2684_v15, %v2684_v15 }
0x158d   :  { %2704 = vadd.xlane.f32.xlu0 %v2703_v38 }
0x158e   :  { %v2706_v35 = vsel %vm239_vm9, %v2690_v60, 0.0 }
0x158f   :  { %2707 = vadd.xlane.f32.xlu1 %v2706_v35 }
0x1608   :  { %v2693_v6 = vpop.xlane.xlu0 %2692 }
0x1609   :  { %v2709_v25 = vmul.f32 0.03125, %v2693_v6 }
0x160b   :  { %v2715_v12 = vadd.f32 1e-12, %v2709_v25 }
0x160c   :  { %v2696_v53 = vpop.xlane.xlu0 %2695 }
0x160d   :  { %3533 = vrsqrt.f32 %v2715_v12  ;;  %v2710_v21 = vmul.f32 0.03125, %v2696_v53 }
0x160f   :  { %v2716_v37 = vadd.f32 1e-12, %v2710_v21 }
0x1611   :  { %3535 = vrsqrt.f32 %v2716_v37 }
0x1612   :  { %v2699_v62 = vpop.xlane.xlu1 %2698 }
0x1613   :  { %v2711_v58 = vmul.f32 0.03125, %v2699_v62 }
0x1615   :  { %v2717_v3 = vadd.f32 1e-12, %v2711_v58 }
0x1616   :  { %v2702_v2 = vpop.xlane.xlu1 %2701 }
0x1617   :  { %v3534_v22 = vpop.eup %3533  ;;  %3537 = vrsqrt.f32 %v2717_v3  ;;  %v2712_v7 = vmul.f32 0.03125, %v2702_v2 }
0x1618   :  { %v2727_v8 = vmul.f32 %v3534_v22, %v2679_v36 }
0x1619   :  { %v2718_v48 = vadd.f32 1e-12, %v2712_v7 }
0x161a   :  { %v2737_v5 = vmul.f32 %v3673_v29, %v2727_v8  ;;  %v2705_v39 = vpop.xlane.xlu0 %2704 }
0x161b   :  { %v3536_v50 = vpop.eup %3535  ;;  %3539 = vrsqrt.f32 %v2718_v48  ;;  %v2713_v19 = vmul.f32 0.03125, %v2705_v39 }
0x161c   :  { %v2747_v44 = vadd.f32 %v3666_v26, %v2737_v5  ;;  %v2728_v55 = vmul.f32 %v3536_v50, %v2680_v32  ;;  %v2708_v11 = vpop.xlane.xlu1 %2707 }
0x161d   :  { %v2719_v46 = vadd.f32 1e-12, %v2713_v19  ;;  %v2714_v10 = vmul.f32 0.03125, %v2708_v11 }
0x161e   :  { %v2738_v18 = vmul.f32 %v3673_v29, %v2728_v55 }
0x161f   :  { %3541 = vrsqrt.f32 %v2719_v46  ;;  %v2720_v34 = vadd.f32 1e-12, %v2714_v10 }
0x1620   :  { %v2748_v51 = vadd.f32 %v3666_v26, %v2738_v18 }
0x1621   :  { %v3538_v9 = vpop.eup %3537  ;;  %3543 = vrsqrt.f32 %v2720_v34 }
0x1622   :  { %v2759_v57 = vrot.slane %v2748_v51, 7  ;;  %v2729_v61 = vmul.f32 %v3538_v9, %v2681_v30 }
0x1624   :  { %v2761_v13 = vsel %vm2760_vm13, %v2759_v57, %v2747_v44  ;;  %v2739_v0 = vmul.f32 %v3673_v29, %v2729_v61 }
0x1625   :  { %v3540_v31 = vpop.eup %3539 }
0x1626   :  { %v2749_v45 = vadd.f32 %v3666_v26, %v2739_v0  ;;  %v2730_v49 = vmul.f32 %v3540_v31, %v2682_v1 }
0x1628   :  { %v2762_v36 = vrot.slane %v2749_v45, 6  ;;  %v2740_v47 = vmul.f32 %v3673_v29, %v2730_v49 }
0x1629   :  { %v3542_v20 = vpop.eup %3541 }
0x162a   :  { %v2764_v17 = vsel %vm2763_vm14, %v2762_v36, %v2761_v13  ;;  %v2750_v32 = vadd.f32 %v3666_v26, %v2740_v47  ;;  %v2731_v52 = vmul.f32 %v3542_v20, %v2683_v33 }
0x162b   :  { %v3544_v24 = vpop.eup %3543 }
0x162c   :  { %v2765_v43 = vrot.slane %v2750_v32, 5  ;;  %v2741_v14 = vmul.f32 %v3673_v29, %v2731_v52  ;;  %v2732_v4 = vmul.f32 %v3544_v24, %v2684_v15 }
0x162e   :  { %v2767_v30 = vsel %vm2766_vm15, %v2765_v43, %v2764_v17  ;;  %v2751_v16 = vadd.f32 %v3666_v26, %v2741_v14  ;;  %v2742_v54 = vmul.f32 %v3673_v29, %v2732_v4 }
0x1630   :  { %v2768_v23 = vrot.slane %v2751_v16, 4  ;;  %v2752_v1 = vadd.f32 %v3666_v26, %v2742_v54 }
0x1632   :  { %v2770_v42 = vsel %vm2769_vm0, %v2768_v23, %v2767_v30  ;;  %v2771_v59 = vrot.slane %v2752_v1, 3 }
0x1634   :  { %v2773_v41 = vsel %vm2772_vm1, %v2771_v59, %v2770_v42 }
0x1635   :  { %2776 = vst.msk [vmem:[%s4605_s12] sm:$0x3f] %vm2775_vm2, %v2773_v41 }

</bundles_post_ra>
